<compile_context>
chip_gen: v6e
topology: v6e:2x2x1
jax: 0.10.0
libtpu: 0.0.40
codegen_flags: <defaults>
</compile_context>

<pallas_src>
import functools
import numpy as np

import jax
import jax.numpy as jnp
from jax import lax
from jax.experimental import pallas as pl
from jax.experimental.pallas import tpu as pltpu

START_TOKEN = "<START>"
STOP_TOKEN = "<STOP>"

NEG = -1e9        # finite "minus infinity" for padded rows/lanes (avoids inf-inf NaNs)
T_PAD = 128       # next-tag axis padded to one full lane register
T_SUB = 8         # prev-tag axis padded to one sublane group (multiple of 8, >= n_tags)


# ----------------------------------------------------------------------------
# Fused kernel: BiLSTM -> hidden2tag -> Viterbi recursion -> backpointer walk
# ----------------------------------------------------------------------------
def _bilstm_crf_kernel(xcat_ref, wih_ref, whh_ref, bgate_ref,
                       h0_ref, c0_ref,
                       wout_ref, bout_ref,
                       trans_ref, trans_stop_ref,
                       path_ref, score_ref,
                       xp_s, out_s, feats_s, bt_s,
                       *, start_idx, n_tags):
    S = xcat_ref.shape[0]
    H2 = h0_ref.shape[1]            # 2*hidden ([fwd | bwd] concatenated)
    H = H2 // 2
    TS = trans_ref.shape[0]         # padded prev-tag count (8 sublanes)
    TP = trans_ref.shape[1]         # padded next-tag count (128 lanes)

    # ---- (1) hoisted input projection: one (S,2E)@(2E,8H) MXU op + bias -------
    xp_s[...] = (jnp.dot(xcat_ref[...], wih_ref[...],
                         preferred_element_type=jnp.float32) + bgate_ref[...])

    whh = whh_ref[...]              # (2H, 8H) per-gate block-diagonal recurrent weights

    # ---- (2) interleaved fwd/bwd recurrence -----------------------------------
    # loop step t advances the forward chain at position t and the backward chain
    # at position S-1-t; one (1,2H)@(2H,8H) matmul serves both directions per step.
    def step(t, carry):
        h, c = carry                                            # (1, 2H) each
        gates = (xp_s[pl.ds(t, 1), :] +
                 jnp.dot(h, whh, preferred_element_type=jnp.float32))   # (1, 8H)
        i = jax.nn.sigmoid(gates[:, 0:H2])                      # [i_f | i_b]
        f = jax.nn.sigmoid(gates[:, H2:2 * H2])                 # [f_f | f_b]
        g = jnp.tanh(gates[:, 2 * H2:3 * H2])                   # [g_f | g_b]
        o = jax.nn.sigmoid(gates[:, 3 * H2:4 * H2])             # [o_f | o_b]
        c = f * c + i * g
        h = o * jnp.tanh(c)
        # merged (S, 2H) lstm-out scratch: fwd half at row t, bwd half at row S-1-t
        # (bwd value already sits at lane offset H -> masked store, no lane rotate)
        out_s[pl.ds(t, 1), 0:H] = h[:, 0:H]
        out_s[pl.ds(S - 1 - t, 1), H:H2] = h[:, H:H2]
        return (h, c)

    lax.fori_loop(0, S, step, (h0_ref[...], c0_ref[...]), unroll=True)

    # ---- (3) hidden2tag: ONE (S,2H)@(2H,128) matmul into padded tag lanes -----
    feats_s[...] = (jnp.dot(out_s[...], wout_ref[...],
                            preferred_element_type=jnp.float32) + bout_ref[...])

    # ---- (4) CRF Viterbi recursion (log-sum-exp, exactly as the reference) ----
    # prev tags i live on the 8 sublanes, next tags j on the 128 lanes.
    trans = trans_ref[...]                                      # (8, 128) [prev, next]
    rows8 = lax.broadcasted_iota(jnp.int32, (TS, TP), 0)        # sublane index i
    cols8 = lax.broadcasted_iota(jnp.int32, (TS, TP), 1)        # lane index j
    eye = rows8 == cols8                                        # hoisted out of the loop
    col1 = lax.broadcasted_iota(jnp.int32, (1, TP), 1)

    alpha0 = jnp.where(col1 == start_idx, 0.0,
                       jnp.where(col1 < n_tags, -10000.0, NEG)).astype(jnp.float32)

    def vstep(t, alpha):                                        # alpha: (1, TP) lane-resident
        # move the first 8 alpha values to the sublane axis: one select + one
        # lane-reduce on a single (8,128) vreg (exact: one nonzero per row).
        alpha_col = jnp.sum(jnp.where(eye, alpha, 0.0), axis=1, keepdims=True)   # (8, 1)
        smat = alpha_col + feats_s[pl.ds(t, 1), :] + trans      # alpha[i]+feat[j]+T[i,j]
        mx = jnp.max(smat, axis=0, keepdims=True)               # (1, TP)
        bp = jnp.min(jnp.where(smat == mx, rows8, TS), axis=0, keepdims=True)    # argmax_i
        bt_s[pl.ds(t, 1), :] = bp.astype(jnp.int32)             # lane-dense (1,128) store
        return jnp.log(jnp.sum(jnp.exp(smat - mx), axis=0, keepdims=True)) + mx

    alpha = lax.fori_loop(0, S, vstep, alpha0, unroll=True)

    # ---- (5) terminal step + on-device backpointer walk (scalar-width outputs) -
    term = alpha + trans_stop_ref[...]                          # alpha[i] + trans[i, STOP]
    mx = jnp.max(term, axis=1, keepdims=True)                   # (1, 1)
    best = jnp.min(jnp.where(term == mx, col1, TP), axis=1, keepdims=True)       # argmax
    score_ref[...] = (jnp.log(jnp.sum(jnp.exp(term - mx), axis=1, keepdims=True))
                      + mx)                                     # LSE score (as reference)
    path_ref[pl.ds(S - 1, 1), :] = best                         # (1,1) store

    def walk(k, b):                                             # b: (1,1) int32 current tag
        t = S - 1 - k
        row = bt_s[pl.ds(t, 1), :]                              # (1, TP) int32
        nb = jnp.sum(jnp.where(col1 == b, row, 0), axis=1, keepdims=True)        # row[b]
        path_ref[pl.ds(t - 1, 1), :] = nb                       # (1,1) store
        return nb

    lax.fori_loop(0, S - 1, walk, best, unroll=True)


# ----------------------------------------------------------------------------
# One-time parameter preparation (transposes, gate interleave, padding)
# ----------------------------------------------------------------------------
def prepare_params(p, stop_idx):
    H = p["w_hh_f"].shape[1]
    T = p["w_out"].shape[0]
    assert T <= T_SUB <= T_PAD

    def interleave_gate_cols(wf_t, wb_t):
        # wf_t: (Df, 4H), wb_t: (Db, 4H), PyTorch gate order [i f g o] along columns.
        # -> (Df+Db, 8H) per-gate block-diagonal matrix, gate columns
        #    [i_f i_b f_f f_b g_f g_b o_f o_b].
        df = wf_t.shape[0]
        out = jnp.zeros((df + wb_t.shape[0], 8 * H), jnp.float32)
        for g in range(4):
            out = out.at[:df, (2 * g) * H:(2 * g + 1) * H].set(wf_t[:, g * H:(g + 1) * H])
            out = out.at[df:, (2 * g + 1) * H:(2 * g + 2) * H].set(wb_t[:, g * H:(g + 1) * H])
        return out

    def interleave_gate_bias(bf, bb):
        out = jnp.zeros((1, 8 * H), jnp.float32)
        for g in range(4):
            out = out.at[0, (2 * g) * H:(2 * g + 1) * H].set(bf[g * H:(g + 1) * H])
            out = out.at[0, (2 * g + 1) * H:(2 * g + 2) * H].set(bb[g * H:(g + 1) * H])
        return out

    wout_t = p["w_out"].T                                       # (2H, T)
    trans = p["transitions"]

    return {
        "embedding": p["embedding"],
        "wih": interleave_gate_cols(p["w_ih_f"].T, p["w_ih_b"].T),     # (2E, 8H)
        "whh": interleave_gate_cols(p["w_hh_f"].T, p["w_hh_b"].T),     # (2H, 8H)
        "bgate": interleave_gate_bias(p["b_ih_f"] + p["b_hh_f"],
                                      p["b_ih_b"] + p["b_hh_b"]),      # (1, 8H)
        "h0": jnp.concatenate([p["h0"][0], p["h0"][1]], axis=1),       # (1, 2H)
        "c0": jnp.concatenate([p["c0"][0], p["c0"][1]], axis=1),       # (1, 2H)
        "wout": jnp.zeros((2 * H, T_PAD), jnp.float32).at[:, :T].set(wout_t),   # (2H, 128)
        "bout": jnp.zeros((1, T_PAD), jnp.float32).at[0, :T].set(p["b_out"]),
        "trans": jnp.full((T_SUB, T_PAD), NEG, jnp.float32).at[:T, :T].set(trans),  # (8,128)
        "trans_stop": jnp.full((1, T_PAD), NEG, jnp.float32).at[0, :T].set(trans[:, stop_idx]),
    }


# ----------------------------------------------------------------------------
# Forward wrapper: one pallas_call, batched over sentences via a parallel grid
# ----------------------------------------------------------------------------
@functools.partial(jax.jit, static_argnums=(2, 3))
def _forward_device(sentences_idx, prep, start_idx, n_tags):
    # sentences_idx: (B, S) int32 word indices (same length S per bucket).
    embeds = prep["embedding"][sentences_idx]                   # (B, S, E) gather (glue)
    xcat = jnp.concatenate([embeds, embeds[:, ::-1, :]], axis=2)  # (B, S, 2E): [fwd | rev]
    B, S, E2 = xcat.shape
    H2 = prep["h0"].shape[1]
    H = H2 // 2
    G8 = prep["wih"].shape[1]                                   # 8H

    inv = lambda b: (0, 0)                                      # grid-invariant weights
    kernel = functools.partial(_bilstm_crf_kernel, start_idx=start_idx, n_tags=n_tags)
    path, score = pl.pallas_call(
        kernel,
        grid=(B,),
        out_shape=(jax.ShapeDtypeStruct((B, S, 1), jnp.int32),
                   jax.ShapeDtypeStruct((B, 1, 1), jnp.float32)),
        in_specs=[
            pl.BlockSpec((None, S, E2), lambda b: (b, 0, 0)),   # per-sentence embeds
            pl.BlockSpec((E2, G8), inv),                        # wih
            pl.BlockSpec((H2, G8), inv),                        # whh
            pl.BlockSpec((1, G8), inv),                         # combined gate bias
            pl.BlockSpec((1, H2), inv),                         # h0
            pl.BlockSpec((1, H2), inv),                         # c0
            pl.BlockSpec((H2, T_PAD), inv),                     # hidden2tag weight
            pl.BlockSpec((1, T_PAD), inv),                      # hidden2tag bias
            pl.BlockSpec((T_SUB, T_PAD), inv),                  # transitions (prev, next)
            pl.BlockSpec((1, T_PAD), inv),                      # transitions[:, STOP]
        ],
        out_specs=(pl.BlockSpec((None, S, 1), lambda b: (b, 0, 0)),
                   pl.BlockSpec((None, 1, 1), lambda b: (b, 0, 0))),
        scratch_shapes=[
            pltpu.VMEM((S, G8), jnp.float32),      # hoisted input projections
            pltpu.VMEM((S, H2), jnp.float32),      # merged [fwd | bwd] lstm_out
            pltpu.VMEM((S, T_PAD), jnp.float32),   # lstm feats (padded tag lanes)
            pltpu.VMEM((S, T_PAD), jnp.int32),     # Viterbi backpointers
        ],
        compiler_params=pltpu.CompilerParams(
            dimension_semantics=("parallel",),     # shard sentences across cores (v7x)
            vmem_limit_bytes=32 * 1024 * 1024),
    )(xcat, prep["wih"], prep["whh"], prep["bgate"], prep["h0"], prep["c0"],
      prep["wout"], prep["bout"], prep["trans"], prep["trans_stop"])
    return score[:, 0, 0], path[:, :, 0]


def bilstm_crf_forward(sentences_idx, prep, start_idx, n_tags):
    scores, paths = _forward_device(sentences_idx, prep, start_idx, n_tags)
    jax.block_until_ready((scores, paths))
    scores = np.asarray(scores)
    paths = np.asarray(paths)
    return [(float(scores[b]), [int(t) for t in paths[b]])
            for b in range(paths.shape[0])]


# ----------------------------------------------------------------------------
# Deterministic parameter initialization (synthetic, PyTorch layout, no checkpoint)
# ----------------------------------------------------------------------------
def init_params(key, V, E, H, T, start_idx, stop_idx):
    ks = jax.random.split(key, 14)
    u = 1.0 / np.sqrt(H)

    def unif(k, shape):
        return jax.random.uniform(k, shape, jnp.float32, -u, u)

    p = {}
    p["embedding"] = jax.random.normal(ks[0], (V, E), jnp.float32)
    p["w_ih_f"] = unif(ks[1], (4 * H, E))
    p["w_hh_f"] = unif(ks[2], (4 * H, H))
    p["b_ih_f"] = unif(ks[3], (4 * H,))
    p["b_hh_f"] = unif(ks[4], (4 * H,))
    p["w_ih_b"] = unif(ks[5], (4 * H, E))
    p["w_hh_b"] = unif(ks[6], (4 * H, H))
    p["b_ih_b"] = unif(ks[7], (4 * H,))
    p["b_hh_b"] = unif(ks[8], (4 * H,))
    p["w_out"] = unif(ks[9], (T, 2 * H))
    p["b_out"] = unif(ks[10], (T,))
    trans = jax.random.normal(ks[11], (T, T), jnp.float32)
    # exactly as the module constructor: transitions[START, :]= -1e4; [:, STOP] = -1e4
    trans = trans.at[start_idx, :].set(-10000.0)
    trans = trans.at[:, stop_idx].set(-10000.0)
    p["transitions"] = trans
    # deterministic stand-in for init_hidden()'s torch.randn(2, 1, H)
    p["h0"] = jax.random.normal(ks[12], (2, 1, H), jnp.float32)
    p["c0"] = jax.random.normal(ks[13], (2, 1, H), jnp.float32)
    return p


if __name__ == "__main__":
    tag_to_ix = {"B": 0, "I": 1, "O": 2, START_TOKEN: 3, STOP_TOKEN: 4}
    word_to_ix = {f"w{i}": i for i in range(20)}
    START_IDX = tag_to_ix[START_TOKEN]
    STOP_IDX = tag_to_ix[STOP_TOKEN]

    V = len(word_to_ix)
    T = len(tag_to_ix)
    E = 32          # embedding_dim
    H = 32          # hidden_dim
    S = 8           # sentence length
    B = 2           # batch of same-length sentences (one parallel grid step each)

    key = jax.random.PRNGKey(0)
    raw_params = init_params(key, V, E, H, T, START_IDX, STOP_IDX)
    prep = prepare_params(raw_params, STOP_IDX)      # one-time, kernel-ready layout

    # deterministic "sentences" as word indices (what _prepare_sequence produces)
    sentences_idx = jnp.array([[3, 7, 1, 15, 0, 9, 12, 5],
                               [2, 4, 6, 8, 10, 11, 13, 14]], dtype=jnp.int32)

    results = bilstm_crf_forward(sentences_idx, prep, START_IDX, T)

    assert len(results) == B
    for score, tag_seq in results:
        assert len(tag_seq) == S
        assert all(0 <= t_ < T for t_ in tag_seq)
        assert np.isfinite(score)
    print("KERNEL_OK")
</pallas_src>

<mosaic_0001>
module attributes {stable_mosaic.version = 11 : i64} {
  func.func @_bilstm_crf_kernel(%arg0: i32, %arg1: memref<1x8x64xf32, #tpu.memory_space<vmem>>, %arg2: memref<64x256xf32, #tpu.memory_space<vmem>>, %arg3: memref<64x256xf32, #tpu.memory_space<vmem>>, %arg4: memref<1x256xf32, #tpu.memory_space<vmem>>, %arg5: memref<1x64xf32, #tpu.memory_space<vmem>>, %arg6: memref<1x64xf32, #tpu.memory_space<vmem>>, %arg7: memref<64x128xf32, #tpu.memory_space<vmem>>, %arg8: memref<1x128xf32, #tpu.memory_space<vmem>>, %arg9: memref<8x128xf32, #tpu.memory_space<vmem>>, %arg10: memref<1x128xf32, #tpu.memory_space<vmem>>, %arg11: memref<1x8x1xi32, #tpu.memory_space<vmem>>, %arg12: memref<1x1x1xf32, #tpu.memory_space<vmem>>, %arg13: memref<8x256xf32, #tpu.memory_space<vmem>>, %arg14: memref<8x64xf32, #tpu.memory_space<vmem>>, %arg15: memref<8x128xf32, #tpu.memory_space<vmem>>, %arg16: memref<8x128xi32, #tpu.memory_space<vmem>>) attributes {dimension_semantics = [#tpu.dimension_semantics<parallel>], iteration_bounds = array<i64: 2>, scalar_prefetch = 0 : i64, scratch_operands = 4 : i64, tpu.core_type = #tpu.core_type<tc>, window_params = [{transform_indices = @transform_0, window_bounds = array<i64: 1, 8, 64>}, {pipeline_mode = #tpu.pipeline_mode<synchronous>, transform_indices = @transform_1, window_bounds = array<i64: 64, 256>}, {pipeline_mode = #tpu.pipeline_mode<synchronous>, transform_indices = @transform_2, window_bounds = array<i64: 64, 256>}, {pipeline_mode = #tpu.pipeline_mode<synchronous>, transform_indices = @transform_3, window_bounds = array<i64: 1, 256>}, {pipeline_mode = #tpu.pipeline_mode<synchronous>, transform_indices = @transform_4, window_bounds = array<i64: 1, 64>}, {pipeline_mode = #tpu.pipeline_mode<synchronous>, transform_indices = @transform_5, window_bounds = array<i64: 1, 64>}, {pipeline_mode = #tpu.pipeline_mode<synchronous>, transform_indices = @transform_6, window_bounds = array<i64: 64, 128>}, {pipeline_mode = #tpu.pipeline_mode<synchronous>, transform_indices = @transform_7, window_bounds = array<i64: 1, 128>}, {pipeline_mode = #tpu.pipeline_mode<synchronous>, transform_indices = @transform_8, window_bounds = array<i64: 8, 128>}, {pipeline_mode = #tpu.pipeline_mode<synchronous>, transform_indices = @transform_9, window_bounds = array<i64: 1, 128>}, {transform_indices = @transform_10, window_bounds = array<i64: 1, 8, 1>}, {transform_indices = @transform_11, window_bounds = array<i64: 1, 1, 1>}]} {
    %c0 = arith.constant 0 : index
    %c0_0 = arith.constant 0 : index
    %c0_1 = arith.constant 0 : index
    %0 = vector.load %arg1[%c0, %c0_0, %c0_1] : memref<1x8x64xf32, #tpu.memory_space<vmem>>, vector<1x8x64xf32>
    %1 = vector.shape_cast %0 : vector<1x8x64xf32> to vector<8x64xf32>
    %c0_2 = arith.constant 0 : index
    %c0_3 = arith.constant 0 : index
    %2 = vector.load %arg2[%c0_2, %c0_3] : memref<64x256xf32, #tpu.memory_space<vmem>>, vector<64x256xf32>
    %cst = arith.constant dense<0.000000e+00> : vector<8x256xf32>
    %3 = tpu.matmul %1, %2, %cst {dimension_numbers = #tpu.dot_dimension_numbers<[1], [0], [0], [1], [0, 0, 1, 1], [], []>} : vector<8x64xf32>, vector<64x256xf32>, vector<8x256xf32> -> vector<8x256xf32>
    %c0_4 = arith.constant 0 : index
    %c0_5 = arith.constant 0 : index
    %4 = vector.load %arg4[%c0_4, %c0_5] : memref<1x256xf32, #tpu.memory_space<vmem>>, vector<1x256xf32>
    %5 = vector.broadcast %4 : vector<1x256xf32> to vector<8x256xf32>
    %6 = arith.addf %3, %5 : vector<8x256xf32>
    %c0_6 = arith.constant 0 : index
    %c0_7 = arith.constant 0 : index
    %7 = vector.load %arg13[%c0_6, %c0_7] : memref<8x256xf32, #tpu.memory_space<vmem>>, vector<8x256xf32>
    tpu.vector_store %arg13[%c0_6, %c0_7], %6 {strides = array<i32>} : memref<8x256xf32, #tpu.memory_space<vmem>>, vector<8x256xf32>,
    %c0_8 = arith.constant 0 : index
    %c0_9 = arith.constant 0 : index
    %8 = vector.load %arg3[%c0_8, %c0_9] : memref<64x256xf32, #tpu.memory_space<vmem>>, vector<64x256xf32>
    %c0_10 = arith.constant 0 : index
    %c0_11 = arith.constant 0 : index
    %9 = vector.load %arg5[%c0_10, %c0_11] : memref<1x64xf32, #tpu.memory_space<vmem>>, vector<1x64xf32>
    %c0_12 = arith.constant 0 : index
    %c0_13 = arith.constant 0 : index
    %10 = vector.load %arg6[%c0_12, %c0_13] : memref<1x64xf32, #tpu.memory_space<vmem>>, vector<1x64xf32>
    %c0_i32 = arith.constant 0 : i32
    %11 = arith.index_cast %c0_i32 : i32 to index
    %c0_14 = arith.constant 0 : index
    %12 = vector.load %arg13[%11, %c0_14] : memref<8x256xf32, #tpu.memory_space<vmem>>, vector<1x256xf32>
    %cst_15 = arith.constant dense<0.000000e+00> : vector<1x256xf32>
    %13 = tpu.matmul %9, %8, %cst_15 {dimension_numbers = #tpu.dot_dimension_numbers<[1], [0], [0], [1], [0, 0, 1, 1], [], []>} : vector<1x64xf32>, vector<64x256xf32>, vector<1x256xf32> -> vector<1x256xf32>
    %14 = arith.addf %12, %13 : vector<1x256xf32>
    %15 = vector.extract_strided_slice %14 {offsets = [0, 0], sizes = [1, 64], strides = [1, 1]} : vector<1x256xf32> to vector<1x64xf32>
    %16 = arith.negf %15 : vector<1x64xf32>
    %17 = math.exp %16 : vector<1x64xf32>
    %cst_16 = arith.constant 1.000000e+00 : f32
    %18 = vector.broadcast %cst_16 : f32 to vector<1x64xf32>
    %19 = arith.addf %18, %17 : vector<1x64xf32>
    %20 = arith.divf %18, %19 : vector<1x64xf32>
    %21 = vector.extract_strided_slice %14 {offsets = [0, 64], sizes = [1, 64], strides = [1, 1]} : vector<1x256xf32> to vector<1x64xf32>
    %22 = arith.negf %21 : vector<1x64xf32>
    %23 = math.exp %22 : vector<1x64xf32>
    %cst_17 = arith.constant 1.000000e+00 : f32
    %24 = vector.broadcast %cst_17 : f32 to vector<1x64xf32>
    %25 = arith.addf %24, %23 : vector<1x64xf32>
    %26 = arith.divf %24, %25 : vector<1x64xf32>
    %27 = vector.extract_strided_slice %14 {offsets = [0, 128], sizes = [1, 64], strides = [1, 1]} : vector<1x256xf32> to vector<1x64xf32>
    %28 = math.tanh %27 : vector<1x64xf32>
    %29 = vector.extract_strided_slice %14 {offsets = [0, 192], sizes = [1, 64], strides = [1, 1]} : vector<1x256xf32> to vector<1x64xf32>
    %30 = arith.negf %29 : vector<1x64xf32>
    %31 = math.exp %30 : vector<1x64xf32>
    %cst_18 = arith.constant 1.000000e+00 : f32
    %32 = vector.broadcast %cst_18 : f32 to vector<1x64xf32>
    %33 = arith.addf %32, %31 : vector<1x64xf32>
    %34 = arith.divf %32, %33 : vector<1x64xf32>
    %35 = arith.mulf %26, %10 : vector<1x64xf32>
    %36 = arith.mulf %20, %28 : vector<1x64xf32>
    %37 = arith.addf %35, %36 : vector<1x64xf32>
    %38 = math.tanh %37 : vector<1x64xf32>
    %39 = arith.mulf %34, %38 : vector<1x64xf32>
    %40 = vector.extract_strided_slice %39 {offsets = [0, 0], sizes = [1, 32], strides = [1, 1]} : vector<1x64xf32> to vector<1x32xf32>
    %41 = arith.index_cast %c0_i32 : i32 to index
    %c0_19 = arith.constant 0 : index
    %42 = vector.load %arg14[%41, %c0_19] : memref<8x64xf32, #tpu.memory_space<vmem>>, vector<1x32xf32>
    tpu.vector_store %arg14[%41, %c0_19], %40 {strides = array<i32>} : memref<8x64xf32, #tpu.memory_space<vmem>>, vector<1x32xf32>,
    %43 = vector.extract_strided_slice %39 {offsets = [0, 32], sizes = [1, 32], strides = [1, 1]} : vector<1x64xf32> to vector<1x32xf32>
    %c7_i32 = arith.constant 7 : i32
    %44 = arith.subi %c7_i32, %c0_i32 : i32
    %45 = arith.index_cast %44 : i32 to index
    %c32 = arith.constant 32 : index
    %46 = vector.load %arg14[%45, %c32] : memref<8x64xf32, #tpu.memory_space<vmem>>, vector<1x32xf32>
    tpu.vector_store %arg14[%45, %c32], %43 {strides = array<i32>} : memref<8x64xf32, #tpu.memory_space<vmem>>, vector<1x32xf32>,
    %c1_i32 = arith.constant 1 : i32
    %47 = arith.index_cast %c1_i32 : i32 to index
    %c0_20 = arith.constant 0 : index
    %48 = vector.load %arg13[%47, %c0_20] : memref<8x256xf32, #tpu.memory_space<vmem>>, vector<1x256xf32>
    %cst_21 = arith.constant dense<0.000000e+00> : vector<1x256xf32>
    %49 = tpu.matmul %39, %8, %cst_21 {dimension_numbers = #tpu.dot_dimension_numbers<[1], [0], [0], [1], [0, 0, 1, 1], [], []>} : vector<1x64xf32>, vector<64x256xf32>, vector<1x256xf32> -> vector<1x256xf32>
    %50 = arith.addf %48, %49 : vector<1x256xf32>
    %51 = vector.extract_strided_slice %50 {offsets = [0, 0], sizes = [1, 64], strides = [1, 1]} : vector<1x256xf32> to vector<1x64xf32>
    %52 = arith.negf %51 : vector<1x64xf32>
    %53 = math.exp %52 : vector<1x64xf32>
    %cst_22 = arith.constant 1.000000e+00 : f32
    %54 = vector.broadcast %cst_22 : f32 to vector<1x64xf32>
    %55 = arith.addf %54, %53 : vector<1x64xf32>
    %56 = arith.divf %54, %55 : vector<1x64xf32>
    %57 = vector.extract_strided_slice %50 {offsets = [0, 64], sizes = [1, 64], strides = [1, 1]} : vector<1x256xf32> to vector<1x64xf32>
    %58 = arith.negf %57 : vector<1x64xf32>
    %59 = math.exp %58 : vector<1x64xf32>
    %cst_23 = arith.constant 1.000000e+00 : f32
    %60 = vector.broadcast %cst_23 : f32 to vector<1x64xf32>
    %61 = arith.addf %60, %59 : vector<1x64xf32>
    %62 = arith.divf %60, %61 : vector<1x64xf32>
    %63 = vector.extract_strided_slice %50 {offsets = [0, 128], sizes = [1, 64], strides = [1, 1]} : vector<1x256xf32> to vector<1x64xf32>
    %64 = math.tanh %63 : vector<1x64xf32>
    %65 = vector.extract_strided_slice %50 {offsets = [0, 192], sizes = [1, 64], strides = [1, 1]} : vector<1x256xf32> to vector<1x64xf32>
    %66 = arith.negf %65 : vector<1x64xf32>
    %67 = math.exp %66 : vector<1x64xf32>
    %cst_24 = arith.constant 1.000000e+00 : f32
    %68 = vector.broadcast %cst_24 : f32 to vector<1x64xf32>
    %69 = arith.addf %68, %67 : vector<1x64xf32>
    %70 = arith.divf %68, %69 : vector<1x64xf32>
    %71 = arith.mulf %62, %37 : vector<1x64xf32>
    %72 = arith.mulf %56, %64 : vector<1x64xf32>
    %73 = arith.addf %71, %72 : vector<1x64xf32>
    %74 = math.tanh %73 : vector<1x64xf32>
    %75 = arith.mulf %70, %74 : vector<1x64xf32>
    %76 = vector.extract_strided_slice %75 {offsets = [0, 0], sizes = [1, 32], strides = [1, 1]} : vector<1x64xf32> to vector<1x32xf32>
    %77 = arith.index_cast %c1_i32 : i32 to index
    %c0_25 = arith.constant 0 : index
    %78 = vector.load %arg14[%77, %c0_25] : memref<8x64xf32, #tpu.memory_space<vmem>>, vector<1x32xf32>
    tpu.vector_store %arg14[%77, %c0_25], %76 {strides = array<i32>} : memref<8x64xf32, #tpu.memory_space<vmem>>, vector<1x32xf32>,
    %79 = vector.extract_strided_slice %75 {offsets = [0, 32], sizes = [1, 32], strides = [1, 1]} : vector<1x64xf32> to vector<1x32xf32>
    %c7_i32_26 = arith.constant 7 : i32
    %80 = arith.subi %c7_i32_26, %c1_i32 : i32
    %81 = arith.index_cast %80 : i32 to index
    %c32_27 = arith.constant 32 : index
    %82 = vector.load %arg14[%81, %c32_27] : memref<8x64xf32, #tpu.memory_space<vmem>>, vector<1x32xf32>
    tpu.vector_store %arg14[%81, %c32_27], %79 {strides = array<i32>} : memref<8x64xf32, #tpu.memory_space<vmem>>, vector<1x32xf32>,
    %c2_i32 = arith.constant 2 : i32
    %83 = arith.index_cast %c2_i32 : i32 to index
    %c0_28 = arith.constant 0 : index
    %84 = vector.load %arg13[%83, %c0_28] : memref<8x256xf32, #tpu.memory_space<vmem>>, vector<1x256xf32>
    %cst_29 = arith.constant dense<0.000000e+00> : vector<1x256xf32>
    %85 = tpu.matmul %75, %8, %cst_29 {dimension_numbers = #tpu.dot_dimension_numbers<[1], [0], [0], [1], [0, 0, 1, 1], [], []>} : vector<1x64xf32>, vector<64x256xf32>, vector<1x256xf32> -> vector<1x256xf32>
    %86 = arith.addf %84, %85 : vector<1x256xf32>
    %87 = vector.extract_strided_slice %86 {offsets = [0, 0], sizes = [1, 64], strides = [1, 1]} : vector<1x256xf32> to vector<1x64xf32>
    %88 = arith.negf %87 : vector<1x64xf32>
    %89 = math.exp %88 : vector<1x64xf32>
    %cst_30 = arith.constant 1.000000e+00 : f32
    %90 = vector.broadcast %cst_30 : f32 to vector<1x64xf32>
    %91 = arith.addf %90, %89 : vector<1x64xf32>
    %92 = arith.divf %90, %91 : vector<1x64xf32>
    %93 = vector.extract_strided_slice %86 {offsets = [0, 64], sizes = [1, 64], strides = [1, 1]} : vector<1x256xf32> to vector<1x64xf32>
    %94 = arith.negf %93 : vector<1x64xf32>
    %95 = math.exp %94 : vector<1x64xf32>
    %cst_31 = arith.constant 1.000000e+00 : f32
    %96 = vector.broadcast %cst_31 : f32 to vector<1x64xf32>
    %97 = arith.addf %96, %95 : vector<1x64xf32>
    %98 = arith.divf %96, %97 : vector<1x64xf32>
    %99 = vector.extract_strided_slice %86 {offsets = [0, 128], sizes = [1, 64], strides = [1, 1]} : vector<1x256xf32> to vector<1x64xf32>
    %100 = math.tanh %99 : vector<1x64xf32>
    %101 = vector.extract_strided_slice %86 {offsets = [0, 192], sizes = [1, 64], strides = [1, 1]} : vector<1x256xf32> to vector<1x64xf32>
    %102 = arith.negf %101 : vector<1x64xf32>
    %103 = math.exp %102 : vector<1x64xf32>
    %cst_32 = arith.constant 1.000000e+00 : f32
    %104 = vector.broadcast %cst_32 : f32 to vector<1x64xf32>
    %105 = arith.addf %104, %103 : vector<1x64xf32>
    %106 = arith.divf %104, %105 : vector<1x64xf32>
    %107 = arith.mulf %98, %73 : vector<1x64xf32>
    %108 = arith.mulf %92, %100 : vector<1x64xf32>
    %109 = arith.addf %107, %108 : vector<1x64xf32>
    %110 = math.tanh %109 : vector<1x64xf32>
    %111 = arith.mulf %106, %110 : vector<1x64xf32>
    %112 = vector.extract_strided_slice %111 {offsets = [0, 0], sizes = [1, 32], strides = [1, 1]} : vector<1x64xf32> to vector<1x32xf32>
    %113 = arith.index_cast %c2_i32 : i32 to index
    %c0_33 = arith.constant 0 : index
    %114 = vector.load %arg14[%113, %c0_33] : memref<8x64xf32, #tpu.memory_space<vmem>>, vector<1x32xf32>
    tpu.vector_store %arg14[%113, %c0_33], %112 {strides = array<i32>} : memref<8x64xf32, #tpu.memory_space<vmem>>, vector<1x32xf32>,
    %115 = vector.extract_strided_slice %111 {offsets = [0, 32], sizes = [1, 32], strides = [1, 1]} : vector<1x64xf32> to vector<1x32xf32>
    %c7_i32_34 = arith.constant 7 : i32
    %116 = arith.subi %c7_i32_34, %c2_i32 : i32
    %117 = arith.index_cast %116 : i32 to index
    %c32_35 = arith.constant 32 : index
    %118 = vector.load %arg14[%117, %c32_35] : memref<8x64xf32, #tpu.memory_space<vmem>>, vector<1x32xf32>
    tpu.vector_store %arg14[%117, %c32_35], %115 {strides = array<i32>} : memref<8x64xf32, #tpu.memory_space<vmem>>, vector<1x32xf32>,
    %c3_i32 = arith.constant 3 : i32
    %119 = arith.index_cast %c3_i32 : i32 to index
    %c0_36 = arith.constant 0 : index
    %120 = vector.load %arg13[%119, %c0_36] : memref<8x256xf32, #tpu.memory_space<vmem>>, vector<1x256xf32>
    %cst_37 = arith.constant dense<0.000000e+00> : vector<1x256xf32>
    %121 = tpu.matmul %111, %8, %cst_37 {dimension_numbers = #tpu.dot_dimension_numbers<[1], [0], [0], [1], [0, 0, 1, 1], [], []>} : vector<1x64xf32>, vector<64x256xf32>, vector<1x256xf32> -> vector<1x256xf32>
    %122 = arith.addf %120, %121 : vector<1x256xf32>
    %123 = vector.extract_strided_slice %122 {offsets = [0, 0], sizes = [1, 64], strides = [1, 1]} : vector<1x256xf32> to vector<1x64xf32>
    %124 = arith.negf %123 : vector<1x64xf32>
    %125 = math.exp %124 : vector<1x64xf32>
    %cst_38 = arith.constant 1.000000e+00 : f32
    %126 = vector.broadcast %cst_38 : f32 to vector<1x64xf32>
    %127 = arith.addf %126, %125 : vector<1x64xf32>
    %128 = arith.divf %126, %127 : vector<1x64xf32>
    %129 = vector.extract_strided_slice %122 {offsets = [0, 64], sizes = [1, 64], strides = [1, 1]} : vector<1x256xf32> to vector<1x64xf32>
    %130 = arith.negf %129 : vector<1x64xf32>
    %131 = math.exp %130 : vector<1x64xf32>
    %cst_39 = arith.constant 1.000000e+00 : f32
    %132 = vector.broadcast %cst_39 : f32 to vector<1x64xf32>
    %133 = arith.addf %132, %131 : vector<1x64xf32>
    %134 = arith.divf %132, %133 : vector<1x64xf32>
    %135 = vector.extract_strided_slice %122 {offsets = [0, 128], sizes = [1, 64], strides = [1, 1]} : vector<1x256xf32> to vector<1x64xf32>
    %136 = math.tanh %135 : vector<1x64xf32>
    %137 = vector.extract_strided_slice %122 {offsets = [0, 192], sizes = [1, 64], strides = [1, 1]} : vector<1x256xf32> to vector<1x64xf32>
    %138 = arith.negf %137 : vector<1x64xf32>
    %139 = math.exp %138 : vector<1x64xf32>
    %cst_40 = arith.constant 1.000000e+00 : f32
    %140 = vector.broadcast %cst_40 : f32 to vector<1x64xf32>
    %141 = arith.addf %140, %139 : vector<1x64xf32>
    %142 = arith.divf %140, %141 : vector<1x64xf32>
    %143 = arith.mulf %134, %109 : vector<1x64xf32>
    %144 = arith.mulf %128, %136 : vector<1x64xf32>
    %145 = arith.addf %143, %144 : vector<1x64xf32>
    %146 = math.tanh %145 : vector<1x64xf32>
    %147 = arith.mulf %142, %146 : vector<1x64xf32>
    %148 = vector.extract_strided_slice %147 {offsets = [0, 0], sizes = [1, 32], strides = [1, 1]} : vector<1x64xf32> to vector<1x32xf32>
    %149 = arith.index_cast %c3_i32 : i32 to index
    %c0_41 = arith.constant 0 : index
    %150 = vector.load %arg14[%149, %c0_41] : memref<8x64xf32, #tpu.memory_space<vmem>>, vector<1x32xf32>
    tpu.vector_store %arg14[%149, %c0_41], %148 {strides = array<i32>} : memref<8x64xf32, #tpu.memory_space<vmem>>, vector<1x32xf32>,
    %151 = vector.extract_strided_slice %147 {offsets = [0, 32], sizes = [1, 32], strides = [1, 1]} : vector<1x64xf32> to vector<1x32xf32>
    %c7_i32_42 = arith.constant 7 : i32
    %152 = arith.subi %c7_i32_42, %c3_i32 : i32
    %153 = arith.index_cast %152 : i32 to index
    %c32_43 = arith.constant 32 : index
    %154 = vector.load %arg14[%153, %c32_43] : memref<8x64xf32, #tpu.memory_space<vmem>>, vector<1x32xf32>
    tpu.vector_store %arg14[%153, %c32_43], %151 {strides = array<i32>} : memref<8x64xf32, #tpu.memory_space<vmem>>, vector<1x32xf32>,
    %c4_i32 = arith.constant 4 : i32
    %155 = arith.index_cast %c4_i32 : i32 to index
    %c0_44 = arith.constant 0 : index
    %156 = vector.load %arg13[%155, %c0_44] : memref<8x256xf32, #tpu.memory_space<vmem>>, vector<1x256xf32>
    %cst_45 = arith.constant dense<0.000000e+00> : vector<1x256xf32>
    %157 = tpu.matmul %147, %8, %cst_45 {dimension_numbers = #tpu.dot_dimension_numbers<[1], [0], [0], [1], [0, 0, 1, 1], [], []>} : vector<1x64xf32>, vector<64x256xf32>, vector<1x256xf32> -> vector<1x256xf32>
    %158 = arith.addf %156, %157 : vector<1x256xf32>
    %159 = vector.extract_strided_slice %158 {offsets = [0, 0], sizes = [1, 64], strides = [1, 1]} : vector<1x256xf32> to vector<1x64xf32>
    %160 = arith.negf %159 : vector<1x64xf32>
    %161 = math.exp %160 : vector<1x64xf32>
    %cst_46 = arith.constant 1.000000e+00 : f32
    %162 = vector.broadcast %cst_46 : f32 to vector<1x64xf32>
    %163 = arith.addf %162, %161 : vector<1x64xf32>
    %164 = arith.divf %162, %163 : vector<1x64xf32>
    %165 = vector.extract_strided_slice %158 {offsets = [0, 64], sizes = [1, 64], strides = [1, 1]} : vector<1x256xf32> to vector<1x64xf32>
    %166 = arith.negf %165 : vector<1x64xf32>
    %167 = math.exp %166 : vector<1x64xf32>
    %cst_47 = arith.constant 1.000000e+00 : f32
    %168 = vector.broadcast %cst_47 : f32 to vector<1x64xf32>
    %169 = arith.addf %168, %167 : vector<1x64xf32>
    %170 = arith.divf %168, %169 : vector<1x64xf32>
    %171 = vector.extract_strided_slice %158 {offsets = [0, 128], sizes = [1, 64], strides = [1, 1]} : vector<1x256xf32> to vector<1x64xf32>
    %172 = math.tanh %171 : vector<1x64xf32>
    %173 = vector.extract_strided_slice %158 {offsets = [0, 192], sizes = [1, 64], strides = [1, 1]} : vector<1x256xf32> to vector<1x64xf32>
    %174 = arith.negf %173 : vector<1x64xf32>
    %175 = math.exp %174 : vector<1x64xf32>
    %cst_48 = arith.constant 1.000000e+00 : f32
    %176 = vector.broadcast %cst_48 : f32 to vector<1x64xf32>
    %177 = arith.addf %176, %175 : vector<1x64xf32>
    %178 = arith.divf %176, %177 : vector<1x64xf32>
    %179 = arith.mulf %170, %145 : vector<1x64xf32>
    %180 = arith.mulf %164, %172 : vector<1x64xf32>
    %181 = arith.addf %179, %180 : vector<1x64xf32>
    %182 = math.tanh %181 : vector<1x64xf32>
    %183 = arith.mulf %178, %182 : vector<1x64xf32>
    %184 = vector.extract_strided_slice %183 {offsets = [0, 0], sizes = [1, 32], strides = [1, 1]} : vector<1x64xf32> to vector<1x32xf32>
    %185 = arith.index_cast %c4_i32 : i32 to index
    %c0_49 = arith.constant 0 : index
    %186 = vector.load %arg14[%185, %c0_49] : memref<8x64xf32, #tpu.memory_space<vmem>>, vector<1x32xf32>
    tpu.vector_store %arg14[%185, %c0_49], %184 {strides = array<i32>} : memref<8x64xf32, #tpu.memory_space<vmem>>, vector<1x32xf32>,
    %187 = vector.extract_strided_slice %183 {offsets = [0, 32], sizes = [1, 32], strides = [1, 1]} : vector<1x64xf32> to vector<1x32xf32>
    %c7_i32_50 = arith.constant 7 : i32
    %188 = arith.subi %c7_i32_50, %c4_i32 : i32
    %189 = arith.index_cast %188 : i32 to index
    %c32_51 = arith.constant 32 : index
    %190 = vector.load %arg14[%189, %c32_51] : memref<8x64xf32, #tpu.memory_space<vmem>>, vector<1x32xf32>
    tpu.vector_store %arg14[%189, %c32_51], %187 {strides = array<i32>} : memref<8x64xf32, #tpu.memory_space<vmem>>, vector<1x32xf32>,
    %c5_i32 = arith.constant 5 : i32
    %191 = arith.index_cast %c5_i32 : i32 to index
    %c0_52 = arith.constant 0 : index
    %192 = vector.load %arg13[%191, %c0_52] : memref<8x256xf32, #tpu.memory_space<vmem>>, vector<1x256xf32>
    %cst_53 = arith.constant dense<0.000000e+00> : vector<1x256xf32>
    %193 = tpu.matmul %183, %8, %cst_53 {dimension_numbers = #tpu.dot_dimension_numbers<[1], [0], [0], [1], [0, 0, 1, 1], [], []>} : vector<1x64xf32>, vector<64x256xf32>, vector<1x256xf32> -> vector<1x256xf32>
    %194 = arith.addf %192, %193 : vector<1x256xf32>
    %195 = vector.extract_strided_slice %194 {offsets = [0, 0], sizes = [1, 64], strides = [1, 1]} : vector<1x256xf32> to vector<1x64xf32>
    %196 = arith.negf %195 : vector<1x64xf32>
    %197 = math.exp %196 : vector<1x64xf32>
    %cst_54 = arith.constant 1.000000e+00 : f32
    %198 = vector.broadcast %cst_54 : f32 to vector<1x64xf32>
    %199 = arith.addf %198, %197 : vector<1x64xf32>
    %200 = arith.divf %198, %199 : vector<1x64xf32>
    %201 = vector.extract_strided_slice %194 {offsets = [0, 64], sizes = [1, 64], strides = [1, 1]} : vector<1x256xf32> to vector<1x64xf32>
    %202 = arith.negf %201 : vector<1x64xf32>
    %203 = math.exp %202 : vector<1x64xf32>
    %cst_55 = arith.constant 1.000000e+00 : f32
    %204 = vector.broadcast %cst_55 : f32 to vector<1x64xf32>
    %205 = arith.addf %204, %203 : vector<1x64xf32>
    %206 = arith.divf %204, %205 : vector<1x64xf32>
    %207 = vector.extract_strided_slice %194 {offsets = [0, 128], sizes = [1, 64], strides = [1, 1]} : vector<1x256xf32> to vector<1x64xf32>
    %208 = math.tanh %207 : vector<1x64xf32>
    %209 = vector.extract_strided_slice %194 {offsets = [0, 192], sizes = [1, 64], strides = [1, 1]} : vector<1x256xf32> to vector<1x64xf32>
    %210 = arith.negf %209 : vector<1x64xf32>
    %211 = math.exp %210 : vector<1x64xf32>
    %cst_56 = arith.constant 1.000000e+00 : f32
    %212 = vector.broadcast %cst_56 : f32 to vector<1x64xf32>
    %213 = arith.addf %212, %211 : vector<1x64xf32>
    %214 = arith.divf %212, %213 : vector<1x64xf32>
    %215 = arith.mulf %206, %181 : vector<1x64xf32>
    %216 = arith.mulf %200, %208 : vector<1x64xf32>
    %217 = arith.addf %215, %216 : vector<1x64xf32>
    %218 = math.tanh %217 : vector<1x64xf32>
    %219 = arith.mulf %214, %218 : vector<1x64xf32>
    %220 = vector.extract_strided_slice %219 {offsets = [0, 0], sizes = [1, 32], strides = [1, 1]} : vector<1x64xf32> to vector<1x32xf32>
    %221 = arith.index_cast %c5_i32 : i32 to index
    %c0_57 = arith.constant 0 : index
    %222 = vector.load %arg14[%221, %c0_57] : memref<8x64xf32, #tpu.memory_space<vmem>>, vector<1x32xf32>
    tpu.vector_store %arg14[%221, %c0_57], %220 {strides = array<i32>} : memref<8x64xf32, #tpu.memory_space<vmem>>, vector<1x32xf32>,
    %223 = vector.extract_strided_slice %219 {offsets = [0, 32], sizes = [1, 32], strides = [1, 1]} : vector<1x64xf32> to vector<1x32xf32>
    %c7_i32_58 = arith.constant 7 : i32
    %224 = arith.subi %c7_i32_58, %c5_i32 : i32
    %225 = arith.index_cast %224 : i32 to index
    %c32_59 = arith.constant 32 : index
    %226 = vector.load %arg14[%225, %c32_59] : memref<8x64xf32, #tpu.memory_space<vmem>>, vector<1x32xf32>
    tpu.vector_store %arg14[%225, %c32_59], %223 {strides = array<i32>} : memref<8x64xf32, #tpu.memory_space<vmem>>, vector<1x32xf32>,
    %c6_i32 = arith.constant 6 : i32
    %227 = arith.index_cast %c6_i32 : i32 to index
    %c0_60 = arith.constant 0 : index
    %228 = vector.load %arg13[%227, %c0_60] : memref<8x256xf32, #tpu.memory_space<vmem>>, vector<1x256xf32>
    %cst_61 = arith.constant dense<0.000000e+00> : vector<1x256xf32>
    %229 = tpu.matmul %219, %8, %cst_61 {dimension_numbers = #tpu.dot_dimension_numbers<[1], [0], [0], [1], [0, 0, 1, 1], [], []>} : vector<1x64xf32>, vector<64x256xf32>, vector<1x256xf32> -> vector<1x256xf32>
    %230 = arith.addf %228, %229 : vector<1x256xf32>
    %231 = vector.extract_strided_slice %230 {offsets = [0, 0], sizes = [1, 64], strides = [1, 1]} : vector<1x256xf32> to vector<1x64xf32>
    %232 = arith.negf %231 : vector<1x64xf32>
    %233 = math.exp %232 : vector<1x64xf32>
    %cst_62 = arith.constant 1.000000e+00 : f32
    %234 = vector.broadcast %cst_62 : f32 to vector<1x64xf32>
    %235 = arith.addf %234, %233 : vector<1x64xf32>
    %236 = arith.divf %234, %235 : vector<1x64xf32>
    %237 = vector.extract_strided_slice %230 {offsets = [0, 64], sizes = [1, 64], strides = [1, 1]} : vector<1x256xf32> to vector<1x64xf32>
    %238 = arith.negf %237 : vector<1x64xf32>
    %239 = math.exp %238 : vector<1x64xf32>
    %cst_63 = arith.constant 1.000000e+00 : f32
    %240 = vector.broadcast %cst_63 : f32 to vector<1x64xf32>
    %241 = arith.addf %240, %239 : vector<1x64xf32>
    %242 = arith.divf %240, %241 : vector<1x64xf32>
    %243 = vector.extract_strided_slice %230 {offsets = [0, 128], sizes = [1, 64], strides = [1, 1]} : vector<1x256xf32> to vector<1x64xf32>
    %244 = math.tanh %243 : vector<1x64xf32>
    %245 = vector.extract_strided_slice %230 {offsets = [0, 192], sizes = [1, 64], strides = [1, 1]} : vector<1x256xf32> to vector<1x64xf32>
    %246 = arith.negf %245 : vector<1x64xf32>
    %247 = math.exp %246 : vector<1x64xf32>
    %cst_64 = arith.constant 1.000000e+00 : f32
    %248 = vector.broadcast %cst_64 : f32 to vector<1x64xf32>
    %249 = arith.addf %248, %247 : vector<1x64xf32>
    %250 = arith.divf %248, %249 : vector<1x64xf32>
    %251 = arith.mulf %242, %217 : vector<1x64xf32>
    %252 = arith.mulf %236, %244 : vector<1x64xf32>
    %253 = arith.addf %251, %252 : vector<1x64xf32>
    %254 = math.tanh %253 : vector<1x64xf32>
    %255 = arith.mulf %250, %254 : vector<1x64xf32>
    %256 = vector.extract_strided_slice %255 {offsets = [0, 0], sizes = [1, 32], strides = [1, 1]} : vector<1x64xf32> to vector<1x32xf32>
    %257 = arith.index_cast %c6_i32 : i32 to index
    %c0_65 = arith.constant 0 : index
    %258 = vector.load %arg14[%257, %c0_65] : memref<8x64xf32, #tpu.memory_space<vmem>>, vector<1x32xf32>
    tpu.vector_store %arg14[%257, %c0_65], %256 {strides = array<i32>} : memref<8x64xf32, #tpu.memory_space<vmem>>, vector<1x32xf32>,
    %259 = vector.extract_strided_slice %255 {offsets = [0, 32], sizes = [1, 32], strides = [1, 1]} : vector<1x64xf32> to vector<1x32xf32>
    %c7_i32_66 = arith.constant 7 : i32
    %260 = arith.subi %c7_i32_66, %c6_i32 : i32
    %261 = arith.index_cast %260 : i32 to index
    %c32_67 = arith.constant 32 : index
    %262 = vector.load %arg14[%261, %c32_67] : memref<8x64xf32, #tpu.memory_space<vmem>>, vector<1x32xf32>
    tpu.vector_store %arg14[%261, %c32_67], %259 {strides = array<i32>} : memref<8x64xf32, #tpu.memory_space<vmem>>, vector<1x32xf32>,
    %c7_i32_68 = arith.constant 7 : i32
    %263 = arith.index_cast %c7_i32_68 : i32 to index
    %c0_69 = arith.constant 0 : index
    %264 = vector.load %arg13[%263, %c0_69] : memref<8x256xf32, #tpu.memory_space<vmem>>, vector<1x256xf32>
    %cst_70 = arith.constant dense<0.000000e+00> : vector<1x256xf32>
    %265 = tpu.matmul %255, %8, %cst_70 {dimension_numbers = #tpu.dot_dimension_numbers<[1], [0], [0], [1], [0, 0, 1, 1], [], []>} : vector<1x64xf32>, vector<64x256xf32>, vector<1x256xf32> -> vector<1x256xf32>
    %266 = arith.addf %264, %265 : vector<1x256xf32>
    %267 = vector.extract_strided_slice %266 {offsets = [0, 0], sizes = [1, 64], strides = [1, 1]} : vector<1x256xf32> to vector<1x64xf32>
    %268 = arith.negf %267 : vector<1x64xf32>
    %269 = math.exp %268 : vector<1x64xf32>
    %cst_71 = arith.constant 1.000000e+00 : f32
    %270 = vector.broadcast %cst_71 : f32 to vector<1x64xf32>
    %271 = arith.addf %270, %269 : vector<1x64xf32>
    %272 = arith.divf %270, %271 : vector<1x64xf32>
    %273 = vector.extract_strided_slice %266 {offsets = [0, 64], sizes = [1, 64], strides = [1, 1]} : vector<1x256xf32> to vector<1x64xf32>
    %274 = arith.negf %273 : vector<1x64xf32>
    %275 = math.exp %274 : vector<1x64xf32>
    %cst_72 = arith.constant 1.000000e+00 : f32
    %276 = vector.broadcast %cst_72 : f32 to vector<1x64xf32>
    %277 = arith.addf %276, %275 : vector<1x64xf32>
    %278 = arith.divf %276, %277 : vector<1x64xf32>
    %279 = vector.extract_strided_slice %266 {offsets = [0, 128], sizes = [1, 64], strides = [1, 1]} : vector<1x256xf32> to vector<1x64xf32>
    %280 = math.tanh %279 : vector<1x64xf32>
    %281 = vector.extract_strided_slice %266 {offsets = [0, 192], sizes = [1, 64], strides = [1, 1]} : vector<1x256xf32> to vector<1x64xf32>
    %282 = arith.negf %281 : vector<1x64xf32>
    %283 = math.exp %282 : vector<1x64xf32>
    %cst_73 = arith.constant 1.000000e+00 : f32
    %284 = vector.broadcast %cst_73 : f32 to vector<1x64xf32>
    %285 = arith.addf %284, %283 : vector<1x64xf32>
    %286 = arith.divf %284, %285 : vector<1x64xf32>
    %287 = arith.mulf %278, %253 : vector<1x64xf32>
    %288 = arith.mulf %272, %280 : vector<1x64xf32>
    %289 = arith.addf %287, %288 : vector<1x64xf32>
    %290 = math.tanh %289 : vector<1x64xf32>
    %291 = arith.mulf %286, %290 : vector<1x64xf32>
    %292 = vector.extract_strided_slice %291 {offsets = [0, 0], sizes = [1, 32], strides = [1, 1]} : vector<1x64xf32> to vector<1x32xf32>
    %293 = arith.index_cast %c7_i32_68 : i32 to index
    %c0_74 = arith.constant 0 : index
    %294 = vector.load %arg14[%293, %c0_74] : memref<8x64xf32, #tpu.memory_space<vmem>>, vector<1x32xf32>
    tpu.vector_store %arg14[%293, %c0_74], %292 {strides = array<i32>} : memref<8x64xf32, #tpu.memory_space<vmem>>, vector<1x32xf32>,
    %295 = vector.extract_strided_slice %291 {offsets = [0, 32], sizes = [1, 32], strides = [1, 1]} : vector<1x64xf32> to vector<1x32xf32>
    %c7_i32_75 = arith.constant 7 : i32
    %296 = arith.subi %c7_i32_75, %c7_i32_68 : i32
    %297 = arith.index_cast %296 : i32 to index
    %c32_76 = arith.constant 32 : index
    %298 = vector.load %arg14[%297, %c32_76] : memref<8x64xf32, #tpu.memory_space<vmem>>, vector<1x32xf32>
    tpu.vector_store %arg14[%297, %c32_76], %295 {strides = array<i32>} : memref<8x64xf32, #tpu.memory_space<vmem>>, vector<1x32xf32>,
    %c8_i32 = arith.constant 8 : i32
    %c0_77 = arith.constant 0 : index
    %c0_78 = arith.constant 0 : index
    %299 = vector.load %arg14[%c0_77, %c0_78] : memref<8x64xf32, #tpu.memory_space<vmem>>, vector<8x64xf32>
    %c0_79 = arith.constant 0 : index
    %c0_80 = arith.constant 0 : index
    %300 = vector.load %arg7[%c0_79, %c0_80] : memref<64x128xf32, #tpu.memory_space<vmem>>, vector<64x128xf32>
    %cst_81 = arith.constant dense<0.000000e+00> : vector<8x128xf32>
    %301 = tpu.matmul %299, %300, %cst_81 {dimension_numbers = #tpu.dot_dimension_numbers<[1], [0], [0], [1], [0, 0, 1, 1], [], []>} : vector<8x64xf32>, vector<64x128xf32>, vector<8x128xf32> -> vector<8x128xf32>
    %c0_82 = arith.constant 0 : index
    %c0_83 = arith.constant 0 : index
    %302 = vector.load %arg8[%c0_82, %c0_83] : memref<1x128xf32, #tpu.memory_space<vmem>>, vector<1x128xf32>
    %303 = vector.broadcast %302 : vector<1x128xf32> to vector<8x128xf32>
    %304 = arith.addf %301, %303 : vector<8x128xf32>
    %c0_84 = arith.constant 0 : index
    %c0_85 = arith.constant 0 : index
    %305 = vector.load %arg15[%c0_84, %c0_85] : memref<8x128xf32, #tpu.memory_space<vmem>>, vector<8x128xf32>
    tpu.vector_store %arg15[%c0_84, %c0_85], %304 {strides = array<i32>} : memref<8x128xf32, #tpu.memory_space<vmem>>, vector<8x128xf32>,
    %c0_86 = arith.constant 0 : index
    %c0_87 = arith.constant 0 : index
    %306 = vector.load %arg9[%c0_86, %c0_87] : memref<8x128xf32, #tpu.memory_space<vmem>>, vector<8x128xf32>
    %307 = tpu.iota {dimensions = array<i32: 0>} : vector<8x128xi32>
    %308 = tpu.iota {dimensions = array<i32: 1>} : vector<8x128xi32>
    %309 = arith.cmpi eq, %307, %308 : vector<8x128xi32>
    %310 = tpu.iota {dimensions = array<i32: 1>} : vector<1x128xi32>
    %c3_i32_88 = arith.constant 3 : i32
    %311 = vector.broadcast %c3_i32_88 : i32 to vector<1x128xi32>
    %312 = arith.cmpi eq, %310, %311 : vector<1x128xi32>
    %c5_i32_89 = arith.constant 5 : i32
    %313 = vector.broadcast %c5_i32_89 : i32 to vector<1x128xi32>
    %314 = arith.cmpi slt, %310, %313 : vector<1x128xi32>
    %cst_90 = arith.constant -1.000000e+04 : f32
    %cst_91 = arith.constant -1.000000e+09 : f32
    %315 = vector.broadcast %cst_90 : f32 to vector<1x128xf32>
    %316 = vector.broadcast %cst_91 : f32 to vector<1x128xf32>
    %317 = arith.select %314, %315, %316 : vector<1x128xi1>, vector<1x128xf32>
    %cst_92 = arith.constant 0.000000e+00 : f32
    %318 = vector.broadcast %cst_92 : f32 to vector<1x128xf32>
    %319 = arith.select %312, %318, %317 : vector<1x128xi1>, vector<1x128xf32>
    %c0_i32_93 = arith.constant 0 : i32
    %cst_94 = arith.constant 0.000000e+00 : f32
    %320 = vector.shape_cast %319 : vector<1x128xf32> to vector<1x128xf32>
    %321 = vector.broadcast %320 : vector<1x128xf32> to vector<8x128xf32>
    %322 = vector.broadcast %cst_94 : f32 to vector<8x128xf32>
    %323 = arith.select %309, %321, %322 : vector<8x128xi1>, vector<8x128xf32>
    %cst_95 = arith.constant dense<0.000000e+00> : vector<8xf32>
    %324 = vector.multi_reduction <add>, %323, %cst_95 [1] : vector<8x128xf32> to vector<8xf32>
    %325 = vector.shape_cast %324 : vector<8xf32> to vector<8x1xf32>
    %326 = arith.index_cast %c0_i32_93 : i32 to index
    %c0_96 = arith.constant 0 : index
    %327 = vector.load %arg15[%326, %c0_96] : memref<8x128xf32, #tpu.memory_space<vmem>>, vector<1x128xf32>
    %328 = vector.broadcast %325 : vector<8x1xf32> to vector<8x128xf32>
    %329 = vector.broadcast %327 : vector<1x128xf32> to vector<8x128xf32>
    %330 = arith.addf %328, %329 : vector<8x128xf32>
    %331 = arith.addf %330, %306 : vector<8x128xf32>
    %cst_97 = arith.constant dense<0xFF800000> : vector<128xf32>
    %332 = vector.multi_reduction <maximumf>, %331, %cst_97 [0] : vector<8x128xf32> to vector<128xf32>
    %333 = vector.shape_cast %332 : vector<128xf32> to vector<1x128xf32>
    %334 = vector.broadcast %333 : vector<1x128xf32> to vector<8x128xf32>
    %335 = arith.cmpf oeq, %331, %334 : vector<8x128xf32>
    %c8_i32_98 = arith.constant 8 : i32
    %336 = vector.broadcast %c8_i32_98 : i32 to vector<8x128xi32>
    %337 = arith.select %335, %307, %336 : vector<8x128xi1>, vector<8x128xi32>
    %cst_99 = arith.constant dense<2147483647> : vector<128xi32>
    %338 = vector.multi_reduction <minsi>, %337, %cst_99 [0] : vector<8x128xi32> to vector<128xi32>
    %339 = vector.shape_cast %338 : vector<128xi32> to vector<1x128xi32>
    %340 = arith.index_cast %c0_i32_93 : i32 to index
    %c0_100 = arith.constant 0 : index
    %341 = vector.load %arg16[%340, %c0_100] : memref<8x128xi32, #tpu.memory_space<vmem>>, vector<1x128xi32>
    tpu.vector_store %arg16[%340, %c0_100], %339 {strides = array<i32>} : memref<8x128xi32, #tpu.memory_space<vmem>>, vector<1x128xi32>,
    %342 = vector.broadcast %333 : vector<1x128xf32> to vector<8x128xf32>
    %343 = arith.subf %331, %342 : vector<8x128xf32>
    %344 = math.exp %343 : vector<8x128xf32>
    %cst_101 = arith.constant dense<0.000000e+00> : vector<128xf32>
    %345 = vector.multi_reduction <add>, %344, %cst_101 [0] : vector<8x128xf32> to vector<128xf32>
    %346 = vector.shape_cast %345 : vector<128xf32> to vector<1x128xf32>
    %347 = math.log %346 : vector<1x128xf32>
    %348 = arith.addf %347, %333 : vector<1x128xf32>
    %c1_i32_102 = arith.constant 1 : i32
    %cst_103 = arith.constant 0.000000e+00 : f32
    %349 = vector.shape_cast %348 : vector<1x128xf32> to vector<1x128xf32>
    %350 = vector.broadcast %349 : vector<1x128xf32> to vector<8x128xf32>
    %351 = vector.broadcast %cst_103 : f32 to vector<8x128xf32>
    %352 = arith.select %309, %350, %351 : vector<8x128xi1>, vector<8x128xf32>
    %cst_104 = arith.constant dense<0.000000e+00> : vector<8xf32>
    %353 = vector.multi_reduction <add>, %352, %cst_104 [1] : vector<8x128xf32> to vector<8xf32>
    %354 = vector.shape_cast %353 : vector<8xf32> to vector<8x1xf32>
    %355 = arith.index_cast %c1_i32_102 : i32 to index
    %c0_105 = arith.constant 0 : index
    %356 = vector.load %arg15[%355, %c0_105] : memref<8x128xf32, #tpu.memory_space<vmem>>, vector<1x128xf32>
    %357 = vector.broadcast %354 : vector<8x1xf32> to vector<8x128xf32>
    %358 = vector.broadcast %356 : vector<1x128xf32> to vector<8x128xf32>
    %359 = arith.addf %357, %358 : vector<8x128xf32>
    %360 = arith.addf %359, %306 : vector<8x128xf32>
    %cst_106 = arith.constant dense<0xFF800000> : vector<128xf32>
    %361 = vector.multi_reduction <maximumf>, %360, %cst_106 [0] : vector<8x128xf32> to vector<128xf32>
    %362 = vector.shape_cast %361 : vector<128xf32> to vector<1x128xf32>
    %363 = vector.broadcast %362 : vector<1x128xf32> to vector<8x128xf32>
    %364 = arith.cmpf oeq, %360, %363 : vector<8x128xf32>
    %c8_i32_107 = arith.constant 8 : i32
    %365 = vector.broadcast %c8_i32_107 : i32 to vector<8x128xi32>
    %366 = arith.select %364, %307, %365 : vector<8x128xi1>, vector<8x128xi32>
    %cst_108 = arith.constant dense<2147483647> : vector<128xi32>
    %367 = vector.multi_reduction <minsi>, %366, %cst_108 [0] : vector<8x128xi32> to vector<128xi32>
    %368 = vector.shape_cast %367 : vector<128xi32> to vector<1x128xi32>
    %369 = arith.index_cast %c1_i32_102 : i32 to index
    %c0_109 = arith.constant 0 : index
    %370 = vector.load %arg16[%369, %c0_109] : memref<8x128xi32, #tpu.memory_space<vmem>>, vector<1x128xi32>
    tpu.vector_store %arg16[%369, %c0_109], %368 {strides = array<i32>} : memref<8x128xi32, #tpu.memory_space<vmem>>, vector<1x128xi32>,
    %371 = vector.broadcast %362 : vector<1x128xf32> to vector<8x128xf32>
    %372 = arith.subf %360, %371 : vector<8x128xf32>
    %373 = math.exp %372 : vector<8x128xf32>
    %cst_110 = arith.constant dense<0.000000e+00> : vector<128xf32>
    %374 = vector.multi_reduction <add>, %373, %cst_110 [0] : vector<8x128xf32> to vector<128xf32>
    %375 = vector.shape_cast %374 : vector<128xf32> to vector<1x128xf32>
    %376 = math.log %375 : vector<1x128xf32>
    %377 = arith.addf %376, %362 : vector<1x128xf32>
    %c2_i32_111 = arith.constant 2 : i32
    %cst_112 = arith.constant 0.000000e+00 : f32
    %378 = vector.shape_cast %377 : vector<1x128xf32> to vector<1x128xf32>
    %379 = vector.broadcast %378 : vector<1x128xf32> to vector<8x128xf32>
    %380 = vector.broadcast %cst_112 : f32 to vector<8x128xf32>
    %381 = arith.select %309, %379, %380 : vector<8x128xi1>, vector<8x128xf32>
    %cst_113 = arith.constant dense<0.000000e+00> : vector<8xf32>
    %382 = vector.multi_reduction <add>, %381, %cst_113 [1] : vector<8x128xf32> to vector<8xf32>
    %383 = vector.shape_cast %382 : vector<8xf32> to vector<8x1xf32>
    %384 = arith.index_cast %c2_i32_111 : i32 to index
    %c0_114 = arith.constant 0 : index
    %385 = vector.load %arg15[%384, %c0_114] : memref<8x128xf32, #tpu.memory_space<vmem>>, vector<1x128xf32>
    %386 = vector.broadcast %383 : vector<8x1xf32> to vector<8x128xf32>
    %387 = vector.broadcast %385 : vector<1x128xf32> to vector<8x128xf32>
    %388 = arith.addf %386, %387 : vector<8x128xf32>
    %389 = arith.addf %388, %306 : vector<8x128xf32>
    %cst_115 = arith.constant dense<0xFF800000> : vector<128xf32>
    %390 = vector.multi_reduction <maximumf>, %389, %cst_115 [0] : vector<8x128xf32> to vector<128xf32>
    %391 = vector.shape_cast %390 : vector<128xf32> to vector<1x128xf32>
    %392 = vector.broadcast %391 : vector<1x128xf32> to vector<8x128xf32>
    %393 = arith.cmpf oeq, %389, %392 : vector<8x128xf32>
    %c8_i32_116 = arith.constant 8 : i32
    %394 = vector.broadcast %c8_i32_116 : i32 to vector<8x128xi32>
    %395 = arith.select %393, %307, %394 : vector<8x128xi1>, vector<8x128xi32>
    %cst_117 = arith.constant dense<2147483647> : vector<128xi32>
    %396 = vector.multi_reduction <minsi>, %395, %cst_117 [0] : vector<8x128xi32> to vector<128xi32>
    %397 = vector.shape_cast %396 : vector<128xi32> to vector<1x128xi32>
    %398 = arith.index_cast %c2_i32_111 : i32 to index
    %c0_118 = arith.constant 0 : index
    %399 = vector.load %arg16[%398, %c0_118] : memref<8x128xi32, #tpu.memory_space<vmem>>, vector<1x128xi32>
    tpu.vector_store %arg16[%398, %c0_118], %397 {strides = array<i32>} : memref<8x128xi32, #tpu.memory_space<vmem>>, vector<1x128xi32>,
    %400 = vector.broadcast %391 : vector<1x128xf32> to vector<8x128xf32>
    %401 = arith.subf %389, %400 : vector<8x128xf32>
    %402 = math.exp %401 : vector<8x128xf32>
    %cst_119 = arith.constant dense<0.000000e+00> : vector<128xf32>
    %403 = vector.multi_reduction <add>, %402, %cst_119 [0] : vector<8x128xf32> to vector<128xf32>
    %404 = vector.shape_cast %403 : vector<128xf32> to vector<1x128xf32>
    %405 = math.log %404 : vector<1x128xf32>
    %406 = arith.addf %405, %391 : vector<1x128xf32>
    %c3_i32_120 = arith.constant 3 : i32
    %cst_121 = arith.constant 0.000000e+00 : f32
    %407 = vector.shape_cast %406 : vector<1x128xf32> to vector<1x128xf32>
    %408 = vector.broadcast %407 : vector<1x128xf32> to vector<8x128xf32>
    %409 = vector.broadcast %cst_121 : f32 to vector<8x128xf32>
    %410 = arith.select %309, %408, %409 : vector<8x128xi1>, vector<8x128xf32>
    %cst_122 = arith.constant dense<0.000000e+00> : vector<8xf32>
    %411 = vector.multi_reduction <add>, %410, %cst_122 [1] : vector<8x128xf32> to vector<8xf32>
    %412 = vector.shape_cast %411 : vector<8xf32> to vector<8x1xf32>
    %413 = arith.index_cast %c3_i32_120 : i32 to index
    %c0_123 = arith.constant 0 : index
    %414 = vector.load %arg15[%413, %c0_123] : memref<8x128xf32, #tpu.memory_space<vmem>>, vector<1x128xf32>
    %415 = vector.broadcast %412 : vector<8x1xf32> to vector<8x128xf32>
    %416 = vector.broadcast %414 : vector<1x128xf32> to vector<8x128xf32>
    %417 = arith.addf %415, %416 : vector<8x128xf32>
    %418 = arith.addf %417, %306 : vector<8x128xf32>
    %cst_124 = arith.constant dense<0xFF800000> : vector<128xf32>
    %419 = vector.multi_reduction <maximumf>, %418, %cst_124 [0] : vector<8x128xf32> to vector<128xf32>
    %420 = vector.shape_cast %419 : vector<128xf32> to vector<1x128xf32>
    %421 = vector.broadcast %420 : vector<1x128xf32> to vector<8x128xf32>
    %422 = arith.cmpf oeq, %418, %421 : vector<8x128xf32>
    %c8_i32_125 = arith.constant 8 : i32
    %423 = vector.broadcast %c8_i32_125 : i32 to vector<8x128xi32>
    %424 = arith.select %422, %307, %423 : vector<8x128xi1>, vector<8x128xi32>
    %cst_126 = arith.constant dense<2147483647> : vector<128xi32>
    %425 = vector.multi_reduction <minsi>, %424, %cst_126 [0] : vector<8x128xi32> to vector<128xi32>
    %426 = vector.shape_cast %425 : vector<128xi32> to vector<1x128xi32>
    %427 = arith.index_cast %c3_i32_120 : i32 to index
    %c0_127 = arith.constant 0 : index
    %428 = vector.load %arg16[%427, %c0_127] : memref<8x128xi32, #tpu.memory_space<vmem>>, vector<1x128xi32>
    tpu.vector_store %arg16[%427, %c0_127], %426 {strides = array<i32>} : memref<8x128xi32, #tpu.memory_space<vmem>>, vector<1x128xi32>,
    %429 = vector.broadcast %420 : vector<1x128xf32> to vector<8x128xf32>
    %430 = arith.subf %418, %429 : vector<8x128xf32>
    %431 = math.exp %430 : vector<8x128xf32>
    %cst_128 = arith.constant dense<0.000000e+00> : vector<128xf32>
    %432 = vector.multi_reduction <add>, %431, %cst_128 [0] : vector<8x128xf32> to vector<128xf32>
    %433 = vector.shape_cast %432 : vector<128xf32> to vector<1x128xf32>
    %434 = math.log %433 : vector<1x128xf32>
    %435 = arith.addf %434, %420 : vector<1x128xf32>
    %c4_i32_129 = arith.constant 4 : i32
    %cst_130 = arith.constant 0.000000e+00 : f32
    %436 = vector.shape_cast %435 : vector<1x128xf32> to vector<1x128xf32>
    %437 = vector.broadcast %436 : vector<1x128xf32> to vector<8x128xf32>
    %438 = vector.broadcast %cst_130 : f32 to vector<8x128xf32>
    %439 = arith.select %309, %437, %438 : vector<8x128xi1>, vector<8x128xf32>
    %cst_131 = arith.constant dense<0.000000e+00> : vector<8xf32>
    %440 = vector.multi_reduction <add>, %439, %cst_131 [1] : vector<8x128xf32> to vector<8xf32>
    %441 = vector.shape_cast %440 : vector<8xf32> to vector<8x1xf32>
    %442 = arith.index_cast %c4_i32_129 : i32 to index
    %c0_132 = arith.constant 0 : index
    %443 = vector.load %arg15[%442, %c0_132] : memref<8x128xf32, #tpu.memory_space<vmem>>, vector<1x128xf32>
    %444 = vector.broadcast %441 : vector<8x1xf32> to vector<8x128xf32>
    %445 = vector.broadcast %443 : vector<1x128xf32> to vector<8x128xf32>
    %446 = arith.addf %444, %445 : vector<8x128xf32>
    %447 = arith.addf %446, %306 : vector<8x128xf32>
    %cst_133 = arith.constant dense<0xFF800000> : vector<128xf32>
    %448 = vector.multi_reduction <maximumf>, %447, %cst_133 [0] : vector<8x128xf32> to vector<128xf32>
    %449 = vector.shape_cast %448 : vector<128xf32> to vector<1x128xf32>
    %450 = vector.broadcast %449 : vector<1x128xf32> to vector<8x128xf32>
    %451 = arith.cmpf oeq, %447, %450 : vector<8x128xf32>
    %c8_i32_134 = arith.constant 8 : i32
    %452 = vector.broadcast %c8_i32_134 : i32 to vector<8x128xi32>
    %453 = arith.select %451, %307, %452 : vector<8x128xi1>, vector<8x128xi32>
    %cst_135 = arith.constant dense<2147483647> : vector<128xi32>
    %454 = vector.multi_reduction <minsi>, %453, %cst_135 [0] : vector<8x128xi32> to vector<128xi32>
    %455 = vector.shape_cast %454 : vector<128xi32> to vector<1x128xi32>
    %456 = arith.index_cast %c4_i32_129 : i32 to index
    %c0_136 = arith.constant 0 : index
    %457 = vector.load %arg16[%456, %c0_136] : memref<8x128xi32, #tpu.memory_space<vmem>>, vector<1x128xi32>
    tpu.vector_store %arg16[%456, %c0_136], %455 {strides = array<i32>} : memref<8x128xi32, #tpu.memory_space<vmem>>, vector<1x128xi32>,
    %458 = vector.broadcast %449 : vector<1x128xf32> to vector<8x128xf32>
    %459 = arith.subf %447, %458 : vector<8x128xf32>
    %460 = math.exp %459 : vector<8x128xf32>
    %cst_137 = arith.constant dense<0.000000e+00> : vector<128xf32>
    %461 = vector.multi_reduction <add>, %460, %cst_137 [0] : vector<8x128xf32> to vector<128xf32>
    %462 = vector.shape_cast %461 : vector<128xf32> to vector<1x128xf32>
    %463 = math.log %462 : vector<1x128xf32>
    %464 = arith.addf %463, %449 : vector<1x128xf32>
    %c5_i32_138 = arith.constant 5 : i32
    %cst_139 = arith.constant 0.000000e+00 : f32
    %465 = vector.shape_cast %464 : vector<1x128xf32> to vector<1x128xf32>
    %466 = vector.broadcast %465 : vector<1x128xf32> to vector<8x128xf32>
    %467 = vector.broadcast %cst_139 : f32 to vector<8x128xf32>
    %468 = arith.select %309, %466, %467 : vector<8x128xi1>, vector<8x128xf32>
    %cst_140 = arith.constant dense<0.000000e+00> : vector<8xf32>
    %469 = vector.multi_reduction <add>, %468, %cst_140 [1] : vector<8x128xf32> to vector<8xf32>
    %470 = vector.shape_cast %469 : vector<8xf32> to vector<8x1xf32>
    %471 = arith.index_cast %c5_i32_138 : i32 to index
    %c0_141 = arith.constant 0 : index
    %472 = vector.load %arg15[%471, %c0_141] : memref<8x128xf32, #tpu.memory_space<vmem>>, vector<1x128xf32>
    %473 = vector.broadcast %470 : vector<8x1xf32> to vector<8x128xf32>
    %474 = vector.broadcast %472 : vector<1x128xf32> to vector<8x128xf32>
    %475 = arith.addf %473, %474 : vector<8x128xf32>
    %476 = arith.addf %475, %306 : vector<8x128xf32>
    %cst_142 = arith.constant dense<0xFF800000> : vector<128xf32>
    %477 = vector.multi_reduction <maximumf>, %476, %cst_142 [0] : vector<8x128xf32> to vector<128xf32>
    %478 = vector.shape_cast %477 : vector<128xf32> to vector<1x128xf32>
    %479 = vector.broadcast %478 : vector<1x128xf32> to vector<8x128xf32>
    %480 = arith.cmpf oeq, %476, %479 : vector<8x128xf32>
    %c8_i32_143 = arith.constant 8 : i32
    %481 = vector.broadcast %c8_i32_143 : i32 to vector<8x128xi32>
    %482 = arith.select %480, %307, %481 : vector<8x128xi1>, vector<8x128xi32>
    %cst_144 = arith.constant dense<2147483647> : vector<128xi32>
    %483 = vector.multi_reduction <minsi>, %482, %cst_144 [0] : vector<8x128xi32> to vector<128xi32>
    %484 = vector.shape_cast %483 : vector<128xi32> to vector<1x128xi32>
    %485 = arith.index_cast %c5_i32_138 : i32 to index
    %c0_145 = arith.constant 0 : index
    %486 = vector.load %arg16[%485, %c0_145] : memref<8x128xi32, #tpu.memory_space<vmem>>, vector<1x128xi32>
    tpu.vector_store %arg16[%485, %c0_145], %484 {strides = array<i32>} : memref<8x128xi32, #tpu.memory_space<vmem>>, vector<1x128xi32>,
    %487 = vector.broadcast %478 : vector<1x128xf32> to vector<8x128xf32>
    %488 = arith.subf %476, %487 : vector<8x128xf32>
    %489 = math.exp %488 : vector<8x128xf32>
    %cst_146 = arith.constant dense<0.000000e+00> : vector<128xf32>
    %490 = vector.multi_reduction <add>, %489, %cst_146 [0] : vector<8x128xf32> to vector<128xf32>
    %491 = vector.shape_cast %490 : vector<128xf32> to vector<1x128xf32>
    %492 = math.log %491 : vector<1x128xf32>
    %493 = arith.addf %492, %478 : vector<1x128xf32>
    %c6_i32_147 = arith.constant 6 : i32
    %cst_148 = arith.constant 0.000000e+00 : f32
    %494 = vector.shape_cast %493 : vector<1x128xf32> to vector<1x128xf32>
    %495 = vector.broadcast %494 : vector<1x128xf32> to vector<8x128xf32>
    %496 = vector.broadcast %cst_148 : f32 to vector<8x128xf32>
    %497 = arith.select %309, %495, %496 : vector<8x128xi1>, vector<8x128xf32>
    %cst_149 = arith.constant dense<0.000000e+00> : vector<8xf32>
    %498 = vector.multi_reduction <add>, %497, %cst_149 [1] : vector<8x128xf32> to vector<8xf32>
    %499 = vector.shape_cast %498 : vector<8xf32> to vector<8x1xf32>
    %500 = arith.index_cast %c6_i32_147 : i32 to index
    %c0_150 = arith.constant 0 : index
    %501 = vector.load %arg15[%500, %c0_150] : memref<8x128xf32, #tpu.memory_space<vmem>>, vector<1x128xf32>
    %502 = vector.broadcast %499 : vector<8x1xf32> to vector<8x128xf32>
    %503 = vector.broadcast %501 : vector<1x128xf32> to vector<8x128xf32>
    %504 = arith.addf %502, %503 : vector<8x128xf32>
    %505 = arith.addf %504, %306 : vector<8x128xf32>
    %cst_151 = arith.constant dense<0xFF800000> : vector<128xf32>
    %506 = vector.multi_reduction <maximumf>, %505, %cst_151 [0] : vector<8x128xf32> to vector<128xf32>
    %507 = vector.shape_cast %506 : vector<128xf32> to vector<1x128xf32>
    %508 = vector.broadcast %507 : vector<1x128xf32> to vector<8x128xf32>
    %509 = arith.cmpf oeq, %505, %508 : vector<8x128xf32>
    %c8_i32_152 = arith.constant 8 : i32
    %510 = vector.broadcast %c8_i32_152 : i32 to vector<8x128xi32>
    %511 = arith.select %509, %307, %510 : vector<8x128xi1>, vector<8x128xi32>
    %cst_153 = arith.constant dense<2147483647> : vector<128xi32>
    %512 = vector.multi_reduction <minsi>, %511, %cst_153 [0] : vector<8x128xi32> to vector<128xi32>
    %513 = vector.shape_cast %512 : vector<128xi32> to vector<1x128xi32>
    %514 = arith.index_cast %c6_i32_147 : i32 to index
    %c0_154 = arith.constant 0 : index
    %515 = vector.load %arg16[%514, %c0_154] : memref<8x128xi32, #tpu.memory_space<vmem>>, vector<1x128xi32>
    tpu.vector_store %arg16[%514, %c0_154], %513 {strides = array<i32>} : memref<8x128xi32, #tpu.memory_space<vmem>>, vector<1x128xi32>,
    %516 = vector.broadcast %507 : vector<1x128xf32> to vector<8x128xf32>
    %517 = arith.subf %505, %516 : vector<8x128xf32>
    %518 = math.exp %517 : vector<8x128xf32>
    %cst_155 = arith.constant dense<0.000000e+00> : vector<128xf32>
    %519 = vector.multi_reduction <add>, %518, %cst_155 [0] : vector<8x128xf32> to vector<128xf32>
    %520 = vector.shape_cast %519 : vector<128xf32> to vector<1x128xf32>
    %521 = math.log %520 : vector<1x128xf32>
    %522 = arith.addf %521, %507 : vector<1x128xf32>
    %c7_i32_156 = arith.constant 7 : i32
    %cst_157 = arith.constant 0.000000e+00 : f32
    %523 = vector.shape_cast %522 : vector<1x128xf32> to vector<1x128xf32>
    %524 = vector.broadcast %523 : vector<1x128xf32> to vector<8x128xf32>
    %525 = vector.broadcast %cst_157 : f32 to vector<8x128xf32>
    %526 = arith.select %309, %524, %525 : vector<8x128xi1>, vector<8x128xf32>
    %cst_158 = arith.constant dense<0.000000e+00> : vector<8xf32>
    %527 = vector.multi_reduction <add>, %526, %cst_158 [1] : vector<8x128xf32> to vector<8xf32>
    %528 = vector.shape_cast %527 : vector<8xf32> to vector<8x1xf32>
    %529 = arith.index_cast %c7_i32_156 : i32 to index
    %c0_159 = arith.constant 0 : index
    %530 = vector.load %arg15[%529, %c0_159] : memref<8x128xf32, #tpu.memory_space<vmem>>, vector<1x128xf32>
    %531 = vector.broadcast %528 : vector<8x1xf32> to vector<8x128xf32>
    %532 = vector.broadcast %530 : vector<1x128xf32> to vector<8x128xf32>
    %533 = arith.addf %531, %532 : vector<8x128xf32>
    %534 = arith.addf %533, %306 : vector<8x128xf32>
    %cst_160 = arith.constant dense<0xFF800000> : vector<128xf32>
    %535 = vector.multi_reduction <maximumf>, %534, %cst_160 [0] : vector<8x128xf32> to vector<128xf32>
    %536 = vector.shape_cast %535 : vector<128xf32> to vector<1x128xf32>
    %537 = vector.broadcast %536 : vector<1x128xf32> to vector<8x128xf32>
    %538 = arith.cmpf oeq, %534, %537 : vector<8x128xf32>
    %c8_i32_161 = arith.constant 8 : i32
    %539 = vector.broadcast %c8_i32_161 : i32 to vector<8x128xi32>
    %540 = arith.select %538, %307, %539 : vector<8x128xi1>, vector<8x128xi32>
    %cst_162 = arith.constant dense<2147483647> : vector<128xi32>
    %541 = vector.multi_reduction <minsi>, %540, %cst_162 [0] : vector<8x128xi32> to vector<128xi32>
    %542 = vector.shape_cast %541 : vector<128xi32> to vector<1x128xi32>
    %543 = arith.index_cast %c7_i32_156 : i32 to index
    %c0_163 = arith.constant 0 : index
    %544 = vector.load %arg16[%543, %c0_163] : memref<8x128xi32, #tpu.memory_space<vmem>>, vector<1x128xi32>
    tpu.vector_store %arg16[%543, %c0_163], %542 {strides = array<i32>} : memref<8x128xi32, #tpu.memory_space<vmem>>, vector<1x128xi32>,
    %545 = vector.broadcast %536 : vector<1x128xf32> to vector<8x128xf32>
    %546 = arith.subf %534, %545 : vector<8x128xf32>
    %547 = math.exp %546 : vector<8x128xf32>
    %cst_164 = arith.constant dense<0.000000e+00> : vector<128xf32>
    %548 = vector.multi_reduction <add>, %547, %cst_164 [0] : vector<8x128xf32> to vector<128xf32>
    %549 = vector.shape_cast %548 : vector<128xf32> to vector<1x128xf32>
    %550 = math.log %549 : vector<1x128xf32>
    %551 = arith.addf %550, %536 : vector<1x128xf32>
    %c8_i32_165 = arith.constant 8 : i32
    %c0_166 = arith.constant 0 : index
    %c0_167 = arith.constant 0 : index
    %552 = vector.load %arg10[%c0_166, %c0_167] : memref<1x128xf32, #tpu.memory_space<vmem>>, vector<1x128xf32>
    %553 = arith.addf %551, %552 : vector<1x128xf32>
    %cst_168 = arith.constant dense<0xFF800000> : vector<1xf32>
    %554 = vector.multi_reduction <maximumf>, %553, %cst_168 [1] : vector<1x128xf32> to vector<1xf32>
    %555 = vector.shape_cast %554 : vector<1xf32> to vector<1x1xf32>
    %556 = vector.broadcast %555 : vector<1x1xf32> to vector<1x128xf32>
    %557 = arith.cmpf oeq, %553, %556 : vector<1x128xf32>
    %c128_i32 = arith.constant 128 : i32
    %558 = vector.broadcast %c128_i32 : i32 to vector<1x128xi32>
    %559 = arith.select %557, %310, %558 : vector<1x128xi1>, vector<1x128xi32>
    %cst_169 = arith.constant dense<2147483647> : vector<1xi32>
    %560 = vector.multi_reduction <minsi>, %559, %cst_169 [1] : vector<1x128xi32> to vector<1xi32>
    %561 = vector.shape_cast %560 : vector<1xi32> to vector<1x1xi32>
    %562 = vector.broadcast %555 : vector<1x1xf32> to vector<1x128xf32>
    %563 = arith.subf %553, %562 : vector<1x128xf32>
    %564 = math.exp %563 : vector<1x128xf32>
    %cst_170 = arith.constant dense<0.000000e+00> : vector<1xf32>
    %565 = vector.multi_reduction <add>, %564, %cst_170 [1] : vector<1x128xf32> to vector<1xf32>
    %566 = vector.shape_cast %565 : vector<1xf32> to vector<1x1xf32>
    %567 = math.log %566 : vector<1x1xf32>
    %568 = arith.addf %567, %555 : vector<1x1xf32>
    %c0_171 = arith.constant 0 : index
    %c0_172 = arith.constant 0 : index
    %c0_173 = arith.constant 0 : index
    %569 = vector.load %arg12[%c0_171, %c0_172, %c0_173] : memref<1x1x1xf32, #tpu.memory_space<vmem>>, vector<1x1x1xf32>
    %570 = vector.shape_cast %569 : vector<1x1x1xf32> to vector<1x1xf32>
    %571 = vector.shape_cast %568 : vector<1x1xf32> to vector<1x1x1xf32>
    tpu.vector_store %arg12[%c0_171, %c0_172, %c0_173], %571 {strides = array<i32>} : memref<1x1x1xf32, #tpu.memory_space<vmem>>, vector<1x1x1xf32>,
    %c0_174 = arith.constant 0 : index
    %c7 = arith.constant 7 : index
    %c0_175 = arith.constant 0 : index
    %572 = vector.load %arg11[%c0_174, %c7, %c0_175] : memref<1x8x1xi32, #tpu.memory_space<vmem>>, vector<1x1x1xi32>
    %573 = vector.shape_cast %572 : vector<1x1x1xi32> to vector<1x1xi32>
    %574 = vector.shape_cast %561 : vector<1x1xi32> to vector<1x1x1xi32>
    tpu.vector_store %arg11[%c0_174, %c7, %c0_175], %574 {strides = array<i32>} : memref<1x8x1xi32, #tpu.memory_space<vmem>>, vector<1x1x1xi32>,
    %c0_i32_176 = arith.constant 0 : i32
    %c7_i32_177 = arith.constant 7 : i32
    %575 = arith.subi %c7_i32_177, %c0_i32_176 : i32
    %576 = arith.index_cast %575 : i32 to index
    %c0_178 = arith.constant 0 : index
    %577 = vector.load %arg16[%576, %c0_178] : memref<8x128xi32, #tpu.memory_space<vmem>>, vector<1x128xi32>
    %578 = vector.broadcast %561 : vector<1x1xi32> to vector<1x128xi32>
    %579 = arith.cmpi eq, %310, %578 : vector<1x128xi32>
    %c0_i32_179 = arith.constant 0 : i32
    %580 = vector.broadcast %c0_i32_179 : i32 to vector<1x128xi32>
    %581 = arith.select %579, %577, %580 : vector<1x128xi1>, vector<1x128xi32>
    %cst_180 = arith.constant dense<0> : vector<1xi32>
    %582 = vector.multi_reduction <add>, %581, %cst_180 [1] : vector<1x128xi32> to vector<1xi32>
    %583 = vector.shape_cast %582 : vector<1xi32> to vector<1x1xi32>
    %c1_i32_181 = arith.constant 1 : i32
    %584 = arith.subi %575, %c1_i32_181 : i32
    %c0_182 = arith.constant 0 : index
    %585 = arith.index_cast %584 : i32 to index
    %c0_183 = arith.constant 0 : index
    %586 = vector.load %arg11[%c0_182, %585, %c0_183] : memref<1x8x1xi32, #tpu.memory_space<vmem>>, vector<1x1x1xi32>
    %587 = vector.shape_cast %586 : vector<1x1x1xi32> to vector<1x1xi32>
    %588 = vector.shape_cast %583 : vector<1x1xi32> to vector<1x1x1xi32>
    tpu.vector_store %arg11[%c0_182, %585, %c0_183], %588 {strides = array<i32>} : memref<1x8x1xi32, #tpu.memory_space<vmem>>, vector<1x1x1xi32>,
    %c1_i32_184 = arith.constant 1 : i32
    %c7_i32_185 = arith.constant 7 : i32
    %589 = arith.subi %c7_i32_185, %c1_i32_184 : i32
    %590 = arith.index_cast %589 : i32 to index
    %c0_186 = arith.constant 0 : index
    %591 = vector.load %arg16[%590, %c0_186] : memref<8x128xi32, #tpu.memory_space<vmem>>, vector<1x128xi32>
    %592 = vector.broadcast %583 : vector<1x1xi32> to vector<1x128xi32>
    %593 = arith.cmpi eq, %310, %592 : vector<1x128xi32>
    %c0_i32_187 = arith.constant 0 : i32
    %594 = vector.broadcast %c0_i32_187 : i32 to vector<1x128xi32>
    %595 = arith.select %593, %591, %594 : vector<1x128xi1>, vector<1x128xi32>
    %cst_188 = arith.constant dense<0> : vector<1xi32>
    %596 = vector.multi_reduction <add>, %595, %cst_188 [1] : vector<1x128xi32> to vector<1xi32>
    %597 = vector.shape_cast %596 : vector<1xi32> to vector<1x1xi32>
    %c1_i32_189 = arith.constant 1 : i32
    %598 = arith.subi %589, %c1_i32_189 : i32
    %c0_190 = arith.constant 0 : index
    %599 = arith.index_cast %598 : i32 to index
    %c0_191 = arith.constant 0 : index
    %600 = vector.load %arg11[%c0_190, %599, %c0_191] : memref<1x8x1xi32, #tpu.memory_space<vmem>>, vector<1x1x1xi32>
    %601 = vector.shape_cast %600 : vector<1x1x1xi32> to vector<1x1xi32>
    %602 = vector.shape_cast %597 : vector<1x1xi32> to vector<1x1x1xi32>
    tpu.vector_store %arg11[%c0_190, %599, %c0_191], %602 {strides = array<i32>} : memref<1x8x1xi32, #tpu.memory_space<vmem>>, vector<1x1x1xi32>,
    %c2_i32_192 = arith.constant 2 : i32
    %c7_i32_193 = arith.constant 7 : i32
    %603 = arith.subi %c7_i32_193, %c2_i32_192 : i32
    %604 = arith.index_cast %603 : i32 to index
    %c0_194 = arith.constant 0 : index
    %605 = vector.load %arg16[%604, %c0_194] : memref<8x128xi32, #tpu.memory_space<vmem>>, vector<1x128xi32>
    %606 = vector.broadcast %597 : vector<1x1xi32> to vector<1x128xi32>
    %607 = arith.cmpi eq, %310, %606 : vector<1x128xi32>
    %c0_i32_195 = arith.constant 0 : i32
    %608 = vector.broadcast %c0_i32_195 : i32 to vector<1x128xi32>
    %609 = arith.select %607, %605, %608 : vector<1x128xi1>, vector<1x128xi32>
    %cst_196 = arith.constant dense<0> : vector<1xi32>
    %610 = vector.multi_reduction <add>, %609, %cst_196 [1] : vector<1x128xi32> to vector<1xi32>
    %611 = vector.shape_cast %610 : vector<1xi32> to vector<1x1xi32>
    %c1_i32_197 = arith.constant 1 : i32
    %612 = arith.subi %603, %c1_i32_197 : i32
    %c0_198 = arith.constant 0 : index
    %613 = arith.index_cast %612 : i32 to index
    %c0_199 = arith.constant 0 : index
    %614 = vector.load %arg11[%c0_198, %613, %c0_199] : memref<1x8x1xi32, #tpu.memory_space<vmem>>, vector<1x1x1xi32>
    %615 = vector.shape_cast %614 : vector<1x1x1xi32> to vector<1x1xi32>
    %616 = vector.shape_cast %611 : vector<1x1xi32> to vector<1x1x1xi32>
    tpu.vector_store %arg11[%c0_198, %613, %c0_199], %616 {strides = array<i32>} : memref<1x8x1xi32, #tpu.memory_space<vmem>>, vector<1x1x1xi32>,
    %c3_i32_200 = arith.constant 3 : i32
    %c7_i32_201 = arith.constant 7 : i32
    %617 = arith.subi %c7_i32_201, %c3_i32_200 : i32
    %618 = arith.index_cast %617 : i32 to index
    %c0_202 = arith.constant 0 : index
    %619 = vector.load %arg16[%618, %c0_202] : memref<8x128xi32, #tpu.memory_space<vmem>>, vector<1x128xi32>
    %620 = vector.broadcast %611 : vector<1x1xi32> to vector<1x128xi32>
    %621 = arith.cmpi eq, %310, %620 : vector<1x128xi32>
    %c0_i32_203 = arith.constant 0 : i32
    %622 = vector.broadcast %c0_i32_203 : i32 to vector<1x128xi32>
    %623 = arith.select %621, %619, %622 : vector<1x128xi1>, vector<1x128xi32>
    %cst_204 = arith.constant dense<0> : vector<1xi32>
    %624 = vector.multi_reduction <add>, %623, %cst_204 [1] : vector<1x128xi32> to vector<1xi32>
    %625 = vector.shape_cast %624 : vector<1xi32> to vector<1x1xi32>
    %c1_i32_205 = arith.constant 1 : i32
    %626 = arith.subi %617, %c1_i32_205 : i32
    %c0_206 = arith.constant 0 : index
    %627 = arith.index_cast %626 : i32 to index
    %c0_207 = arith.constant 0 : index
    %628 = vector.load %arg11[%c0_206, %627, %c0_207] : memref<1x8x1xi32, #tpu.memory_space<vmem>>, vector<1x1x1xi32>
    %629 = vector.shape_cast %628 : vector<1x1x1xi32> to vector<1x1xi32>
    %630 = vector.shape_cast %625 : vector<1x1xi32> to vector<1x1x1xi32>
    tpu.vector_store %arg11[%c0_206, %627, %c0_207], %630 {strides = array<i32>} : memref<1x8x1xi32, #tpu.memory_space<vmem>>, vector<1x1x1xi32>,
    %c4_i32_208 = arith.constant 4 : i32
    %c7_i32_209 = arith.constant 7 : i32
    %631 = arith.subi %c7_i32_209, %c4_i32_208 : i32
    %632 = arith.index_cast %631 : i32 to index
    %c0_210 = arith.constant 0 : index
    %633 = vector.load %arg16[%632, %c0_210] : memref<8x128xi32, #tpu.memory_space<vmem>>, vector<1x128xi32>
    %634 = vector.broadcast %625 : vector<1x1xi32> to vector<1x128xi32>
    %635 = arith.cmpi eq, %310, %634 : vector<1x128xi32>
    %c0_i32_211 = arith.constant 0 : i32
    %636 = vector.broadcast %c0_i32_211 : i32 to vector<1x128xi32>
    %637 = arith.select %635, %633, %636 : vector<1x128xi1>, vector<1x128xi32>
    %cst_212 = arith.constant dense<0> : vector<1xi32>
    %638 = vector.multi_reduction <add>, %637, %cst_212 [1] : vector<1x128xi32> to vector<1xi32>
    %639 = vector.shape_cast %638 : vector<1xi32> to vector<1x1xi32>
    %c1_i32_213 = arith.constant 1 : i32
    %640 = arith.subi %631, %c1_i32_213 : i32
    %c0_214 = arith.constant 0 : index
    %641 = arith.index_cast %640 : i32 to index
    %c0_215 = arith.constant 0 : index
    %642 = vector.load %arg11[%c0_214, %641, %c0_215] : memref<1x8x1xi32, #tpu.memory_space<vmem>>, vector<1x1x1xi32>
    %643 = vector.shape_cast %642 : vector<1x1x1xi32> to vector<1x1xi32>
    %644 = vector.shape_cast %639 : vector<1x1xi32> to vector<1x1x1xi32>
    tpu.vector_store %arg11[%c0_214, %641, %c0_215], %644 {strides = array<i32>} : memref<1x8x1xi32, #tpu.memory_space<vmem>>, vector<1x1x1xi32>,
    %c5_i32_216 = arith.constant 5 : i32
    %c7_i32_217 = arith.constant 7 : i32
    %645 = arith.subi %c7_i32_217, %c5_i32_216 : i32
    %646 = arith.index_cast %645 : i32 to index
    %c0_218 = arith.constant 0 : index
    %647 = vector.load %arg16[%646, %c0_218] : memref<8x128xi32, #tpu.memory_space<vmem>>, vector<1x128xi32>
    %648 = vector.broadcast %639 : vector<1x1xi32> to vector<1x128xi32>
    %649 = arith.cmpi eq, %310, %648 : vector<1x128xi32>
    %c0_i32_219 = arith.constant 0 : i32
    %650 = vector.broadcast %c0_i32_219 : i32 to vector<1x128xi32>
    %651 = arith.select %649, %647, %650 : vector<1x128xi1>, vector<1x128xi32>
    %cst_220 = arith.constant dense<0> : vector<1xi32>
    %652 = vector.multi_reduction <add>, %651, %cst_220 [1] : vector<1x128xi32> to vector<1xi32>
    %653 = vector.shape_cast %652 : vector<1xi32> to vector<1x1xi32>
    %c1_i32_221 = arith.constant 1 : i32
    %654 = arith.subi %645, %c1_i32_221 : i32
    %c0_222 = arith.constant 0 : index
    %655 = arith.index_cast %654 : i32 to index
    %c0_223 = arith.constant 0 : index
    %656 = vector.load %arg11[%c0_222, %655, %c0_223] : memref<1x8x1xi32, #tpu.memory_space<vmem>>, vector<1x1x1xi32>
    %657 = vector.shape_cast %656 : vector<1x1x1xi32> to vector<1x1xi32>
    %658 = vector.shape_cast %653 : vector<1x1xi32> to vector<1x1x1xi32>
    tpu.vector_store %arg11[%c0_222, %655, %c0_223], %658 {strides = array<i32>} : memref<1x8x1xi32, #tpu.memory_space<vmem>>, vector<1x1x1xi32>,
    %c6_i32_224 = arith.constant 6 : i32
    %c7_i32_225 = arith.constant 7 : i32
    %659 = arith.subi %c7_i32_225, %c6_i32_224 : i32
    %660 = arith.index_cast %659 : i32 to index
    %c0_226 = arith.constant 0 : index
    %661 = vector.load %arg16[%660, %c0_226] : memref<8x128xi32, #tpu.memory_space<vmem>>, vector<1x128xi32>
    %662 = vector.broadcast %653 : vector<1x1xi32> to vector<1x128xi32>
    %663 = arith.cmpi eq, %310, %662 : vector<1x128xi32>
    %c0_i32_227 = arith.constant 0 : i32
    %664 = vector.broadcast %c0_i32_227 : i32 to vector<1x128xi32>
    %665 = arith.select %663, %661, %664 : vector<1x128xi1>, vector<1x128xi32>
    %cst_228 = arith.constant dense<0> : vector<1xi32>
    %666 = vector.multi_reduction <add>, %665, %cst_228 [1] : vector<1x128xi32> to vector<1xi32>
    %667 = vector.shape_cast %666 : vector<1xi32> to vector<1x1xi32>
    %c1_i32_229 = arith.constant 1 : i32
    %668 = arith.subi %659, %c1_i32_229 : i32
    %c0_230 = arith.constant 0 : index
    %669 = arith.index_cast %668 : i32 to index
    %c0_231 = arith.constant 0 : index
    %670 = vector.load %arg11[%c0_230, %669, %c0_231] : memref<1x8x1xi32, #tpu.memory_space<vmem>>, vector<1x1x1xi32>
    %671 = vector.shape_cast %670 : vector<1x1x1xi32> to vector<1x1xi32>
    %672 = vector.shape_cast %667 : vector<1x1xi32> to vector<1x1x1xi32>
    tpu.vector_store %arg11[%c0_230, %669, %c0_231], %672 {strides = array<i32>} : memref<1x8x1xi32, #tpu.memory_space<vmem>>, vector<1x1x1xi32>,
    %c7_i32_232 = arith.constant 7 : i32
    return
  }
  func.func @transform_0(%arg0: i32) -> (i32, i32, i32) {
    %c0_i32 = arith.constant 0 : i32
    %c0_i32_0 = arith.constant 0 : i32
    %c0_i32_1 = arith.constant 0 : i32
    return %arg0, %c0_i32, %c0_i32_0 : i32, i32, i32
  }
  func.func @transform_1(%arg0: i32) -> (i32, i32) {
    %c0_i32 = arith.constant 0 : i32
    %c0_i32_0 = arith.constant 0 : i32
    %c0_i32_1 = arith.constant 0 : i32
    return %c0_i32, %c0_i32_0 : i32, i32
  }
  func.func @transform_2(%arg0: i32) -> (i32, i32) {
    %c0_i32 = arith.constant 0 : i32
    %c0_i32_0 = arith.constant 0 : i32
    %c0_i32_1 = arith.constant 0 : i32
    return %c0_i32, %c0_i32_0 : i32, i32
  }
  func.func @transform_3(%arg0: i32) -> (i32, i32) {
    %c0_i32 = arith.constant 0 : i32
    %c0_i32_0 = arith.constant 0 : i32
    %c0_i32_1 = arith.constant 0 : i32
    return %c0_i32, %c0_i32_0 : i32, i32
  }
  func.func @transform_4(%arg0: i32) -> (i32, i32) {
    %c0_i32 = arith.constant 0 : i32
    %c0_i32_0 = arith.constant 0 : i32
    %c0_i32_1 = arith.constant 0 : i32
    return %c0_i32, %c0_i32_0 : i32, i32
  }
  func.func @transform_5(%arg0: i32) -> (i32, i32) {
    %c0_i32 = arith.constant 0 : i32
    %c0_i32_0 = arith.constant 0 : i32
    %c0_i32_1 = arith.constant 0 : i32
    return %c0_i32, %c0_i32_0 : i32, i32
  }
  func.func @transform_6(%arg0: i32) -> (i32, i32) {
    %c0_i32 = arith.constant 0 : i32
    %c0_i32_0 = arith.constant 0 : i32
    %c0_i32_1 = arith.constant 0 : i32
    return %c0_i32, %c0_i32_0 : i32, i32
  }
  func.func @transform_7(%arg0: i32) -> (i32, i32) {
    %c0_i32 = arith.constant 0 : i32
    %c0_i32_0 = arith.constant 0 : i32
    %c0_i32_1 = arith.constant 0 : i32
    return %c0_i32, %c0_i32_0 : i32, i32
  }
  func.func @transform_8(%arg0: i32) -> (i32, i32) {
    %c0_i32 = arith.constant 0 : i32
    %c0_i32_0 = arith.constant 0 : i32
    %c0_i32_1 = arith.constant 0 : i32
    return %c0_i32, %c0_i32_0 : i32, i32
  }
  func.func @transform_9(%arg0: i32) -> (i32, i32) {
    %c0_i32 = arith.constant 0 : i32
    %c0_i32_0 = arith.constant 0 : i32
    %c0_i32_1 = arith.constant 0 : i32
    return %c0_i32, %c0_i32_0 : i32, i32
  }
  func.func @transform_10(%arg0: i32) -> (i32, i32, i32) {
    %c0_i32 = arith.constant 0 : i32
    %c0_i32_0 = arith.constant 0 : i32
    %c0_i32_1 = arith.constant 0 : i32
    return %arg0, %c0_i32, %c0_i32_0 : i32, i32, i32
  }
  func.func @transform_11(%arg0: i32) -> (i32, i32, i32) {
    %c0_i32 = arith.constant 0 : i32
    %c0_i32_0 = arith.constant 0 : i32
    %c0_i32_1 = arith.constant 0 : i32
    return %arg0, %c0_i32, %c0_i32_0 : i32, i32, i32
  }
}

</mosaic_0001>

<bundles_post_ra>
// kernel: _forward_device.1
= control target key start
LH: loop header
LB: loop body
LE: loop exit
PB: predicated region body
PF: predicated region fallthrough
CT: control target
= control target key end

     0   :  { %17 = vsyncpa [#allocation7], 0  ;;  %s3532_s0 = inlined_call_operand.vmem [shape: f32[2,8,64], index: 0, kind: input, shape index: {}]   ;;  %s3533_s1 = inlined_call_operand.vmem [shape: f32[64,256], index: 1, kind: input, shape index: {}]   ;;  %s3534_s2 = inlined_call_operand.vmem [shape: f32[64,256], index: 2, kind: input, shape index: {}]   ;;  %s3535_s3 = inlined_call_operand.hbm [shape: f32[1,256], index: 3, kind: input, shape index: {}]   ;;  %s3536_s4 = inlined_call_operand.hbm [shape: f32[1,64], index: 4, kind: input, shape index: {}]   ;;  %s3537_s5 = inlined_call_operand.hbm [shape: f32[1,64], index: 5, kind: input, shape index: {}]   ;;  %s3538_s6 = inlined_call_operand.hbm [shape: f32[64,128], index: 6, kind: input, shape index: {}]   ;;  %s3539_s7 = inlined_call_operand.hbm [shape: f32[1,128], index: 7, kind: input, shape index: {}]   ;;  %s3540_s8 = inlined_call_operand.hbm [shape: f32[8,128], index: 8, kind: input, shape index: {}]   ;;  %s3541_s9 = inlined_call_operand.hbm [shape: f32[1,128], index: 9, kind: input, shape index: {}]   ;;  %s3542_s10 = inlined_call_operand.vmem [shape: s32[2,8,1], index: 10, kind: output, shape index: {0}]   ;;  %s3543_s11 = inlined_call_operand.vmem [shape: f32[2,1,1], index: 11, kind: output, shape index: {1}]  }
   0x1   :  { %18 = vsyncpa [#allocation9], 0 }
   0x2   :  { %19 = vsyncpa [#allocation12], 0 }
   0x3   :  { %20 = vsyncpa [#allocation15], 0  ;;  %s2955_s17 = smov 0  }
   0x4 LB: > { %s2881_s18 = smov [#allocation8]   ;;  %s2961_s20 = sadd.s32 4294967295, %s2879_s17   ;;  %s2879_s17 = sphi %s2955_s17, %s26_s17  }
   0x5   : > { %s328_s19 = sshll.u32 %s2881_s18, 4  ;;  %p2373_p0 = scmp.ge.s32.totalorder %s2879_s17, 1  ;;  %s329_s19 = int_to_ptr.vmem [resolvable:$true] %s328_s19 }
   0x6   : > { %p298_p1 = scmp.lt.s32.totalorder %s2879_s17, 3  ;;  %p3544_p2 = scmp.eq.s32.totalorder %s2961_s20, 0 }
   0x7   : > { %s2882_s22 = smov [#allocation11]   ;;  %s2883_s25 = smov [#allocation14]  }
   0x8   : > { %p2966_p3 = pnand %p2373_p0, %p298_p1  ;;  %s349_s23 = sshll.u32 %s2882_s22, 4  ;;  %s2972_s23 = int_to_ptr.vmem [resolvable:$true] %s349_s23 }
   0x9   : > { %s374_s26 = sshll.u32 %s2883_s25, 4  ;;  %s2884_s27 = smov [#allocation6]   ;;  %s2980_s26 = int_to_ptr.vmem [resolvable:$true] %s374_s26 }
   0xa   : > { %p2485_p4 = pneg %p2966_p3  ;;  %s2982_s28 = sshll.u32 %s2884_s27, 4  ;;  %s318_s28 = int_to_ptr.vmem [resolvable:$true] %s2982_s28 }
   0xb   : > { %s2686_s30 = scalar_lea.vmem %s329_s19, 16  ;;  %s2693_s12 = scalar_lea.vmem %s329_s19, 32 }
   0xc   : > { %p2976_p5 = pnand %p3544_p2, %p2485_p4  ;;  %p2687_p7 = scmp.ne.s32.totalorder %s329_s19, %s2686_s30 }
   0xd   : > { %p2694_p10 = scmp.lt.s32.totalorder %s329_s19, %s329_s19  ;;  %p2695_p11 = scmp.lt.s32.totalorder %s2693_s12, %s2686_s30 }
   0xe   : > { %p2986_p6 = pneg %p2976_p5 }
   0xf   : > { %p2696_p12 = por %p2695_p11, %p2694_p10 }
  0x10   : > { %p2689_p8 = pnand %p2687_p7, %p2986_p6 }
  0x12   : > { %p2690_p9 = pneg %p2689_p8 }
  0x14   : > { %p2697_p13 = pnand %p2696_p12, %p2690_p9 }
  0x16   : > { %2700 = shalt.err (!%p2697_p13)
}
  0x17   : > { %2491 = dma.hbm_to_vmem [thread:$0]  (!%p2976_p5), %s3536_s4, 16, %s329_s19, [#allocation9]  }
  0x18   : > { %s2712_s15 = scalar_lea.vmem %s2972_s23, 1024  ;;  %p2720_p7 = scmp.lt.s32.totalorder %s2972_s23, %s2972_s23 }
  0x19   : > { %p2713_p0 = scmp.ne.s32.totalorder %s2972_s23, %s2712_s15  ;;  %p2721_p8 = scmp.lt.s32.totalorder %s2712_s15, %s2712_s15 }
  0x1b   : > { %p2715_p1 = pnand %p2713_p0, %p2986_p6  ;;  %p2722_p9 = por %p2721_p8, %p2720_p7 }
  0x1d   : > { %p2716_p4 = pneg %p2715_p1 }
  0x1f   : > { %p2723_p10 = pnand %p2722_p9, %p2716_p4 }
  0x21   : > { %2726 = shalt.err (!%p2723_p10)
}
  0x22   : > { %s2885_s16 = smov 128   ;;  %s2886_s18 = smov 8  }
  0x23   : > { %2497 = dma.hbm_to_vmem [thread:$0]  (!%p2976_p5), %s3538_s6, 1024, %s2972_s23, [#allocation12], %s2885_s16, %s2885_s16, %s2886_s18  }
  0x24   : > { %s2738_s25 = scalar_lea.vmem %s2980_s26, 128  ;;  %p2746_p0 = scmp.lt.s32.totalorder %s2980_s26, %s2980_s26 }
  0x25   : > { %p2739_p11 = scmp.ne.s32.totalorder %s2980_s26, %s2738_s25  ;;  %p2747_p1 = scmp.lt.s32.totalorder %s2738_s25, %s2738_s25 }
  0x27   : > { %p2741_p12 = pnand %p2739_p11, %p2986_p6  ;;  %p2748_p4 = por %p2747_p1, %p2746_p0 }
  0x29   : > { %p2742_p13 = pneg %p2741_p12 }
  0x2b   : > { %p2749_p7 = pnand %p2748_p4, %p2742_p13 }
  0x2d   : > { %2752 = shalt.err (!%p2749_p7)
}
  0x2e   : > { %2503 = dma.hbm_to_vmem [thread:$0]  (!%p2976_p5), %s3540_s8, 128, %s2980_s26, [#allocation15]  }
  0x2f   : > { %s2764_s23 = scalar_lea.vmem %s318_s28, 32  ;;  %p2772_p11 = scmp.lt.s32.totalorder %s318_s28, %s318_s28 }
  0x30   : > { %p2765_p8 = scmp.ne.s32.totalorder %s318_s28, %s2764_s23  ;;  %p2773_p12 = scmp.lt.s32.totalorder %s2764_s23, %s2764_s23 }
  0x32   : > { %p2767_p9 = pnand %p2765_p8, %p2986_p6  ;;  %p2774_p0 = por %p2773_p12, %p2772_p11 }
  0x34   : > { %p2768_p10 = pneg %p2767_p9 }
  0x36   : > { %p2775_p13 = pnand %p2774_p0, %p2768_p10 }
  0x38   : > { %2778 = shalt.err (!%p2775_p13)
}
  0x39   : > { %2488 = dma.hbm_to_vmem [thread:$0]  (!%p2976_p5), %s3535_s3, 32, %s318_s28, [#allocation7]  }
  0x3a   : > { %s2887_s14 = smov [#allocation10]   ;;  %s2888_s15 = smov [#allocation13]  }
  0x3b   : > { %s339_s26 = sshll.u32 %s2887_s14, 4  ;;  %s363_s16 = sshll.u32 %s2888_s15, 4  ;;  %s340_s26 = int_to_ptr.vmem [resolvable:$true] %s339_s26  ;;  %s364_s16 = int_to_ptr.vmem [resolvable:$true] %s363_s16 }
  0x3c   : > { %s2790_s18 = scalar_lea.vmem %s340_s26, 16  ;;  %s2797_s19 = scalar_lea.vmem %s340_s26, 32 }
  0x3d   : > { %p2791_p1 = scmp.ne.s32.totalorder %s340_s26, %s2790_s18  ;;  %p2798_p8 = scmp.lt.s32.totalorder %s340_s26, %s340_s26 }
  0x3e   : > { %p2799_p9 = scmp.lt.s32.totalorder %s2797_s19, %s2790_s18 }
  0x3f   : > { %p2793_p4 = pnand %p2791_p1, %p2986_p6 }
  0x40   : > { %p2800_p10 = por %p2799_p9, %p2798_p8 }
  0x41   : > { %p2794_p7 = pneg %p2793_p4 }
  0x43   : > { %p2801_p11 = pnand %p2800_p10, %p2794_p7 }
  0x45   : > { %2804 = shalt.err (!%p2801_p11)
}
  0x46   : > { %2494 = dma.hbm_to_vmem [thread:$0]  (!%p2976_p5), %s3537_s5, 16, %s340_s26, [#allocation9]  }
  0x47   : > { %s2816_s25 = scalar_lea.vmem %s364_s16, 16  ;;  %s2823_s27 = scalar_lea.vmem %s364_s16, 32 }
  0x48   : > { %p2817_p12 = scmp.ne.s32.totalorder %s364_s16, %s2816_s25  ;;  %p2824_p1 = scmp.lt.s32.totalorder %s364_s16, %s364_s16 }
  0x49   : > { %p2825_p4 = scmp.lt.s32.totalorder %s2823_s27, %s2816_s25 }
  0x4a   : > { %p2819_p0 = pnand %p2817_p12, %p2986_p6 }
  0x4b   : > { %p2826_p2 = por %p2825_p4, %p2824_p1 }
  0x4c   : > { %p2820_p13 = pneg %p2819_p0 }
  0x4e   : > { %p2827_p8 = pnand %p2826_p2, %p2820_p13 }
  0x50   : > { %2830 = shalt.err (!%p2827_p8)
}
  0x51   : > { %2500 = dma.hbm_to_vmem [thread:$0]  (!%p2976_p5), %s3539_s7, 16, %s364_s16, [#allocation12]  }
  0x52   : > { %s2889_s12 = smov [#allocation16]  }
  0x53   : > { %s385_s13 = sshll.u32 %s2889_s12, 4  ;;  %s386_s13 = int_to_ptr.vmem [resolvable:$true] %s385_s13 }
  0x54   : > { %s2842_s14 = scalar_lea.vmem %s386_s13, 16  ;;  %s2849_s26 = scalar_lea.vmem %s386_s13, 32 }
  0x55   : > { %p2843_p7 = scmp.ne.s32.totalorder %s386_s13, %s2842_s14  ;;  %p2850_p11 = scmp.lt.s32.totalorder %s386_s13, %s386_s13 }
  0x56   : > { %p2851_p12 = scmp.lt.s32.totalorder %s2849_s26, %s2842_s14 }
  0x57   : > { %p2845_p9 = pnand %p2843_p7, %p2986_p6 }
  0x58   : > { %p2852_p2 = por %p2851_p12, %p2850_p11 }
  0x59   : > { %p2846_p10 = pneg %p2845_p9 }
  0x5b   : > { %p2853_p0 = pnand %p2852_p2, %p2846_p10 }
  0x5d   : > { %2856 = shalt.err (!%p2853_p0)
}
  0x5e   : > { %2506 = dma.hbm_to_vmem [thread:$0]  (!%p2976_p5), %s3541_s9, 16, %s386_s13, [#allocation15]  }
  0x5f   : > { %405 = sbr.rel (%p2966_p3) target bundleno = 7198 (0x1c1e), region = 60  ;;  %p3548_p13 = scmp.eq.s32.totalorder (!%p2966_p3), %s2961_s20, 0 }
  0x64   : > { %2862 = dma.done.wait (%p3548_p13), [#allocation7], 32   ;;  %p3549_p6 = pmov %p3548_p13 }
  0x66   : > { %2864 = vsyncadd (%p3549_p6), [#allocation7], 4294967264  ;;  %p3550_p1 = pmov %p3549_p6 }
  0x68   : > { %2866 = dma.done.wait (%p3550_p1), [#allocation9], 32   ;;  %p3551_p4 = pmov %p3550_p1 }
  0x69   : > { %p3552_p8 = pmov %p3550_p1 }
  0x6a   : > { %2868 = vsyncadd (%p3551_p4), [#allocation9], 4294967264 }
  0x6b   : > { %2870 = dma.done.wait (%p3552_p8), [#allocation12], 1040   ;;  %p3553_p5 = pmov %p3550_p1 }
  0x6c   : > { %p3554_p3 = pmov %p3550_p1 }
  0x6d   : > { %2872 = vsyncadd (%p3553_p5), [#allocation12], 4294966256 }
  0x6e   : > { %2874 = dma.done.wait (%p3554_p3), [#allocation15], 144   ;;  %p3555_p7 = pmov %p3550_p1 }
  0x6f   : > { %v2890_v0 = vmov 0.0   ;;  %v497_v1 = vld [vmem:[%s3533_s1 + $0x78] sm:$0xff]  ;;  %v496_v2 = vld [vmem:[%s3533_s1 + $0x70] sm:$0xff]  ;;  %v495_v3 = vld [vmem:[%s3533_s1 + $0x68] sm:$0xff]  ;;  %p470_p9 = scmp.lt.s32.totalorder %s2961_s20, 1  ;;  %vm510_vm0 = vcmask 523264   ;;  %v500_v36 = vlaneseq }
  0x70   : > { %2876 = vsyncadd (%p3555_p7), [#allocation15], 4294967152  ;;  %578 = vmatprep.mubr.f32.mxu0 %v2890_v0  ;;  %673 = vmatprep.mubr.f32.mxu1 %v2890_v0  ;;  %v3083_v4 = vld [vmem:[%s3534_s2 + $0x78] sm:$0xff]  ;;  %v494_v5 = vld [vmem:[%s3533_s1 + $0x60] sm:$0xff]  ;;  %s2891_s24 = smov 64   ;;  %vm736_vm1 = vcmask 253952  }
  0x71   : > { %530 = vmatprep.subr.mxu0 %v497_v1  ;;  %v3091_v6 = vld [vmem:[%s3534_s2 + $0x70] sm:$0xff]  ;;  %625 = vmatprep.subr.mxu1 %v3083_v4  ;;  %v493_v7 = vld [vmem:[%s3533_s1 + $0x58] sm:$0xff]  ;;  %v3100_v8 = vld [vmem:[%s3534_s2 + $0x68] sm:$0xff]  ;;  %s3559_s20 = smov (!%p470_p9, %s2961_s20), 1  ;;  %v3266_v37 = vshrl.u32 %v500_v36, 7  ;;  %vm738_vm2 = vcmask 516352  }
  0x72   : > { %531 = vmatpush1.msra.mxu0 %v496_v2  ;;  %626 = vmatpush1.msra.mxu1 %v3091_v6  ;;  %v492_v9 = vld [vmem:[%s3533_s1 + $0x50] sm:$0xff]  ;;  %v3109_v10 = vld [vmem:[%s3534_s2 + $0x60] sm:$0xff]  ;;  %v3114_v11 = vld [vmem:[%s3534_s2 + $0x58] sm:$0xff]  ;;  %s2390_s27 = sshll.u32 %s3559_s20, 3  ;;  %v2892_v41 = vmov 1966171168  }
  0x73   : > { %532 = vmatprep.subr.mxu0 %v495_v3  ;;  %627 = vmatprep.subr.mxu1 %v3100_v8  ;;  %v491_v12 = vld [vmem:[%s3533_s1 + $0x48] sm:$0xff]  ;;  %v3123_v13 = vld [vmem:[%s3534_s2 + $0x50] sm:$0xff]  ;;  %v490_v14 = vld [vmem:[%s3533_s1 + $0x40] sm:$0xff]  ;;  %s473_s28 = scalar_lea.vmem %s3532_s0, %s2390_s27  ;;  %v502_v38 = vsub.s32 0, %v3266_v37  ;;  %v506_v40 = vsub.s32 1, %v3266_v37  ;;  %v684_v42 = vunpack.c.l.s4 %v2892_v41  ;;  %vm2893_vm3 = vmmov 0   ;;  %s3488_s19 = scalar_lea.vmem %s3542_s10, %s2390_s27 }
  0x74   : > { %533 = vmatpush1.msra.mxu0 %v494_v5  ;;  %628 = vmatpush1.msra.mxu1 %v3109_v10  ;;  %v3137_v15 = vld [vmem:[%s3534_s2 + $0x48] sm:$0xff]  ;;  %v489_v16 = vld [vmem:[%s3533_s1 + $0x38] sm:$0xff]  ;;  %v3146_v17 = vld [vmem:[%s3534_s2 + $0x40] sm:$0xff] }
  0x75   : > { %534 = vmatprep.subr.mxu0 %v493_v7  ;;  %629 = vmatprep.subr.mxu1 %v3114_v11  ;;  %v488_v18 = vld [vmem:[%s3533_s1 + $0x30] sm:$0xff]  ;;  %v3155_v19 = vld [vmem:[%s3534_s2 + $0x38] sm:$0xff]  ;;  %v487_v20 = vld [vmem:[%s3533_s1 + $0x28] sm:$0xff]  ;;  %v685_v45 = vunpack.c.0.s8 %v684_v42 }
  0x76   : > { %535 = vmatpush1.msra.mxu0 %v492_v9  ;;  %630 = vmatpush1.msra.mxu1 %v3123_v13  ;;  %v3164_v21 = vld [vmem:[%s3534_s2 + $0x30] sm:$0xff]  ;;  %v486_v22 = vld [vmem:[%s3533_s1 + $0x20] sm:$0xff]  ;;  %v3174_v23 = vld [vmem:[%s3534_s2 + $0x28] sm:$0xff] }
  0x77   : > { %536 = vmatprep.subr.mxu0 %v491_v12  ;;  %631 = vmatprep.subr.mxu1 %v3137_v15  ;;  %v485_v24 = vld [vmem:[%s3533_s1 + $0x18] sm:$0xff]  ;;  %v3183_v25 = vld [vmem:[%s3534_s2 + $0x20] sm:$0xff]  ;;  %v484_v26 = vld [vmem:[%s3533_s1 + $0x10] sm:$0xff]  ;;  %v3271_v52 = vsub.s32 %v685_v45, %v3266_v37 }
  0x78   : > { %537 = vmatpush1.msra.mxu0 %v490_v14  ;;  %632 = vmatpush1.msra.mxu1 %v3146_v17  ;;  %v3192_v27 = vld [vmem:[%s3534_s2 + $0x18] sm:$0xff]  ;;  %v483_v28 = vld [vmem:[%s3533_s1 + $0x8] sm:$0xff]  ;;  %v3206_v29 = vld [vmem:[%s3534_s2 + $0x10] sm:$0xff] }
  0x79   : > { %538 = vmatprep.subr.mxu0 %v489_v16  ;;  %633 = vmatprep.subr.mxu1 %v3155_v19  ;;  %v482_v30 = vld [vmem:[%s3533_s1] sm:$0xff]  ;;  %v3215_v31 = vld [vmem:[%s3534_s2 + $0x8] sm:$0xff] }
  0x7a   : > { %539 = vmatpush1.msra.mxu0 %v488_v18  ;;  %634 = vmatpush1.msra.mxu1 %v3164_v21  ;;  %v481_v32 = vld [vmem:[%s473_s28] sm:$0xff]  ;;  %s480_s28 = scalar_lea.vmem %s3543_s11, %s3559_s20 }
  0x7b   : > { %540 = vmatprep.subr.mxu0 %v487_v20  ;;  %635 = vmatprep.subr.mxu1 %v3174_v23  ;;  %v3221_v33 = vld [vmem:[%s3534_s2] sm:$0xff] }
  0x7c   : > { %541 = vmatpush1.msra.mxu0 %v486_v22  ;;  %636 = vmatpush1.msra.mxu1 %v3183_v25  ;;  %v603_v34 = vld [vmem:[#allocation8] sm:$0x1]  ;;  %v604_v35 = vld [vmem:[#allocation10] sm:$0x1]  ;;  %v498_v39 = vld [vmem:[#allocation6] sm:$0x3] }
  0x7d   : > { %542 = vmatprep.subr.mxu0 %v485_v24  ;;  %637 = vmatprep.subr.mxu1 %v3192_v27  ;;  %v503_v43 = vrot.slane %v498_v39, %v502_v38  ;;  %v507_v44 = vrot.slane %v498_v39, %v506_v40 }
  0x7e   : > { %543 = vmatpush1.msra.mxu0 %v484_v26  ;;  %638 = vmatpush1.msra.mxu1 %v3206_v29 }
  0x7f   : > { %544 = vmatprep.subr.mxu0 %v483_v28  ;;  %639 = vmatprep.subr.mxu1 %v3215_v31 }
  0x80   : > { %545 = vmatpush1.msra.mxu0 %v482_v30  ;;  %640 = vmatpush1.msra.mxu1 %v3221_v33 }
  0x81   : > { %2392 = vmatmul.mubr.msk.f32.vlgmr.msra.gmra.mxu0 %vm510_vm0, %v481_v32  ;;  %2393 = vmatmul.mubr.msk.f32.vlgmr.msra.gmra.mxu1 %vm510_vm0, %v603_v34 }
  0x82   : > { %720 = vrot.lane.b32.xlu0 %v604_v35, %s2891_s24  ;;  %761 = vmatprep.subr.mxu0 %v3083_v4 }
  0x83   : > { %809 = vmatprep.mubr.f32.mxu0 %v2890_v0  ;;  %762 = vmatpush1.msra.mxu0 %v3091_v6 }
  0x84   : > { %891 = vmatprep.subr.mxu1 %v3083_v4  ;;  %763 = vmatprep.subr.mxu0 %v3100_v8 }
  0x85   : > { %892 = vmatpush1.msra.mxu1 %v3091_v6  ;;  %764 = vmatpush1.msra.mxu0 %v3109_v10 }
  0x86   : > { %893 = vmatprep.subr.mxu1 %v3100_v8  ;;  %765 = vmatprep.subr.mxu0 %v3114_v11 }
  0x87   : > { %894 = vmatpush1.msra.mxu1 %v3109_v10  ;;  %766 = vmatpush1.msra.mxu0 %v3123_v13 }
  0x88   : > { %895 = vmatprep.subr.mxu1 %v3114_v11  ;;  %767 = vmatprep.subr.mxu0 %v3137_v15 }
  0x89   : > { %896 = vmatpush1.msra.mxu1 %v3123_v13  ;;  %768 = vmatpush1.msra.mxu0 %v3146_v17 }
  0x8a   : > { %897 = vmatprep.subr.mxu1 %v3137_v15  ;;  %769 = vmatprep.subr.mxu0 %v3155_v19 }
  0x8b   : > { %898 = vmatpush1.msra.mxu1 %v3146_v17  ;;  %770 = vmatpush1.msra.mxu0 %v3164_v21 }
  0x8c   : > { %899 = vmatprep.subr.mxu1 %v3155_v19  ;;  %771 = vmatprep.subr.mxu0 %v3174_v23 }
  0x8d   : > { %900 = vmatpush1.msra.mxu1 %v3164_v21  ;;  %772 = vmatpush1.msra.mxu0 %v3183_v25 }
  0x8e   : > { %901 = vmatprep.subr.mxu1 %v3174_v23  ;;  %773 = vmatprep.subr.mxu0 %v3192_v27 }
  0x8f   : > { %902 = vmatpush1.msra.mxu1 %v3183_v25  ;;  %774 = vmatpush1.msra.mxu0 %v3206_v29 }
  0x90   : > { %903 = vmatprep.subr.mxu1 %v3192_v27  ;;  %775 = vmatprep.subr.mxu0 %v3215_v31 }
  0x91   : > { %904 = vmatpush1.msra.mxu1 %v3206_v29  ;;  %776 = vmatpush1.msra.mxu0 %v3221_v33 }
  0x92   : > { %905 = vmatprep.subr.mxu1 %v3215_v31  ;;  %939 = vmatprep.mubr.f32.mxu1 %v2890_v0 }
  0x93   : > { %906 = vmatpush1.msra.mxu1 %v3221_v33  ;;  %1021 = vmatprep.subr.mxu0 %v3083_v4 }
  0x94   : > { %1151 = vmatprep.subr.mxu1 %v3083_v4 }
  0xf4   : > { %v721_v2 = vpop.permute.xlu0 %720 }
 0x141   : > { %v580_v46 = vpop.f32.mrf.mxu0  ;;  %v675_v48 = vpop.f32.mrf.mxu1 }
 0x142   : > { %v581_v47 = vadd.f32 %v580_v46, %v503_v43 }
 0x143   : > { %v582_v49 = vpop.f32.mrf.mxu0  ;;  %v677_v51 = vpop.f32.mrf.mxu1 }
 0x144   : > { %585 = vst [vmem:[#allocation2] sm:$0xff] %v581_v47  ;;  %v583_v50 = vadd.f32 %v582_v49, %v507_v44  ;;  %v682_v53 = vcombine.low %v675_v48, %v677_v51 }
 0x146   : > { %586 = vst [vmem:[#allocation2 + $0x8] sm:$0xff] %v583_v50  ;;  %v689_v54 = vrot.slane %v682_v53, %v3271_v52 }
 0x148   : > { %v696_v55 = vrot.slane %v689_v54, %v3271_v52 }
 0x14d   : > { %v605_v56 = vld [vmem:[#allocation2] ss:$8 sm:$0x3]  ;;  %v741_v38 = vld [vmem:[#allocation2 + $0x1] ss:$8 sm:$0x3] }
 0x14e   : > { %v698_v57 = vadd.f32 %v696_v55, %v605_v56 }
 0x150   : > { %709 = vrot.lane.b32.xlu1 %v698_v57, %s2891_s24  ;;  %v2394_v58 = vmul.f32 -1.442695, %v698_v57  ;;  %v706_v59 = vrot.slane %v698_v57, 1 }
 0x152   : > { %2543 = vpow2.f32 %v2394_v58 }
 0x153   : > { %2545 = vtanh.f32 %v706_v59 }
 0x15f   : > { %v2544_v60 = vpop.eup %2543 }
 0x160   : > { %v702_v61 = vadd.f32 1.0, %v2544_v60  ;;  %v2546_v62 = vpop.eup %2545 }
 0x162   : > { %2547 = vrcp.f32 %v702_v61 }
 0x16f   : > { %v2548_v63 = vpop.eup %2547 }
 0x170   : > { %v724_v1 = vmul.f32 %v2548_v63, %v2546_v62  ;;  %v723_v3 = vmul.f32 %v2548_v63, %v721_v2  ;;  %v871_v2 = vld [vmem:[#allocation2 + $0x2] ss:$8 sm:$0x3] }
 0x172   : > { %726 = vrot.lane.b32.xlu0 %v724_v1, %s2891_s24 }
 0x1c2   : > { %v710_v12 = vpop.permute.xlu1 %709 }
 0x1c3   : > { %v711_v14 = vrot.slane %v710_v12, 1 }
 0x1c5   : > { %v2395_v16 = vmul.f32 -1.442695, %v711_v14 }
 0x1e4   : > { %v727_v5 = vpop.permute.xlu0 %726 }
 0x1e5   : > { %v729_v7 = vadd.f32 %v727_v5, %v723_v3 }
 0x1e7   : > { %2549 = vtanh.f32 %v729_v7 }
 0x1e8   : > { %2551 = vpow2.f32 %v2395_v16 }
 0x1f4   : > { %v2550_v9 = vpop.eup %2549 }
 0x1f5   : > { %732 = vrot.lane.b32.xlu1 %v2550_v9, %s2891_s24  ;;  %v2552_v18 = vpop.eup %2551 }
 0x1f6   : > { %v716_v20 = vadd.f32 1.0, %v2552_v18 }
 0x1f8   : > { %2553 = vrcp.f32 %v716_v20 }
 0x205   : > { %v2554_v22 = vpop.eup %2553 }
 0x267   : > { %v733_v24 = vpop.permute.xlu1 %732 }
 0x268   : > { %v735_v26 = vmul.f32 %v2554_v22, %v733_v24 }
 0x26a   : > { %737 = vst.msk [vmem:[#allocation3] sm:$0x1] %vm736_vm1, %v735_v26  ;;  %2396 = vmatmul.mubr.msk.f32.vlgmr.msra.gmra.mxu0 %vm510_vm0, %v735_v26 }
 0x26b   : > { %739 = vst.msk [vmem:[#allocation3 + $0x7] sm:$0x1] %vm738_vm2, %v735_v26  ;;  %1022 = vmatpush1.msra.mxu0 %v3091_v6  ;;  %1069 = vmatprep.mubr.f32.mxu0 %v2890_v0 }
 0x26c   : > { %1023 = vmatprep.subr.mxu0 %v3100_v8 }
 0x26d   : > { %1024 = vmatpush1.msra.mxu0 %v3109_v10 }
 0x26e   : > { %1025 = vmatprep.subr.mxu0 %v3114_v11 }
 0x26f   : > { %1026 = vmatpush1.msra.mxu0 %v3123_v13 }
 0x270   : > { %1027 = vmatprep.subr.mxu0 %v3137_v15 }
 0x271   : > { %1028 = vmatpush1.msra.mxu0 %v3146_v17 }
 0x272   : > { %1029 = vmatprep.subr.mxu0 %v3155_v19 }
 0x273   : > { %1030 = vmatpush1.msra.mxu0 %v3164_v21 }
 0x274   : > { %1031 = vmatprep.subr.mxu0 %v3174_v23 }
 0x275   : > { %1032 = vmatpush1.msra.mxu0 %v3183_v25 }
 0x276   : > { %1033 = vmatprep.subr.mxu0 %v3192_v27 }
 0x277   : > { %1034 = vmatpush1.msra.mxu0 %v3206_v29 }
 0x278   : > { %1035 = vmatprep.subr.mxu0 %v3215_v31 }
 0x279   : > { %1036 = vmatpush1.msra.mxu0 %v3221_v33 }
 0x27a   : > { %1281 = vmatprep.subr.mxu0 %v3083_v4 }
 0x32a   : > { %v811_v28 = vpop.f32.mrf.mxu0 }
 0x32c   : > { %v813_v30 = vpop.f32.mrf.mxu0 }
 0x32d   : > { %v818_v32 = vcombine.low %v811_v28, %v813_v30 }
 0x32f   : > { %v825_v34 = vrot.slane %v818_v32, %v3271_v52 }
 0x331   : > { %v832_v35 = vrot.slane %v825_v34, %v3271_v52 }
 0x333   : > { %v834_v39 = vadd.f32 %v832_v35, %v741_v38 }
 0x335   : > { %845 = vrot.lane.b32.xlu1 %v834_v39, %s2891_s24  ;;  %v2397_v40 = vmul.f32 -1.442695, %v834_v39  ;;  %v842_v41 = vrot.slane %v834_v39, 1 }
 0x337   : > { %2555 = vpow2.f32 %v2397_v40 }
 0x338   : > { %2557 = vtanh.f32 %v842_v41 }
 0x344   : > { %v2556_v42 = vpop.eup %2555 }
 0x345   : > { %v838_v43 = vadd.f32 1.0, %v2556_v42  ;;  %v2558_v44 = vpop.eup %2557 }
 0x347   : > { %2559 = vrcp.f32 %v838_v43 }
 0x354   : > { %v2560_v45 = vpop.eup %2559 }
 0x355   : > { %v856_v46 = vmul.f32 %v2560_v45, %v2558_v44  ;;  %v855_v47 = vmul.f32 %v2560_v45, %v729_v7 }
 0x357   : > { %858 = vrot.lane.b32.xlu0 %v856_v46, %s2891_s24  ;;  %v1001_v46 = vld [vmem:[#allocation2 + $0x3] ss:$8 sm:$0x3] }
 0x3a7   : > { %v846_v51 = vpop.permute.xlu1 %845 }
 0x3a8   : > { %v847_v53 = vrot.slane %v846_v51, 1 }
 0x3aa   : > { %v2398_v54 = vmul.f32 -1.442695, %v847_v53 }
 0x3c9   : > { %v859_v48 = vpop.permute.xlu0 %858 }
 0x3ca   : > { %v861_v49 = vadd.f32 %v859_v48, %v855_v47 }
 0x3cc   : > { %2561 = vtanh.f32 %v861_v49 }
 0x3cd   : > { %2563 = vpow2.f32 %v2398_v54 }
 0x3d9   : > { %v2562_v50 = vpop.eup %2561 }
 0x3da   : > { %864 = vrot.lane.b32.xlu0 %v2562_v50, %s2891_s24  ;;  %v2564_v55 = vpop.eup %2563 }
 0x3db   : > { %v852_v56 = vadd.f32 1.0, %v2564_v55 }
 0x3dd   : > { %2565 = vrcp.f32 %v852_v56 }
 0x3ea   : > { %v2566_v57 = vpop.eup %2565 }
 0x44c   : > { %v865_v58 = vpop.permute.xlu0 %864 }
 0x44d   : > { %v867_v59 = vmul.f32 %v2566_v57, %v865_v58 }
 0x44f   : > { %868 = vst.msk [vmem:[#allocation3 + $0x1] sm:$0x1] %vm736_vm1, %v867_v59  ;;  %2399 = vmatmul.mubr.msk.f32.vlgmr.msra.gmra.mxu1 %vm510_vm0, %v867_v59 }
 0x450   : > { %869 = vst.msk [vmem:[#allocation3 + $0x6] sm:$0x1] %vm738_vm2, %v867_v59  ;;  %1152 = vmatpush1.msra.mxu1 %v3091_v6  ;;  %1199 = vmatprep.mubr.f32.mxu1 %v2890_v0 }
 0x451   : > { %1153 = vmatprep.subr.mxu1 %v3100_v8 }
 0x452   : > { %1154 = vmatpush1.msra.mxu1 %v3109_v10 }
 0x453   : > { %1155 = vmatprep.subr.mxu1 %v3114_v11 }
 0x454   : > { %1156 = vmatpush1.msra.mxu1 %v3123_v13 }
 0x455   : > { %1157 = vmatprep.subr.mxu1 %v3137_v15 }
 0x456   : > { %1158 = vmatpush1.msra.mxu1 %v3146_v17 }
 0x457   : > { %1159 = vmatprep.subr.mxu1 %v3155_v19 }
 0x458   : > { %1160 = vmatpush1.msra.mxu1 %v3164_v21 }
 0x459   : > { %1161 = vmatprep.subr.mxu1 %v3174_v23 }
 0x45a   : > { %1162 = vmatpush1.msra.mxu1 %v3183_v25 }
 0x45b   : > { %1163 = vmatprep.subr.mxu1 %v3192_v27 }
 0x45c   : > { %1164 = vmatpush1.msra.mxu1 %v3206_v29 }
 0x45d   : > { %1165 = vmatprep.subr.mxu1 %v3215_v31 }
 0x45e   : > { %1166 = vmatpush1.msra.mxu1 %v3221_v33 }
 0x45f   : > { %1411 = vmatprep.subr.mxu1 %v3083_v4 }
 0x50f   : > { %v941_v60 = vpop.f32.mrf.mxu1 }
 0x511   : > { %v943_v61 = vpop.f32.mrf.mxu1 }
 0x512   : > { %v948_v62 = vcombine.low %v941_v60, %v943_v61 }
 0x514   : > { %v955_v63 = vrot.slane %v948_v62, %v3271_v52 }
 0x516   : > { %v962_v1 = vrot.slane %v955_v63, %v3271_v52 }
 0x518   : > { %v964_v3 = vadd.f32 %v962_v1, %v871_v2 }
 0x51a   : > { %975 = vrot.lane.b32.xlu0 %v964_v3, %s2891_s24  ;;  %v2400_v5 = vmul.f32 -1.442695, %v964_v3  ;;  %v972_v7 = vrot.slane %v964_v3, 1 }
 0x51c   : > { %2567 = vpow2.f32 %v2400_v5 }
 0x51d   : > { %2569 = vtanh.f32 %v972_v7 }
 0x529   : > { %v2568_v9 = vpop.eup %2567 }
 0x52a   : > { %v968_v12 = vadd.f32 1.0, %v2568_v9  ;;  %v2570_v14 = vpop.eup %2569 }
 0x52c   : > { %2571 = vrcp.f32 %v968_v12 }
 0x539   : > { %v2572_v16 = vpop.eup %2571 }
 0x53a   : > { %v986_v18 = vmul.f32 %v2572_v16, %v2570_v14  ;;  %v985_v20 = vmul.f32 %v2572_v16, %v861_v49  ;;  %v1131_v16 = vld [vmem:[#allocation2 + $0x4] ss:$8 sm:$0x3] }
 0x53c   : > { %988 = vrot.lane.b32.xlu1 %v986_v18, %s2891_s24 }
 0x58c   : > { %v976_v28 = vpop.permute.xlu0 %975 }
 0x58d   : > { %v977_v30 = vrot.slane %v976_v28, 1 }
 0x58f   : > { %v2401_v32 = vmul.f32 -1.442695, %v977_v30 }
 0x5ae   : > { %v989_v22 = vpop.permute.xlu1 %988 }
 0x5af   : > { %v991_v24 = vadd.f32 %v989_v22, %v985_v20 }
 0x5b1   : > { %2573 = vtanh.f32 %v991_v24 }
 0x5b2   : > { %2575 = vpow2.f32 %v2401_v32 }
 0x5be   : > { %v2574_v26 = vpop.eup %2573 }
 0x5bf   : > { %994 = vrot.lane.b32.xlu1 %v2574_v26, %s2891_s24  ;;  %v2576_v34 = vpop.eup %2575 }
 0x5c0   : > { %v982_v35 = vadd.f32 1.0, %v2576_v34 }
 0x5c2   : > { %2577 = vrcp.f32 %v982_v35 }
 0x5cf   : > { %v2578_v38 = vpop.eup %2577 }
 0x631   : > { %v995_v39 = vpop.permute.xlu1 %994 }
 0x632   : > { %v997_v40 = vmul.f32 %v2578_v38, %v995_v39 }
 0x634   : > { %998 = vst.msk [vmem:[#allocation3 + $0x2] sm:$0x1] %vm736_vm1, %v997_v40  ;;  %2402 = vmatmul.mubr.msk.f32.vlgmr.msra.gmra.mxu0 %vm510_vm0, %v997_v40 }
 0x635   : > { %999 = vst.msk [vmem:[#allocation3 + $0x5] sm:$0x1] %vm738_vm2, %v997_v40  ;;  %1282 = vmatpush1.msra.mxu0 %v3091_v6  ;;  %1329 = vmatprep.mubr.f32.mxu0 %v2890_v0 }
 0x636   : > { %1283 = vmatprep.subr.mxu0 %v3100_v8 }
 0x637   : > { %1284 = vmatpush1.msra.mxu0 %v3109_v10 }
 0x638   : > { %1285 = vmatprep.subr.mxu0 %v3114_v11 }
 0x639   : > { %1286 = vmatpush1.msra.mxu0 %v3123_v13 }
 0x63a   : > { %1287 = vmatprep.subr.mxu0 %v3137_v15 }
 0x63b   : > { %1288 = vmatpush1.msra.mxu0 %v3146_v17 }
 0x63c   : > { %1289 = vmatprep.subr.mxu0 %v3155_v19 }
 0x63d   : > { %1290 = vmatpush1.msra.mxu0 %v3164_v21 }
 0x63e   : > { %1291 = vmatprep.subr.mxu0 %v3174_v23 }
 0x63f   : > { %1292 = vmatpush1.msra.mxu0 %v3183_v25 }
 0x640   : > { %1293 = vmatprep.subr.mxu0 %v3192_v27 }
 0x641   : > { %1294 = vmatpush1.msra.mxu0 %v3206_v29 }
 0x642   : > { %1295 = vmatprep.subr.mxu0 %v3215_v31 }
 0x643   : > { %1296 = vmatpush1.msra.mxu0 %v3221_v33 }
 0x644   : > { %1541 = vmatprep.subr.mxu0 %v3083_v4 }
 0x6f4   : > { %v1071_v41 = vpop.f32.mrf.mxu0 }
 0x6f6   : > { %v1073_v42 = vpop.f32.mrf.mxu0 }
 0x6f7   : > { %v1078_v43 = vcombine.low %v1071_v41, %v1073_v42 }
 0x6f9   : > { %v1085_v44 = vrot.slane %v1078_v43, %v3271_v52 }
 0x6fb   : > { %v1092_v45 = vrot.slane %v1085_v44, %v3271_v52 }
 0x6fd   : > { %v1094_v47 = vadd.f32 %v1092_v45, %v1001_v46 }
 0x6ff   : > { %1105 = vrot.lane.b32.xlu1 %v1094_v47, %s2891_s24  ;;  %v2403_v48 = vmul.f32 -1.442695, %v1094_v47  ;;  %v1102_v49 = vrot.slane %v1094_v47, 1 }
 0x701   : > { %2579 = vpow2.f32 %v2403_v48 }
 0x702   : > { %2581 = vtanh.f32 %v1102_v49 }
 0x70e   : > { %v2580_v50 = vpop.eup %2579 }
 0x70f   : > { %v1098_v51 = vadd.f32 1.0, %v2580_v50  ;;  %v2582_v53 = vpop.eup %2581 }
 0x711   : > { %2583 = vrcp.f32 %v1098_v51 }
 0x71e   : > { %v2584_v4 = vpop.eup %2583 }
 0x71f   : > { %v1116_v54 = vmul.f32 %v2584_v4, %v2582_v53  ;;  %v1115_v55 = vmul.f32 %v2584_v4, %v991_v24 }
 0x721   : > { %1118 = vrot.lane.b32.xlu0 %v1116_v54, %s2891_s24 }
 0x771   : > { %v1106_v59 = vpop.permute.xlu1 %1105 }
 0x772   : > { %v1107_v60 = vrot.slane %v1106_v59, 1 }
 0x774   : > { %v2404_v61 = vmul.f32 -1.442695, %v1107_v60 }
 0x793   : > { %v1119_v56 = vpop.permute.xlu0 %1118 }
 0x794   : > { %v1121_v57 = vadd.f32 %v1119_v56, %v1115_v55 }
 0x796   : > { %2585 = vtanh.f32 %v1121_v57 }
 0x797   : > { %2587 = vpow2.f32 %v2404_v61 }
 0x7a3   : > { %v2586_v58 = vpop.eup %2585 }
 0x7a4   : > { %1124 = vrot.lane.b32.xlu0 %v2586_v58, %s2891_s24  ;;  %v2588_v62 = vpop.eup %2587 }
 0x7a5   : > { %v1112_v63 = vadd.f32 1.0, %v2588_v62 }
 0x7a7   : > { %2589 = vrcp.f32 %v1112_v63 }
 0x7b4   : > { %v2590_v1 = vpop.eup %2589 }
 0x816   : > { %v1125_v2 = vpop.permute.xlu0 %1124 }
 0x817   : > { %v1127_v3 = vmul.f32 %v2590_v1, %v1125_v2  ;;  %v1391_v1 = vld [vmem:[#allocation2 + $0x6] ss:$8 sm:$0x3] }
 0x819   : > { %1128 = vst.msk [vmem:[#allocation3 + $0x3] sm:$0x1] %vm736_vm1, %v1127_v3  ;;  %2405 = vmatmul.mubr.msk.f32.vlgmr.msra.gmra.mxu1 %vm510_vm0, %v1127_v3 }
 0x81a   : > { %1129 = vst.msk [vmem:[#allocation3 + $0x4] sm:$0x1] %vm738_vm2, %v1127_v3  ;;  %1412 = vmatpush1.msra.mxu1 %v3091_v6  ;;  %1459 = vmatprep.mubr.f32.mxu1 %v2890_v0 }
 0x81b   : > { %1413 = vmatprep.subr.mxu1 %v3100_v8 }
 0x81c   : > { %1414 = vmatpush1.msra.mxu1 %v3109_v10 }
 0x81d   : > { %1415 = vmatprep.subr.mxu1 %v3114_v11 }
 0x81e   : > { %1416 = vmatpush1.msra.mxu1 %v3123_v13 }
 0x81f   : > { %1417 = vmatprep.subr.mxu1 %v3137_v15 }
 0x820   : > { %1418 = vmatpush1.msra.mxu1 %v3146_v17 }
 0x821   : > { %1419 = vmatprep.subr.mxu1 %v3155_v19 }
 0x822   : > { %1420 = vmatpush1.msra.mxu1 %v3164_v21 }
 0x823   : > { %1421 = vmatprep.subr.mxu1 %v3174_v23 }
 0x824   : > { %1422 = vmatpush1.msra.mxu1 %v3183_v25 }
 0x825   : > { %1423 = vmatprep.subr.mxu1 %v3192_v27 }
 0x826   : > { %1424 = vmatpush1.msra.mxu1 %v3206_v29 }
 0x827   : > { %1425 = vmatprep.subr.mxu1 %v3215_v31 }
 0x828   : > { %1426 = vmatpush1.msra.mxu1 %v3221_v33 }
 0x829   : > { %2438 = vmatprep.subr.mxu1 %v2890_v0 }
 0x8d9   : > { %v1201_v5 = vpop.f32.mrf.mxu1 }
 0x8db   : > { %v1203_v7 = vpop.f32.mrf.mxu1 }
 0x8dc   : > { %v1208_v9 = vcombine.low %v1201_v5, %v1203_v7 }
 0x8de   : > { %v1215_v12 = vrot.slane %v1208_v9, %v3271_v52 }
 0x8e0   : > { %v1222_v14 = vrot.slane %v1215_v12, %v3271_v52 }
 0x8e2   : > { %v1224_v18 = vadd.f32 %v1222_v14, %v1131_v16 }
 0x8e4   : > { %1235 = vrot.lane.b32.xlu0 %v1224_v18, %s2891_s24  ;;  %v2406_v20 = vmul.f32 -1.442695, %v1224_v18  ;;  %v1232_v22 = vrot.slane %v1224_v18, 1 }
 0x8e6   : > { %2591 = vpow2.f32 %v2406_v20 }
 0x8e7   : > { %2593 = vtanh.f32 %v1232_v22 }
 0x8f3   : > { %v2592_v24 = vpop.eup %2591 }
 0x8f4   : > { %v1228_v26 = vadd.f32 1.0, %v2592_v24  ;;  %v2594_v28 = vpop.eup %2593 }
 0x8f6   : > { %2595 = vrcp.f32 %v1228_v26 }
 0x903   : > { %v2596_v30 = vpop.eup %2595 }
 0x904   : > { %v1246_v32 = vmul.f32 %v2596_v30, %v2594_v28  ;;  %v1245_v34 = vmul.f32 %v2596_v30, %v1121_v57 }
 0x906   : > { %1248 = vrot.lane.b32.xlu1 %v1246_v32, %s2891_s24 }
 0x956   : > { %v1236_v40 = vpop.permute.xlu0 %1235 }
 0x957   : > { %v1237_v41 = vrot.slane %v1236_v40, 1 }
 0x959   : > { %v2407_v42 = vmul.f32 -1.442695, %v1237_v41 }
 0x978   : > { %v1249_v35 = vpop.permute.xlu1 %1248 }
 0x979   : > { %v1251_v38 = vadd.f32 %v1249_v35, %v1245_v34 }
 0x97b   : > { %2597 = vtanh.f32 %v1251_v38 }
 0x97c   : > { %2599 = vpow2.f32 %v2407_v42 }
 0x988   : > { %v2598_v39 = vpop.eup %2597 }
 0x989   : > { %1254 = vrot.lane.b32.xlu1 %v2598_v39, %s2891_s24  ;;  %v2600_v43 = vpop.eup %2599 }
 0x98a   : > { %v1242_v44 = vadd.f32 1.0, %v2600_v43 }
 0x98c   : > { %2601 = vrcp.f32 %v1242_v44 }
 0x999   : > { %v2602_v45 = vpop.eup %2601 }
 0x9fb   : > { %v1255_v46 = vpop.permute.xlu1 %1254 }
 0x9fc   : > { %v1257_v47 = vmul.f32 %v2602_v45, %v1255_v46  ;;  %v1521_v45 = vld [vmem:[#allocation2 + $0x7] ss:$8 sm:$0x3] }
 0x9fe   : > { %1258 = vst.msk [vmem:[#allocation3 + $0x4] sm:$0x1] %vm736_vm1, %v1257_v47  ;;  %2408 = vmatmul.mubr.msk.f32.vlgmr.msra.gmra.mxu0 %vm510_vm0, %v1257_v47 }
 0x9ff   : > { %1259 = vst.msk [vmem:[#allocation3 + $0x3] sm:$0x1] %vm738_vm2, %v1257_v47  ;;  %1542 = vmatpush1.msra.mxu0 %v3091_v6  ;;  %1589 = vmatprep.mubr.f32.mxu0 %v2890_v0 }
 0xa00   : > { %1543 = vmatprep.subr.mxu0 %v3100_v8 }
 0xa01   : > { %1544 = vmatpush1.msra.mxu0 %v3109_v10 }
 0xa02   : > { %1545 = vmatprep.subr.mxu0 %v3114_v11 }
 0xa03   : > { %1546 = vmatpush1.msra.mxu0 %v3123_v13 }
 0xa04   : > { %1547 = vmatprep.subr.mxu0 %v3137_v15  ;;  %v1261_v15 = vld [vmem:[#allocation2 + $0x5] ss:$8 sm:$0x3] }
 0xa05   : > { %1548 = vmatpush1.msra.mxu0 %v3146_v17 }
 0xa06   : > { %1549 = vmatprep.subr.mxu0 %v3155_v19 }
 0xa07   : > { %1550 = vmatpush1.msra.mxu0 %v3164_v21 }
 0xa08   : > { %1551 = vmatprep.subr.mxu0 %v3174_v23 }
 0xa09   : > { %1552 = vmatpush1.msra.mxu0 %v3183_v25 }
 0xa0a   : > { %1553 = vmatprep.subr.mxu0 %v3192_v27 }
 0xa0b   : > { %1554 = vmatpush1.msra.mxu0 %v3206_v29 }
 0xa0c   : > { %1555 = vmatprep.subr.mxu0 %v3215_v31 }
 0xa0d   : > { %1556 = vmatpush1.msra.mxu0 %v3221_v33 }
 0xabe   : > { %v1331_v6 = vpop.f32.mrf.mxu0 }
 0xac0   : > { %v1333_v8 = vpop.f32.mrf.mxu0 }
 0xac1   : > { %v1338_v10 = vcombine.low %v1331_v6, %v1333_v8 }
 0xac3   : > { %v1345_v11 = vrot.slane %v1338_v10, %v3271_v52 }
 0xac5   : > { %v1352_v13 = vrot.slane %v1345_v11, %v3271_v52 }
 0xac7   : > { %v1354_v17 = vadd.f32 %v1352_v13, %v1261_v15 }
 0xac9   : > { %1365 = vrot.lane.b32.xlu1 %v1354_v17, %s2891_s24  ;;  %v2409_v19 = vmul.f32 -1.442695, %v1354_v17  ;;  %v1362_v21 = vrot.slane %v1354_v17, 1  ;;  %v1658_v17 = vld [vmem:[#allocation11 + $0x38] sm:$0xff] }
 0xacb   : > { %2603 = vpow2.f32 %v2409_v19  ;;  %v1657_v19 = vld [vmem:[#allocation11 + $0x30] sm:$0xff] }
 0xacc   : > { %2605 = vtanh.f32 %v1362_v21 }
 0xad8   : > { %v2604_v23 = vpop.eup %2603 }
 0xad9   : > { %v1358_v25 = vadd.f32 1.0, %v2604_v23  ;;  %v2606_v27 = vpop.eup %2605 }
 0xadb   : > { %2607 = vrcp.f32 %v1358_v25 }
 0xae8   : > { %v2608_v29 = vpop.eup %2607 }
 0xae9   : > { %v1376_v31 = vmul.f32 %v2608_v29, %v2606_v27  ;;  %v1375_v33 = vmul.f32 %v2608_v29, %v1251_v38  ;;  %v1655_v27 = vld [vmem:[#allocation11 + $0x20] sm:$0xff]  ;;  %v1654_v29 = vld [vmem:[#allocation11 + $0x18] sm:$0xff] }
 0xaeb   : > { %1378 = vrot.lane.b32.xlu0 %v1376_v31, %s2891_s24  ;;  %v1653_v31 = vld [vmem:[#allocation11 + $0x10] sm:$0xff] }
 0xb3b   : > { %v1366_v51 = vpop.permute.xlu1 %1365 }
 0xb3c   : > { %v1367_v53 = vrot.slane %v1366_v51, 1 }
 0xb3e   : > { %v2410_v4 = vmul.f32 -1.442695, %v1367_v53  ;;  %v2894_v53 = vmov -1e+09  }
 0xb5d   : > { %v1379_v48 = vpop.permute.xlu0 %1378 }
 0xb5e   : > { %v1381_v49 = vadd.f32 %v1379_v48, %v1375_v33  ;;  %v1652_v33 = vld [vmem:[#allocation11 + $0x8] sm:$0xff]  ;;  %v1651_v48 = vld [vmem:[#allocation11] sm:$0xff] }
 0xb60   : > { %2609 = vtanh.f32 %v1381_v49 }
 0xb61   : > { %2611 = vpow2.f32 %v2410_v4 }
 0xb6d   : > { %v2610_v50 = vpop.eup %2609 }
 0xb6e   : > { %1384 = vrot.lane.b32.xlu0 %v2610_v50, %s2891_s24  ;;  %v2612_v54 = vpop.eup %2611 }
 0xb6f   : > { %v1372_v55 = vadd.f32 1.0, %v2612_v54 }
 0xb71   : > { %2613 = vrcp.f32 %v1372_v55 }
 0xb7e   : > { %v2614_v56 = vpop.eup %2613 }
 0xbe0   : > { %v1385_v57 = vpop.permute.xlu0 %1384 }
 0xbe1   : > { %v1387_v58 = vmul.f32 %v2614_v56, %v1385_v57 }
 0xbe3   : > { %1388 = vst.msk [vmem:[#allocation3 + $0x5] sm:$0x1] %vm736_vm1, %v1387_v58  ;;  %2411 = vmatmul.mubr.msk.f32.vlgmr.msra.gmra.mxu1 %vm510_vm0, %v1387_v58 }
 0xbe4   : > { %1389 = vst.msk [vmem:[#allocation3 + $0x2] sm:$0x1] %vm738_vm2, %v1387_v58  ;;  %2439 = vmatpush3.msra.mxu1 %v1658_v17  ;;  %2454 = vmatprep.mubr.msk.f32.mxu1 %vm2893_vm3, %v2890_v0 }
 0xbe5   : > { %2440 = vmatprep.subr.mxu1 %v2890_v0 }
 0xbe6   : > { %2441 = vmatpush3.msra.mxu1 %v1657_v19 }
 0xbe7   : > { %2442 = vmatprep.subr.mxu1 %v2890_v0 }
 0xca3   : > { %v1461_v59 = vpop.f32.mrf.mxu1 }
 0xca5   : > { %v1463_v60 = vpop.f32.mrf.mxu1 }
 0xca6   : > { %v1468_v61 = vcombine.low %v1461_v59, %v1463_v60 }
 0xca8   : > { %v1475_v62 = vrot.slane %v1468_v61, %v3271_v52 }
 0xcaa   : > { %v1482_v63 = vrot.slane %v1475_v62, %v3271_v52 }
 0xcac   : > { %v1484_v2 = vadd.f32 %v1482_v63, %v1391_v1  ;;  %v2417_v63 = vld [vmem:[#allocation13] ss:$0 sm:$0xff] }
 0xcae   : > { %1495 = vrot.lane.b32.xlu0 %v1484_v2, %s2891_s24  ;;  %v2412_v3 = vmul.f32 -1.442695, %v1484_v2  ;;  %v1492_v5 = vrot.slane %v1484_v2, 1 }
 0xcb0   : > { %2615 = vpow2.f32 %v2412_v3 }
 0xcb1   : > { %2617 = vtanh.f32 %v1492_v5 }
 0xcbd   : > { %v2616_v7 = vpop.eup %2615 }
 0xcbe   : > { %v1488_v9 = vadd.f32 1.0, %v2616_v7  ;;  %v2618_v12 = vpop.eup %2617  ;;  %v3442_v7 = vld [vmem:[#allocation14] sm:$0xff] }
 0xcc0   : > { %2619 = vrcp.f32 %v1488_v9 }
 0xccd   : > { %v2620_v14 = vpop.eup %2619 }
 0xcce   : > { %v1506_v16 = vmul.f32 %v2620_v14, %v2618_v12  ;;  %v1505_v18 = vmul.f32 %v2620_v14, %v1381_v49  ;;  %v3426_v49 = vand.u32 127, %v500_v36 }
 0xcd0   : > { %1508 = vrot.lane.b32.xlu1 %v1506_v16, %s2891_s24  ;;  %vm3430_vm4 = vcmp.eq.s32.totalorder %v3266_v37, %v3426_v49  ;;  %vm1746_vm5 = vcmp.eq.s32.totalorder %v3426_v49, 3  ;;  %vm1747_vm6 = vcmp.lt.s32.totalorder %v3426_v49, 5 }
 0xcd1   : > { %v1748_v4 = vsel %vm1747_vm6, -10000.0, %v2894_v53 }
 0xd20   : > { %v1496_v26 = vpop.permute.xlu0 %1495 }
 0xd21   : > { %v1497_v28 = vrot.slane %v1496_v26, 1 }
 0xd23   : > { %v2413_v30 = vmul.f32 -1.442695, %v1497_v28 }
 0xd42   : > { %v1509_v20 = vpop.permute.xlu1 %1508 }
 0xd43   : > { %v1511_v22 = vadd.f32 %v1509_v20, %v1505_v18 }
 0xd45   : > { %2621 = vtanh.f32 %v1511_v22 }
 0xd46   : > { %2623 = vpow2.f32 %v2413_v30 }
 0xd52   : > { %v2622_v24 = vpop.eup %2621 }
 0xd53   : > { %1514 = vrot.lane.b32.xlu1 %v2622_v24, %s2891_s24  ;;  %v2624_v32 = vpop.eup %2623 }
 0xd54   : > { %v1502_v34 = vadd.f32 1.0, %v2624_v32 }
 0xd56   : > { %2625 = vrcp.f32 %v1502_v34 }
 0xd63   : > { %v2626_v35 = vpop.eup %2625 }
 0xdc5   : > { %v1515_v38 = vpop.permute.xlu1 %1514 }
 0xdc6   : > { %v1517_v39 = vmul.f32 %v2626_v35, %v1515_v38 }
 0xdc8   : > { %1518 = vst.msk [vmem:[#allocation3 + $0x6] sm:$0x1] %vm736_vm1, %v1517_v39  ;;  %2414 = vmatmul.mubr.msk.f32.vlgmr.msra.gmra.mxu0 %vm510_vm0, %v1517_v39 }
 0xdc9   : > { %1519 = vst.msk [vmem:[#allocation3 + $0x1] sm:$0x1] %vm738_vm2, %v1517_v39 }
 0xe88   : > { %v1591_v40 = vpop.f32.mrf.mxu0 }
 0xe8a   : > { %v1593_v41 = vpop.f32.mrf.mxu0 }
 0xe8b   : > { %v1598_v42 = vcombine.low %v1591_v40, %v1593_v41 }
 0xe8d   : > { %v1605_v43 = vrot.slane %v1598_v42, %v3271_v52 }
 0xe8f   : > { %v1612_v44 = vrot.slane %v1605_v43, %v3271_v52  ;;  %v1656_v52 = vld [vmem:[#allocation11 + $0x28] sm:$0xff] }
 0xe90   : > { %2443 = vmatpush3.msra.mxu1 %v1656_v52 }
 0xe91   : > { %v1614_v46 = vadd.f32 %v1612_v44, %v1521_v45  ;;  %2444 = vmatprep.subr.mxu1 %v2890_v0 }
 0xe92   : > { %2445 = vmatpush3.msra.mxu1 %v1655_v27 }
 0xe93   : > { %1625 = vrot.lane.b32.xlu1 %v1614_v46, %s2891_s24  ;;  %v2415_v47 = vmul.f32 -1.442695, %v1614_v46  ;;  %v1622_v6 = vrot.slane %v1614_v46, 1  ;;  %2446 = vmatprep.subr.mxu1 %v2890_v0 }
 0xe94   : > { %2447 = vmatpush3.msra.mxu1 %v1654_v29 }
 0xe95   : > { %2627 = vpow2.f32 %v2415_v47  ;;  %2448 = vmatprep.subr.mxu1 %v2890_v0 }
 0xe96   : > { %2629 = vtanh.f32 %v1622_v6  ;;  %2449 = vmatpush3.msra.mxu1 %v1653_v31 }
 0xe97   : > { %2450 = vmatprep.subr.mxu1 %v2890_v0 }
 0xe98   : > { %2451 = vmatpush3.msra.mxu1 %v1652_v33 }
 0xe99   : > { %2452 = vmatprep.subr.mxu1 %v2890_v0  ;;  %v1749_v0 = vsel %vm1746_vm5, 0.0, %v1748_v4 }
 0xe9a   : > { %2453 = vmatpush3.msra.mxu1 %v1651_v48  ;;  %v1750_v36 = vsel %vm3430_vm4, %v1749_v0, 0.0 }
 0xea2   : > { %v2628_v8 = vpop.eup %2627 }
 0xea3   : > { %v1618_v10 = vadd.f32 1.0, %v2628_v8  ;;  %v2630_v11 = vpop.eup %2629 }
 0xea5   : > { %2631 = vrcp.f32 %v1618_v10 }
 0xeb2   : > { %v2632_v13 = vpop.eup %2631 }
 0xeb3   : > { %v1636_v15 = vmul.f32 %v2632_v13, %v2630_v11  ;;  %v1635_v21 = vmul.f32 %v2632_v13, %v1511_v22 }
 0xeb5   : > { %1638 = vrot.lane.b32.xlu0 %v1636_v15, %s2891_s24 }
 0xeb7   : > { %1751 = vadd.xlane.f32.xlu1 %v1750_v36 }
 0xf05   : > { %v1626_v54 = vpop.permute.xlu1 %1625 }
 0xf06   : > { %v1627_v55 = vrot.slane %v1626_v54, 1 }
 0xf08   : > { %v2416_v56 = vmul.f32 -1.442695, %v1627_v55 }
 0xf27   : > { %v1639_v23 = vpop.permute.xlu0 %1638 }
 0xf28   : > { %v1641_v25 = vadd.f32 %v1639_v23, %v1635_v21 }
 0xf2a   : > { %2633 = vtanh.f32 %v1641_v25 }
 0xf2b   : > { %2635 = vpow2.f32 %v2416_v56 }
 0xf37   : > { %v2634_v50 = vpop.eup %2633 }
 0xf38   : > { %1644 = vrot.lane.b32.xlu0 %v2634_v50, %s2891_s24  ;;  %v2636_v57 = vpop.eup %2635 }
 0xf39   : > { %v1632_v58 = vadd.f32 1.0, %v2636_v57 }
 0xf3b   : > { %2637 = vrcp.f32 %v1632_v58 }
 0xf40   : > { %v1752_v5 = vpop.xlane.xlu1 %1751 }
 0xf48   : > { %v2638_v59 = vpop.eup %2637 }
 0xfaa   : > { %v1645_v60 = vpop.permute.xlu0 %1644 }
 0xfab   : > { %v1647_v61 = vmul.f32 %v2638_v59, %v1645_v60 }
 0xfad   : > { %1648 = vst.msk [vmem:[#allocation3 + $0x7] sm:$0x1] %vm736_vm1, %v1647_v61 }
 0xfae   : > { %1649 = vst.msk [vmem:[#allocation3] sm:$0x1] %vm738_vm2, %v1647_v61 }
 0xfb5   : > { %v1650_v62 = vld [vmem:[#allocation3] sm:$0xff] }
 0xfb6   : > { %2455 = vmatmul.mubr.msk.f32.vlgmr.msra.gmra.mxu1 %vm510_vm0, %v1650_v62 }
0x1076   : > { %v1735_v1 = vpop.f32.mrf.mxu1 }
0x1077   : > { %v1736_v2 = vadd.f32 %v2417_v63, %v1735_v1 }
0x1078   : > { %v2456_v3 = vpop.f32.mrf.mxu1 }
0x1079   : > { %1739 = vst [vmem:[#allocation4] sm:$0xff] %v1736_v2 }
0x1080   : > { %v2419_v9 = vld [vmem:[#allocation4] ss:$0 sm:$0xff]  ;;  %v2420_v46 = vld [vmem:[#allocation4 + $0x1] ss:$0 sm:$0xff]  ;;  %v2421_v60 = vld [vmem:[#allocation4 + $0x2] ss:$0 sm:$0xff] }
0x1081   : > { %v1758_v12 = vadd.f32 %v2419_v9, %v1752_v5 }
0x1083   : > { %v1759_v14 = vadd.f32 %v1758_v12, %v3442_v7 }
0x1085   : > { %v1760_v16 = vrot.slane %v1759_v14, 4 }
0x1087   : > { %v1761_v18 = vmax.f32 %v1759_v14, %v1760_v16 }
0x1089   : > { %v1762_v20 = vrot.slane %v1761_v18, 2 }
0x108b   : > { %v1763_v22 = vmax.f32 %v1761_v18, %v1762_v20 }
0x108d   : > { %v1764_v24 = vrot.slane %v1763_v22, 1 }
0x108f   : > { %v1765_v26 = vmax.f32 %v1763_v22, %v1764_v24 }
0x1091   : > { %v1778_v28 = vsub.f32 %v1759_v14, %v1765_v26 }
0x1093   : > { %v1779_v30 = vmul.f32 1.442695, %v1778_v28 }
0x1095   : > { %2639 = vpow2.f32 %v1779_v30 }
0x10a2   : > { %v2640_v32 = vpop.eup %2639 }
0x10a3   : > { %v1781_v34 = vrot.slane %v2640_v32, 4 }
0x10a5   : > { %v1782_v35 = vadd.f32 %v2640_v32, %v1781_v34 }
0x10a7   : > { %v1783_v38 = vrot.slane %v1782_v35, 2 }
0x10a9   : > { %v1784_v39 = vadd.f32 %v1783_v38, %v1782_v35 }
0x10ab   : > { %v1785_v40 = vrot.slane %v1784_v39, 1 }
0x10ad   : > { %v1786_v41 = vadd.f32 %v1785_v40, %v1784_v39 }
0x10af   : > { %2641 = vlog2.f32 %v1786_v41 }
0x10bc   : > { %v2642_v42 = vpop.eup %2641 }
0x10bd   : > { %v1788_v43 = vmul.f32 0.6931472, %v2642_v42 }
0x10bf   : > { %v1789_v44 = vadd.f32 %v1788_v43, %v1765_v26 }
0x10c1   : > { %v1790_v45 = vsel %vm3430_vm4, %v1789_v44, 0.0 }
0x10c2   : > { %1791 = vadd.xlane.f32.xlu0 %v1790_v45 }
0x114b   : > { %v1792_v47 = vpop.xlane.xlu0 %1791 }
0x114c   : > { %v1798_v6 = vadd.f32 %v2420_v46, %v1792_v47  ;;  %v2422_v46 = vld [vmem:[#allocation4 + $0x3] ss:$0 sm:$0xff] }
0x114e   : > { %v1799_v8 = vadd.f32 %v1798_v6, %v3442_v7 }
0x1150   : > { %v1800_v10 = vrot.slane %v1799_v8, 4 }
0x1152   : > { %v1801_v11 = vmax.f32 %v1799_v8, %v1800_v10 }
0x1154   : > { %v1802_v13 = vrot.slane %v1801_v11, 2 }
0x1156   : > { %v1803_v15 = vmax.f32 %v1801_v11, %v1802_v13 }
0x1158   : > { %v1804_v17 = vrot.slane %v1803_v15, 1 }
0x115a   : > { %v1805_v19 = vmax.f32 %v1803_v15, %v1804_v17 }
0x115c   : > { %v1818_v52 = vsub.f32 %v1799_v8, %v1805_v19  ;;  %vm1806_vm7 = vcmp.eq.f32.partialorder %v1799_v8, %v1805_v19 }
0x115d   : > { %v1807_v21 = vsel %vm1806_vm7, %v3266_v37, 8 }
0x115e   : > { %v1819_v23 = vmul.f32 1.442695, %v1818_v52  ;;  %v1808_v25 = vrot.slane %v1807_v21, 4 }
0x1160   : > { %2643 = vpow2.f32 %v1819_v23  ;;  %vm1809_vm8 = vcmp.lt.s32.totalorder %v1807_v21, %v1808_v25 }
0x1161   : > { %v1810_v27 = vsel %vm1809_vm8, %v1807_v21, %v1808_v25 }
0x1162   : > { %v1811_v29 = vrot.slane %v1810_v27, 2 }
0x1164   : > { %vm1812_vm9 = vcmp.lt.s32.totalorder %v1810_v27, %v1811_v29 }
0x1165   : > { %v1813_v31 = vsel %vm1812_vm9, %v1810_v27, %v1811_v29 }
0x1166   : > { %v1814_v33 = vrot.slane %v1813_v31, 1 }
0x1168   : > { %vm1815_vm10 = vcmp.lt.s32.totalorder %v1813_v31, %v1814_v33 }
0x1169   : > { %v1816_v48 = vsel %vm1815_vm10, %v1813_v31, %v1814_v33 }
0x116a   : > { %1817 = vst [vmem:[#allocation5 + $0x1] sm:$0x1] %v1816_v48 }
0x116d   : > { %v2644_v50 = vpop.eup %2643 }
0x116e   : > { %v1821_v53 = vrot.slane %v2644_v50, 4 }
0x1170   : > { %v1822_v4 = vadd.f32 %v2644_v50, %v1821_v53 }
0x1172   : > { %v1823_v0 = vrot.slane %v1822_v4, 2 }
0x1174   : > { %v1824_v36 = vadd.f32 %v1823_v0, %v1822_v4 }
0x1176   : > { %v1825_v54 = vrot.slane %v1824_v36, 1 }
0x1178   : > { %v1826_v55 = vadd.f32 %v1825_v54, %v1824_v36 }
0x117a   : > { %2645 = vlog2.f32 %v1826_v55 }
0x1187   : > { %v2646_v56 = vpop.eup %2645 }
0x1188   : > { %v1828_v57 = vmul.f32 0.6931472, %v2646_v56 }
0x118a   : > { %v1829_v58 = vadd.f32 %v1828_v57, %v1805_v19 }
0x118c   : > { %v1830_v59 = vsel %vm3430_vm4, %v1829_v58, 0.0 }
0x118d   : > { %1831 = vadd.xlane.f32.xlu0 %v1830_v59 }
0x1216   : > { %v1832_v61 = vpop.xlane.xlu0 %1831 }
0x1217   : > { %v1838_v62 = vadd.f32 %v2421_v60, %v1832_v61  ;;  %v2423_v60 = vld [vmem:[#allocation4 + $0x4] ss:$0 sm:$0xff] }
0x1219   : > { %v1839_v63 = vadd.f32 %v1838_v62, %v3442_v7 }
0x121b   : > { %v1840_v1 = vrot.slane %v1839_v63, 4 }
0x121d   : > { %v1841_v2 = vmax.f32 %v1839_v63, %v1840_v1 }
0x121f   : > { %v1842_v3 = vrot.slane %v1841_v2, 2 }
0x1221   : > { %v1843_v5 = vmax.f32 %v1841_v2, %v1842_v3 }
0x1223   : > { %v1844_v9 = vrot.slane %v1843_v5, 1 }
0x1225   : > { %v1845_v12 = vmax.f32 %v1843_v5, %v1844_v9 }
0x1227   : > { %v1858_v14 = vsub.f32 %v1839_v63, %v1845_v12  ;;  %vm1846_vm11 = vcmp.eq.f32.partialorder %v1839_v63, %v1845_v12 }
0x1228   : > { %v1847_v16 = vsel %vm1846_vm11, %v3266_v37, 8 }
0x1229   : > { %v1859_v18 = vmul.f32 1.442695, %v1858_v14  ;;  %v1848_v20 = vrot.slane %v1847_v16, 4 }
0x122b   : > { %2647 = vpow2.f32 %v1859_v18  ;;  %vm1849_vm12 = vcmp.lt.s32.totalorder %v1847_v16, %v1848_v20 }
0x122c   : > { %v1850_v22 = vsel %vm1849_vm12, %v1847_v16, %v1848_v20 }
0x122d   : > { %v1851_v24 = vrot.slane %v1850_v22, 2 }
0x122f   : > { %vm1852_vm13 = vcmp.lt.s32.totalorder %v1850_v22, %v1851_v24 }
0x1230   : > { %v1853_v26 = vsel %vm1852_vm13, %v1850_v22, %v1851_v24 }
0x1231   : > { %v1854_v28 = vrot.slane %v1853_v26, 1 }
0x1233   : > { %vm1855_vm14 = vcmp.lt.s32.totalorder %v1853_v26, %v1854_v28 }
0x1234   : > { %v1856_v30 = vsel %vm1855_vm14, %v1853_v26, %v1854_v28 }
0x1235   : > { %1857 = vst [vmem:[#allocation5 + $0x2] sm:$0x1] %v1856_v30 }
0x1238   : > { %v2648_v32 = vpop.eup %2647 }
0x1239   : > { %v1861_v34 = vrot.slane %v2648_v32, 4 }
0x123b   : > { %v1862_v35 = vadd.f32 %v2648_v32, %v1861_v34 }
0x123d   : > { %v1863_v38 = vrot.slane %v1862_v35, 2 }
0x123f   : > { %v1864_v39 = vadd.f32 %v1863_v38, %v1862_v35 }
0x1241   : > { %v1865_v40 = vrot.slane %v1864_v39, 1 }
0x1243   : > { %v1866_v41 = vadd.f32 %v1865_v40, %v1864_v39 }
0x1245   : > { %2649 = vlog2.f32 %v1866_v41 }
0x1252   : > { %v2650_v42 = vpop.eup %2649 }
0x1253   : > { %v1868_v43 = vmul.f32 0.6931472, %v2650_v42 }
0x1255   : > { %v1869_v44 = vadd.f32 %v1868_v43, %v1845_v12 }
0x1257   : > { %v1870_v45 = vsel %vm3430_vm4, %v1869_v44, 0.0 }
0x1258   : > { %1871 = vadd.xlane.f32.xlu1 %v1870_v45 }
0x12e1   : > { %v1872_v47 = vpop.xlane.xlu1 %1871 }
0x12e2   : > { %v1878_v6 = vadd.f32 %v2422_v46, %v1872_v47  ;;  %v2424_v46 = vld [vmem:[#allocation4 + $0x5] ss:$0 sm:$0xff] }
0x12e4   : > { %v1879_v8 = vadd.f32 %v1878_v6, %v3442_v7 }
0x12e6   : > { %v1880_v10 = vrot.slane %v1879_v8, 4 }
0x12e8   : > { %v1881_v11 = vmax.f32 %v1879_v8, %v1880_v10 }
0x12ea   : > { %v1882_v13 = vrot.slane %v1881_v11, 2 }
0x12ec   : > { %v1883_v15 = vmax.f32 %v1881_v11, %v1882_v13 }
0x12ee   : > { %v1884_v17 = vrot.slane %v1883_v15, 1 }
0x12f0   : > { %v1885_v19 = vmax.f32 %v1883_v15, %v1884_v17 }
0x12f2   : > { %v1898_v52 = vsub.f32 %v1879_v8, %v1885_v19  ;;  %vm1886_vm15 = vcmp.eq.f32.partialorder %v1879_v8, %v1885_v19 }
0x12f3   : > { %v1887_v21 = vsel %vm1886_vm15, %v3266_v37, 8 }
0x12f4   : > { %v1899_v23 = vmul.f32 1.442695, %v1898_v52  ;;  %v1888_v25 = vrot.slane %v1887_v21, 4 }
0x12f6   : > { %2651 = vpow2.f32 %v1899_v23  ;;  %vm1889_vm0 = vcmp.lt.s32.totalorder %v1887_v21, %v1888_v25 }
0x12f7   : > { %v1890_v27 = vsel %vm1889_vm0, %v1887_v21, %v1888_v25 }
0x12f8   : > { %v1891_v29 = vrot.slane %v1890_v27, 2 }
0x12fa   : > { %vm1892_vm1 = vcmp.lt.s32.totalorder %v1890_v27, %v1891_v29 }
0x12fb   : > { %v1893_v31 = vsel %vm1892_vm1, %v1890_v27, %v1891_v29 }
0x12fc   : > { %v1894_v33 = vrot.slane %v1893_v31, 1 }
0x12fe   : > { %vm1895_vm2 = vcmp.lt.s32.totalorder %v1893_v31, %v1894_v33 }
0x12ff   : > { %v1896_v48 = vsel %vm1895_vm2, %v1893_v31, %v1894_v33 }
0x1300   : > { %1897 = vst [vmem:[#allocation5 + $0x3] sm:$0x1] %v1896_v48 }
0x1303   : > { %v2652_v50 = vpop.eup %2651 }
0x1304   : > { %v1901_v53 = vrot.slane %v2652_v50, 4 }
0x1306   : > { %v1902_v4 = vadd.f32 %v2652_v50, %v1901_v53 }
0x1308   : > { %v1903_v0 = vrot.slane %v1902_v4, 2 }
0x130a   : > { %v1904_v36 = vadd.f32 %v1903_v0, %v1902_v4 }
0x130c   : > { %v1905_v54 = vrot.slane %v1904_v36, 1 }
0x130e   : > { %v1906_v55 = vadd.f32 %v1905_v54, %v1904_v36 }
0x1310   : > { %2653 = vlog2.f32 %v1906_v55 }
0x131d   : > { %v2654_v56 = vpop.eup %2653 }
0x131e   : > { %v1908_v57 = vmul.f32 0.6931472, %v2654_v56 }
0x1320   : > { %v1909_v58 = vadd.f32 %v1908_v57, %v1885_v19 }
0x1322   : > { %v1910_v59 = vsel %vm3430_vm4, %v1909_v58, 0.0 }
0x1323   : > { %1911 = vadd.xlane.f32.xlu0 %v1910_v59 }
0x13ac   : > { %v1912_v61 = vpop.xlane.xlu0 %1911 }
0x13ad   : > { %v1918_v62 = vadd.f32 %v2423_v60, %v1912_v61  ;;  %v2425_v60 = vld [vmem:[#allocation4 + $0x6] ss:$0 sm:$0xff] }
0x13af   : > { %v1919_v63 = vadd.f32 %v1918_v62, %v3442_v7 }
0x13b1   : > { %v1920_v1 = vrot.slane %v1919_v63, 4 }
0x13b3   : > { %v1921_v2 = vmax.f32 %v1919_v63, %v1920_v1 }
0x13b5   : > { %v1922_v3 = vrot.slane %v1921_v2, 2 }
0x13b7   : > { %v1923_v5 = vmax.f32 %v1921_v2, %v1922_v3 }
0x13b9   : > { %v1924_v9 = vrot.slane %v1923_v5, 1 }
0x13bb   : > { %v1925_v12 = vmax.f32 %v1923_v5, %v1924_v9 }
0x13bd   : > { %v1938_v14 = vsub.f32 %v1919_v63, %v1925_v12  ;;  %vm1926_vm3 = vcmp.eq.f32.partialorder %v1919_v63, %v1925_v12 }
0x13be   : > { %v1927_v16 = vsel %vm1926_vm3, %v3266_v37, 8  ;;  %vm2072_vm3 = vcmask 1040384  }
0x13bf   : > { %v1939_v18 = vmul.f32 1.442695, %v1938_v14  ;;  %v1928_v20 = vrot.slane %v1927_v16, 4 }
0x13c1   : > { %2655 = vpow2.f32 %v1939_v18  ;;  %vm1929_vm5 = vcmp.lt.s32.totalorder %v1927_v16, %v1928_v20 }
0x13c2   : > { %v1930_v22 = vsel %vm1929_vm5, %v1927_v16, %v1928_v20 }
0x13c3   : > { %v1931_v24 = vrot.slane %v1930_v22, 2 }
0x13c5   : > { %vm1932_vm6 = vcmp.lt.s32.totalorder %v1930_v22, %v1931_v24 }
0x13c6   : > { %v1933_v26 = vsel %vm1932_vm6, %v1930_v22, %v1931_v24 }
0x13c7   : > { %v1934_v28 = vrot.slane %v1933_v26, 1 }
0x13c9   : > { %vm1935_vm7 = vcmp.lt.s32.totalorder %v1933_v26, %v1934_v28 }
0x13ca   : > { %v1936_v30 = vsel %vm1935_vm7, %v1933_v26, %v1934_v28  ;;  %vm2102_vm7 = vcmask 0  }
0x13cb   : > { %1937 = vst [vmem:[#allocation5 + $0x4] sm:$0x1] %v1936_v30 }
0x13ce   : > { %v2656_v32 = vpop.eup %2655 }
0x13cf   : > { %v1941_v34 = vrot.slane %v2656_v32, 4 }
0x13d1   : > { %v1942_v35 = vadd.f32 %v2656_v32, %v1941_v34 }
0x13d3   : > { %v1943_v38 = vrot.slane %v1942_v35, 2 }
0x13d5   : > { %v1944_v39 = vadd.f32 %v1943_v38, %v1942_v35 }
0x13d7   : > { %v1945_v40 = vrot.slane %v1944_v39, 1 }
0x13d9   : > { %v1946_v41 = vadd.f32 %v1945_v40, %v1944_v39 }
0x13db   : > { %2657 = vlog2.f32 %v1946_v41 }
0x13e8   : > { %v2658_v42 = vpop.eup %2657 }
0x13e9   : > { %v1948_v43 = vmul.f32 0.6931472, %v2658_v42 }
0x13eb   : > { %v1949_v44 = vadd.f32 %v1948_v43, %v1925_v12 }
0x13ed   : > { %v1950_v45 = vsel %vm3430_vm4, %v1949_v44, 0.0 }
0x13ee   : > { %1951 = vadd.xlane.f32.xlu1 %v1950_v45 }
0x1477   : > { %v1952_v47 = vpop.xlane.xlu1 %1951 }
0x1478   : > { %v1958_v6 = vadd.f32 %v2424_v46, %v1952_v47  ;;  %v2426_v46 = vld [vmem:[#allocation4 + $0x7] ss:$0 sm:$0xff] }
0x147a   : > { %v1959_v8 = vadd.f32 %v1958_v6, %v3442_v7 }
0x147c   : > { %v1960_v10 = vrot.slane %v1959_v8, 4 }
0x147e   : > { %v1961_v11 = vmax.f32 %v1959_v8, %v1960_v10 }
0x1480   : > { %v1962_v13 = vrot.slane %v1961_v11, 2 }
0x1482   : > { %v1963_v15 = vmax.f32 %v1961_v11, %v1962_v13 }
0x1484   : > { %v1964_v17 = vrot.slane %v1963_v15, 1 }
0x1486   : > { %v1965_v19 = vmax.f32 %v1963_v15, %v1964_v17 }
0x1488   : > { %v1978_v52 = vsub.f32 %v1959_v8, %v1965_v19  ;;  %vm1966_vm8 = vcmp.eq.f32.partialorder %v1959_v8, %v1965_v19 }
0x1489   : > { %v1967_v21 = vsel %vm1966_vm8, %v3266_v37, 8 }
0x148a   : > { %v1979_v23 = vmul.f32 1.442695, %v1978_v52  ;;  %v1968_v25 = vrot.slane %v1967_v21, 4 }
0x148c   : > { %2659 = vpow2.f32 %v1979_v23  ;;  %vm1969_vm9 = vcmp.lt.s32.totalorder %v1967_v21, %v1968_v25 }
0x148d   : > { %v1970_v27 = vsel %vm1969_vm9, %v1967_v21, %v1968_v25 }
0x148e   : > { %v1971_v29 = vrot.slane %v1970_v27, 2 }
0x1490   : > { %vm1972_vm10 = vcmp.lt.s32.totalorder %v1970_v27, %v1971_v29 }
0x1491   : > { %v1973_v31 = vsel %vm1972_vm10, %v1970_v27, %v1971_v29 }
0x1492   : > { %v1974_v33 = vrot.slane %v1973_v31, 1 }
0x1494   : > { %vm1975_vm11 = vcmp.lt.s32.totalorder %v1973_v31, %v1974_v33 }
0x1495   : > { %v1976_v48 = vsel %vm1975_vm11, %v1973_v31, %v1974_v33 }
0x1496   : > { %1977 = vst [vmem:[#allocation5 + $0x5] sm:$0x1] %v1976_v48 }
0x1499   : > { %v2660_v50 = vpop.eup %2659 }
0x149a   : > { %v1981_v53 = vrot.slane %v2660_v50, 4 }
0x149c   : > { %v1982_v4 = vadd.f32 %v2660_v50, %v1981_v53 }
0x149e   : > { %v1983_v0 = vrot.slane %v1982_v4, 2 }
0x14a0   : > { %v1984_v36 = vadd.f32 %v1983_v0, %v1982_v4 }
0x14a2   : > { %v1985_v54 = vrot.slane %v1984_v36, 1 }
0x14a4   : > { %v1986_v55 = vadd.f32 %v1985_v54, %v1984_v36 }
0x14a6   : > { %2661 = vlog2.f32 %v1986_v55  ;;  %v2070_v55 = vld [vmem:[#allocation16] sm:$0x1] }
0x14b3   : > { %v2662_v56 = vpop.eup %2661 }
0x14b4   : > { %v1988_v57 = vmul.f32 0.6931472, %v2662_v56 }
0x14b6   : > { %v1989_v58 = vadd.f32 %v1988_v57, %v1965_v19 }
0x14b8   : > { %v1990_v59 = vsel %vm3430_vm4, %v1989_v58, 0.0 }
0x14b9   : > { %1991 = vadd.xlane.f32.xlu0 %v1990_v59 }
0x1542   : > { %v1992_v61 = vpop.xlane.xlu0 %1991 }
0x1543   : > { %v1998_v62 = vadd.f32 %v2425_v60, %v1992_v61 }
0x1545   : > { %v1999_v63 = vadd.f32 %v1998_v62, %v3442_v7 }
0x1547   : > { %v2000_v1 = vrot.slane %v1999_v63, 4 }
0x1549   : > { %v2001_v2 = vmax.f32 %v1999_v63, %v2000_v1 }
0x154b   : > { %v2002_v3 = vrot.slane %v2001_v2, 2 }
0x154d   : > { %v2003_v5 = vmax.f32 %v2001_v2, %v2002_v3 }
0x154f   : > { %v2004_v9 = vrot.slane %v2003_v5, 1 }
0x1551   : > { %v2005_v12 = vmax.f32 %v2003_v5, %v2004_v9 }
0x1553   : > { %v2018_v14 = vsub.f32 %v1999_v63, %v2005_v12  ;;  %vm2006_vm12 = vcmp.eq.f32.partialorder %v1999_v63, %v2005_v12 }
0x1554   : > { %v2007_v16 = vsel %vm2006_vm12, %v3266_v37, 8 }
0x1555   : > { %v2019_v18 = vmul.f32 1.442695, %v2018_v14  ;;  %v2008_v20 = vrot.slane %v2007_v16, 4 }
0x1557   : > { %2663 = vpow2.f32 %v2019_v18  ;;  %vm2009_vm13 = vcmp.lt.s32.totalorder %v2007_v16, %v2008_v20 }
0x1558   : > { %v2010_v22 = vsel %vm2009_vm13, %v2007_v16, %v2008_v20 }
0x1559   : > { %v2011_v24 = vrot.slane %v2010_v22, 2 }
0x155b   : > { %vm2012_vm14 = vcmp.lt.s32.totalorder %v2010_v22, %v2011_v24 }
0x155c   : > { %v2013_v26 = vsel %vm2012_vm14, %v2010_v22, %v2011_v24 }
0x155d   : > { %v2014_v28 = vrot.slane %v2013_v26, 1 }
0x155f   : > { %vm2015_vm15 = vcmp.lt.s32.totalorder %v2013_v26, %v2014_v28 }
0x1560   : > { %v2016_v30 = vsel %vm2015_vm15, %v2013_v26, %v2014_v28 }
0x1561   : > { %2017 = vst [vmem:[#allocation5 + $0x6] sm:$0x1] %v2016_v30 }
0x1564   : > { %v2664_v32 = vpop.eup %2663 }
0x1565   : > { %v2021_v34 = vrot.slane %v2664_v32, 4 }
0x1567   : > { %v2022_v35 = vadd.f32 %v2664_v32, %v2021_v34 }
0x1569   : > { %v2023_v38 = vrot.slane %v2022_v35, 2 }
0x156b   : > { %v2024_v39 = vadd.f32 %v2023_v38, %v2022_v35 }
0x156d   : > { %v2025_v40 = vrot.slane %v2024_v39, 1 }
0x156f   : > { %v2026_v41 = vadd.f32 %v2025_v40, %v2024_v39 }
0x1571   : > { %2665 = vlog2.f32 %v2026_v41 }
0x157e   : > { %v2666_v42 = vpop.eup %2665 }
0x157f   : > { %v2028_v43 = vmul.f32 0.6931472, %v2666_v42  ;;  %v2122_v42 = vld [vmem:[#allocation5 + $0x6] sm:$0x1] }
0x1581   : > { %v2029_v44 = vadd.f32 %v2028_v43, %v2005_v12 }
0x1583   : > { %v2030_v45 = vsel %vm3430_vm4, %v2029_v44, 0.0 }
0x1584   : > { %2031 = vadd.xlane.f32.xlu1 %v2030_v45 }
0x160d   : > { %v2032_v47 = vpop.xlane.xlu1 %2031 }
0x160e   : > { %v2038_v6 = vadd.f32 %v2426_v46, %v2032_v47 }
0x1610   : > { %v2039_v8 = vadd.f32 %v2038_v6, %v3442_v7 }
0x1612   : > { %v2040_v10 = vrot.slane %v2039_v8, 4 }
0x1614   : > { %v2041_v11 = vmax.f32 %v2039_v8, %v2040_v10 }
0x1616   : > { %v2042_v13 = vrot.slane %v2041_v11, 2 }
0x1618   : > { %v2043_v15 = vmax.f32 %v2041_v11, %v2042_v13 }
0x161a   : > { %v2044_v17 = vrot.slane %v2043_v15, 1 }
0x161c   : > { %v2045_v19 = vmax.f32 %v2043_v15, %v2044_v17 }
0x161e   : > { %vm2046_vm0 = vcmp.eq.f32.partialorder %v2039_v8, %v2045_v19  ;;  %v2058_v52 = vsub.f32 %v2039_v8, %v2045_v19 }
0x161f   : > { %v2047_v21 = vsel %vm2046_vm0, %v3266_v37, 8 }
0x1620   : > { %v2048_v23 = vrot.slane %v2047_v21, 4  ;;  %v2059_v25 = vmul.f32 1.442695, %v2058_v52 }
0x1622   : > { %vm2049_vm1 = vcmp.lt.s32.totalorder %v2047_v21, %v2048_v23  ;;  %2667 = vpow2.f32 %v2059_v25 }
0x1623   : > { %v2050_v51 = vsel %vm2049_vm1, %v2047_v21, %v2048_v23 }
0x1624   : > { %v2051_v27 = vrot.slane %v2050_v51, 2 }
0x1626   : > { %vm2052_vm4 = vcmp.lt.s32.totalorder %v2050_v51, %v2051_v27 }
0x1627   : > { %v2053_v29 = vsel %vm2052_vm4, %v2050_v51, %v2051_v27 }
0x1628   : > { %v2054_v31 = vrot.slane %v2053_v29, 1 }
0x162a   : > { %vm2055_vm2 = vcmp.lt.s32.totalorder %v2053_v29, %v2054_v31 }
0x162b   : > { %v2056_v7 = vsel %vm2055_vm2, %v2053_v29, %v2054_v31 }
0x162c   : > { %2057 = vst [vmem:[#allocation5 + $0x7] sm:$0x1] %v2056_v7 }
0x162f   : > { %v2668_v33 = vpop.eup %2667 }
0x1630   : > { %v2061_v48 = vrot.slane %v2668_v33, 4 }
0x1632   : > { %v2062_v50 = vadd.f32 %v2668_v33, %v2061_v48 }
0x1633   : > { %v2105_v20 = vld [vmem:[#allocation5 + $0x7] sm:$0x1] }
0x1634   : > { %v2063_v53 = vrot.slane %v2062_v50, 2 }
0x1636   : > { %v2064_v4 = vadd.f32 %v2063_v53, %v2062_v50  ;;  %v2156_v53 = vld [vmem:[#allocation5 + $0x4] sm:$0x1] }
0x1638   : > { %v2065_v0 = vrot.slane %v2064_v4, 1 }
0x163a   : > { %v2066_v36 = vadd.f32 %v2065_v0, %v2064_v4 }
0x163c   : > { %2669 = vlog2.f32 %v2066_v36 }
0x1649   : > { %v2670_v37 = vpop.eup %2669 }
0x164a   : > { %v2068_v54 = vmul.f32 0.6931472, %v2670_v37 }
0x164c   : > { %v2069_v56 = vadd.f32 %v2068_v54, %v2045_v19  ;;  %v2139_v19 = vld [vmem:[#allocation5 + $0x5] sm:$0x1] }
0x164e   : > { %v3473_v57 = vadd.f32 %v2070_v55, %v2069_v56 }
0x1650   : > { %v2073_v58 = vsel %vm2072_vm3, %v3473_v57, -inf }
0x1651   : > { %2074 = vmax.xlane.f32.xlu0 %v2073_v58 }
0x16da   : > { %v3477_v59 = vpop.xlane.xlu0 %2074 }
0x16db   : > { %vm2076_vm5 = vcmp.eq.f32.partialorder %v3473_v57, %v3477_v59 }
0x16dc   : > { %v2077_v60 = vsel %vm2076_vm5, %v3426_v49, 128 }
0x16dd   : > { %v2078_v61 = vsel %vm2072_vm3, %v2077_v60, 2147483647 }
0x16de   : > { %v2080_v62 = vshra.s32 %v2078_v61, 16  ;;  %v2079_v1 = vand.u32 65535, %v2078_v61 }
0x16e0   : > { %v2082_v63 = vcvt.s32.f32 %v2080_v62  ;;  %v2081_v3 = vcvt.s32.f32 %v2079_v1  ;;  %v2173_v1 = vld [vmem:[#allocation5 + $0x3] sm:$0x1] }
0x16e2   : > { %2083 = vmin.xlane.f32.xlu1 %v2082_v63 }
0x176b   : > { %v2084_v2 = vpop.xlane.xlu1 %2083 }
0x176c   : > { %vm2085_vm6 = vcmp.eq.f32.partialorder %v2082_v63, %v2084_v2  ;;  %v2090_v9 = vcvt.f32.s32 %v2084_v2 }
0x176d   : > { %v2086_v5 = vsel %vm2085_vm6, %v2081_v3, inf }
0x176e   : > { %2087 = vmin.xlane.f32.xlu0 %v2086_v5  ;;  %v2091_v14 = vshll.u32 %v2090_v9, 16 }
0x17f7   : > { %v2088_v12 = vpop.xlane.xlu0 %2087 }
0x17f8   : > { %v2089_v16 = vcvt.f32.s32 %v2088_v12 }
0x17fa   : > { %v2092_v18 = vadd.s32 %v2091_v14, %v2089_v16  ;;  %v2093_v16 = vsub.f32 %v3473_v57, %v3477_v59 }
0x17fc   : > { %2104 = vst.msk [vmem:[%s3488_s19 + $0x7] sm:$0x1] %vm2102_vm7, %v2092_v18  ;;  %vm2106_vm8 = vcmp.eq.s32.totalorder %v3426_v49, %v2092_v18  ;;  %v2094_v18 = vmul.f32 1.442695, %v2093_v16 }
0x17fd   : > { %v2107_v22 = vsel %vm2106_vm8, %v2105_v20, 0 }
0x17fe   : > { %v2108_v24 = vsel %vm2072_vm3, %v2107_v22, 0  ;;  %2671 = vpow2.f32 %v2094_v18 }
0x17ff   : > { %v2110_v26 = vshrl.u32 %v2108_v24, 16  ;;  %v2109_v28 = vand.u32 65535, %v2108_v24 }
0x1801   : > { %v2112_v30 = vcvt.s32.f32 %v2110_v26  ;;  %v2111_v32 = vcvt.s32.f32 %v2109_v28 }
0x1803   : > { %2115 = vadd.xlane.f32.xlu1 %v2112_v30  ;;  %2113 = vadd.xlane.f32.xlu0 %v2111_v32  ;;  %v2190_v32 = vld [vmem:[#allocation5 + $0x2] sm:$0x1] }
0x188c   : > { %v2116_v34 = vpop.xlane.xlu1 %2115  ;;  %v2114_v35 = vpop.xlane.xlu0 %2113 }
0x188d   : > { %v2118_v38 = vcvt.f32.s32 %v2116_v34  ;;  %v2117_v40 = vcvt.f32.s32 %v2114_v35 }
0x188f   : > { %v2119_v39 = vshll.u32 %v2118_v38, 16 }
0x1891   : > { %v2120_v41 = vadd.s32 %v2119_v39, %v2117_v40 }
0x1893   : > { %2121 = vst.msk [vmem:[%s3488_s19 + $0x6] sm:$0x1] %vm2102_vm7, %v2120_v41  ;;  %vm2123_vm9 = vcmp.eq.s32.totalorder %v3426_v49, %v2120_v41  ;;  %v2672_v41 = vpop.eup %2671 }
0x1894   : > { %v2124_v43 = vsel %vm2123_vm9, %v2122_v42, 0  ;;  %v2096_v42 = vsel %vm2072_vm3, %v2672_v41, 0.0 }
0x1895   : > { %v2125_v44 = vsel %vm2072_vm3, %v2124_v43, 0 }
0x1896   : > { %v2127_v45 = vshrl.u32 %v2125_v44, 16  ;;  %v2126_v46 = vand.u32 65535, %v2125_v44 }
0x1898   : > { %v2129_v47 = vcvt.s32.f32 %v2127_v45  ;;  %v2128_v6 = vcvt.s32.f32 %v2126_v46 }
0x189a   : > { %2132 = vadd.xlane.f32.xlu1 %v2129_v47  ;;  %2130 = vadd.xlane.f32.xlu0 %v2128_v6 }
0x1923   : > { %v2133_v8 = vpop.xlane.xlu1 %2132  ;;  %v2131_v10 = vpop.xlane.xlu0 %2130 }
0x1924   : > { %v2135_v11 = vcvt.f32.s32 %v2133_v8  ;;  %v2134_v15 = vcvt.f32.s32 %v2131_v10  ;;  %v2207_v10 = vld [vmem:[#allocation5 + $0x1] sm:$0x1] }
0x1926   : > { %v2136_v13 = vshll.u32 %v2135_v11, 16 }
0x1928   : > { %v2137_v17 = vadd.s32 %v2136_v13, %v2134_v15 }
0x192a   : > { %2138 = vst.msk [vmem:[%s3488_s19 + $0x5] sm:$0x1] %vm2102_vm7, %v2137_v17  ;;  %vm2140_vm10 = vcmp.eq.s32.totalorder %v3426_v49, %v2137_v17 }
0x192b   : > { %v2141_v52 = vsel %vm2140_vm10, %v2139_v19, 0 }
0x192c   : > { %v2142_v21 = vsel %vm2072_vm3, %v2141_v52, 0 }
0x192d   : > { %v2144_v23 = vshrl.u32 %v2142_v21, 16  ;;  %v2143_v25 = vand.u32 65535, %v2142_v21 }
0x192f   : > { %v2146_v51 = vcvt.s32.f32 %v2144_v23  ;;  %v2145_v27 = vcvt.s32.f32 %v2143_v25 }
0x1931   : > { %2149 = vadd.xlane.f32.xlu1 %v2146_v51  ;;  %2147 = vadd.xlane.f32.xlu0 %v2145_v27 }
0x19ba   : > { %v2150_v29 = vpop.xlane.xlu1 %2149  ;;  %v2148_v31 = vpop.xlane.xlu0 %2147 }
0x19bb   : > { %v2152_v7 = vcvt.f32.s32 %v2150_v29  ;;  %v2151_v48 = vcvt.f32.s32 %v2148_v31 }
0x19bd   : > { %v2153_v33 = vshll.u32 %v2152_v7, 16 }
0x19bf   : > { %v2154_v50 = vadd.s32 %v2153_v33, %v2151_v48 }
0x19c1   : > { %2155 = vst.msk [vmem:[%s3488_s19 + $0x4] sm:$0x1] %vm2102_vm7, %v2154_v50  ;;  %vm2157_vm11 = vcmp.eq.s32.totalorder %v3426_v49, %v2154_v50 }
0x19c2   : > { %v2158_v4 = vsel %vm2157_vm11, %v2156_v53, 0 }
0x19c3   : > { %v2159_v0 = vsel %vm2072_vm3, %v2158_v4, 0 }
0x19c4   : > { %v2161_v36 = vshrl.u32 %v2159_v0, 16  ;;  %v2160_v37 = vand.u32 65535, %v2159_v0 }
0x19c6   : > { %v2163_v54 = vcvt.s32.f32 %v2161_v36  ;;  %v2162_v55 = vcvt.s32.f32 %v2160_v37 }
0x19c8   : > { %2166 = vadd.xlane.f32.xlu1 %v2163_v54  ;;  %2164 = vadd.xlane.f32.xlu0 %v2162_v55 }
0x1a51   : > { %v2167_v56 = vpop.xlane.xlu1 %2166  ;;  %v2165_v58 = vpop.xlane.xlu0 %2164 }
0x1a52   : > { %v2169_v60 = vcvt.f32.s32 %v2167_v56  ;;  %v2168_v62 = vcvt.f32.s32 %v2165_v58 }
0x1a54   : > { %v2170_v61 = vshll.u32 %v2169_v60, 16 }
0x1a56   : > { %v2171_v63 = vadd.s32 %v2170_v61, %v2168_v62 }
0x1a58   : > { %2172 = vst.msk [vmem:[%s3488_s19 + $0x3] sm:$0x1] %vm2102_vm7, %v2171_v63  ;;  %vm2174_vm12 = vcmp.eq.s32.totalorder %v3426_v49, %v2171_v63 }
0x1a59   : > { %v2175_v2 = vsel %vm2174_vm12, %v2173_v1, 0 }
0x1a5a   : > { %v2176_v3 = vsel %vm2072_vm3, %v2175_v2, 0 }
0x1a5b   : > { %v2178_v5 = vshrl.u32 %v2176_v3, 16  ;;  %v2177_v9 = vand.u32 65535, %v2176_v3 }
0x1a5d   : > { %v2180_v12 = vcvt.s32.f32 %v2178_v5  ;;  %v2179_v14 = vcvt.s32.f32 %v2177_v9 }
0x1a5f   : > { %2183 = vadd.xlane.f32.xlu1 %v2180_v12  ;;  %2181 = vadd.xlane.f32.xlu0 %v2179_v14 }
0x1ae8   : > { %v2184_v20 = vpop.xlane.xlu1 %2183  ;;  %v2182_v22 = vpop.xlane.xlu0 %2181 }
0x1ae9   : > { %v2186_v24 = vcvt.f32.s32 %v2184_v20  ;;  %v2185_v28 = vcvt.f32.s32 %v2182_v22 }
0x1aeb   : > { %v2187_v26 = vshll.u32 %v2186_v24, 16 }
0x1aed   : > { %v2188_v30 = vadd.s32 %v2187_v26, %v2185_v28 }
0x1aef   : > { %2189 = vst.msk [vmem:[%s3488_s19 + $0x2] sm:$0x1] %vm2102_vm7, %v2188_v30  ;;  %vm2191_vm13 = vcmp.eq.s32.totalorder %v3426_v49, %v2188_v30 }
0x1af0   : > { %v2192_v34 = vsel %vm2191_vm13, %v2190_v32, 0 }
0x1af1   : > { %v2193_v35 = vsel %vm2072_vm3, %v2192_v34, 0 }
0x1af2   : > { %v2195_v38 = vshrl.u32 %v2193_v35, 16  ;;  %v2194_v39 = vand.u32 65535, %v2193_v35 }
0x1af4   : > { %v2197_v57 = vcvt.s32.f32 %v2195_v38  ;;  %v2196_v40 = vcvt.s32.f32 %v2194_v39 }
0x1af6   : > { %2200 = vadd.xlane.f32.xlu1 %v2197_v57  ;;  %2198 = vadd.xlane.f32.xlu0 %v2196_v40 }
0x1afa   : > { %2097 = vadd.xlane.f32.xlu1 %v2096_v42 }
0x1b7f   : > { %v2201_v43 = vpop.xlane.xlu1 %2200  ;;  %v2199_v44 = vpop.xlane.xlu0 %2198 }
0x1b80   : > { %v2203_v45 = vcvt.f32.s32 %v2201_v43  ;;  %v2202_v47 = vcvt.f32.s32 %v2199_v44 }
0x1b82   : > { %v2204_v46 = vshll.u32 %v2203_v45, 16 }
0x1b83   : > { %v2098_v6 = vpop.xlane.xlu1 %2097 }
0x1b84   : > { %v2205_v8 = vadd.s32 %v2204_v46, %v2202_v47  ;;  %2673 = vlog2.f32 %v2098_v6 }
0x1b86   : > { %2206 = vst.msk [vmem:[%s3488_s19 + $0x1] sm:$0x1] %vm2102_vm7, %v2205_v8  ;;  %vm2208_vm14 = vcmp.eq.s32.totalorder %v3426_v49, %v2205_v8 }
0x1b87   : > { %v2209_v11 = vsel %vm2208_vm14, %v2207_v10, 0 }
0x1b88   : > { %v2210_v13 = vsel %vm2072_vm3, %v2209_v11, 0 }
0x1b89   : > { %v2212_v15 = vshrl.u32 %v2210_v13, 16  ;;  %v2211_v17 = vand.u32 65535, %v2210_v13 }
0x1b8b   : > { %v2214_v19 = vcvt.s32.f32 %v2212_v15  ;;  %v2213_v52 = vcvt.s32.f32 %v2211_v17 }
0x1b8d   : > { %2217 = vadd.xlane.f32.xlu0 %v2214_v19  ;;  %2215 = vadd.xlane.f32.xlu1 %v2213_v52 }
0x1b91   : > { %v2674_v21 = vpop.eup %2673 }
0x1b92   : > { %v2100_v23 = vmul.f32 0.6931472, %v2674_v21 }
0x1b94   : > { %v2101_v25 = vadd.f32 %v2100_v23, %v3477_v59 }
0x1b96   : > { %2103 = vst.msk [vmem:[%s480_s28] sm:$0x1] %vm2102_vm7, %v2101_v25 }
0x1c16   : > { %v2218_v49 = vpop.xlane.xlu0 %2217  ;;  %v2216_v51 = vpop.xlane.xlu1 %2215 }
0x1c17   : > { %v2220_v27 = vcvt.f32.s32 %v2218_v49  ;;  %v2219_v31 = vcvt.f32.s32 %v2216_v51 }
0x1c19   : > { %v2221_v29 = vshll.u32 %v2220_v27, 16 }
0x1c1b   : > { %v2222_v7 = vadd.s32 %v2221_v29, %v2219_v31 }
0x1c1d   : > { %2223 = vst.msk [vmem:[%s3488_s19] sm:$0x1] %vm2102_vm7, %v2222_v7 }
0x1c1e PF: > { %s26_s17 = sadd.s32 1, %s2879_s17  }
0x1c1f   : > { %p23_p10 = scmp.ge.s32.totalorder %s26_s17, 4  }
0x1c21   :  { %25 = sbr.rel (!%p23_p10) target bundleno = 4 (0x4), region = 138 }
0x1c26   :  { %2255 = vsyncpa [#allocation7], 1 }
0x1c27   :  { %2257 = vsyncpa [#allocation7 + $0x1], 1 }
0x1c28   :  { %2258 = vsyncpa [#allocation9], 1 }
0x1c29   :  { %2259 = vsyncpa [#allocation12], 1 }
0x1c2a   :  { %2260 = vsyncpa [#allocation15], 1 }

</bundles_post_ra>
